<compile_context>
chip_gen: v7x
topology: tpu7x:2x2x1
jax: 0.10.0
libtpu: 0.0.40
codegen_flags: <defaults>
</compile_context>

<pallas_src>
import functools

import jax
import jax.numpy as jnp
import numpy as np
from jax.experimental import pallas as pl
from jax.experimental.pallas import tpu as pltpu


# Fused layer schedule: (activation, residual)
#   backbone: stem(relu), 3 x residual(relu), head(none)
#   upsample: ConvT1(silu), ConvT2(silu), [ConvT3 . Conv1x1] folded (none)
_LAYER_CFG = (
    ("relu", False),
    ("relu", True),
    ("relu", True),
    ("relu", True),
    (None, False),
    ("silu", False),
    ("silu", False),
    (None, False),
)


# ----------------------------------------------------------------------------
# Pallas kernel: entire forward chain fused, activations resident in VMEM
# ----------------------------------------------------------------------------
def _fused_forward_kernel(*refs, cfg):
    n = len(cfg)
    x_ref = refs[0]
    w_refs = refs[1:1 + n]
    b_refs = refs[1 + n:1 + 2 * n]
    o_ref = refs[1 + 2 * n]

    h = x_ref[...]                                        # f32 (B_pad, K0_pad)
    for (act, residual), w_ref, b_ref in zip(cfg, w_refs, b_refs):
        # bf16 x bf16 -> f32 accumulation on the MXU
        y = jnp.dot(h.astype(jnp.bfloat16), w_ref[...],
                    preferred_element_type=jnp.float32)
        y = y + b_ref[...]
        if act == "relu":
            y = jnp.maximum(y, 0.0)
        elif act == "silu":
            y = y * jax.nn.sigmoid(y)
        if residual:
            y = y + h
        h = y
    o_ref[...] = h.astype(o_ref.dtype)


def fused_forward(x_pad, weights, biases, cfg=_LAYER_CFG):
    """One pallas_call for the whole chain.  x_pad (B_pad, K0_pad) f32,
    weights[i] (K_i_pad, N_i_pad) bf16, biases[i] (1, N_i_pad) f32."""
    B_pad, _ = x_pad.shape
    n = len(cfg)
    assert len(weights) == n and len(biases) == n
    n_out = weights[-1].shape[1]

    # Advisory cost hint for the XLA scheduler.
    flops = 0
    transcendentals = 0
    bytes_accessed = x_pad.size * 4 + B_pad * n_out * 4
    for (act, _), w in zip(cfg, weights):
        k, nn_ = w.shape
        flops += 2 * B_pad * k * nn_
        bytes_accessed += w.size * w.dtype.itemsize + nn_ * 4
        if act == "silu":
            transcendentals += B_pad * nn_

    in_specs = [pl.BlockSpec(x_pad.shape, lambda i: (0, 0))]
    in_specs += [pl.BlockSpec(w.shape, lambda i: (0, 0)) for w in weights]
    in_specs += [pl.BlockSpec(b.shape, lambda i: (0, 0)) for b in biases]

    # NOTE: at this (launch-bound) scale a single grid step is optimal.  For
    # large batches, add a leading M-tile grid axis marked "parallel" so both
    # v7x TensorCores are used.  For large channel counts / lengths, exploit
    # the band structure of the ConvT matrices (tile K, skip all-zero tiles).
    kernel = functools.partial(_fused_forward_kernel, cfg=cfg)
    return pl.pallas_call(
        kernel,
        out_shape=jax.ShapeDtypeStruct((B_pad, n_out), jnp.float32),
        grid=(1,),
        in_specs=in_specs,
        out_specs=pl.BlockSpec((B_pad, n_out), lambda i: (0, 0)),
        compiler_params=pltpu.CompilerParams(
            dimension_semantics=("arbitrary",),
            vmem_limit_bytes=48 * 1024 * 1024,   # <= v7x 64 MiB physical VMEM
        ),
        cost_estimate=pl.CostEstimate(
            flops=flops,
            transcendentals=transcendentals,
            bytes_accessed=bytes_accessed,
        ),
    )(x_pad, *weights, *biases)


# ----------------------------------------------------------------------------
# Glue: ConvTranspose1d as a dense banded matrix (channel-major flat layout)
# ----------------------------------------------------------------------------
def convT1d_matrix(W, L_in, stride):
    """W: (C_in, C_out, K) PyTorch ConvTranspose1d weight -> dense matrix.

    out[b, co, j] = sum_{ci, p} x[b, ci, p] * W[ci, co, j - p*stride]
    Returns M of shape (C_in*L_in, C_out*L_out) acting on channel-major flats.
    """
    Cin, Cout, K = W.shape
    L_out = (L_in - 1) * stride + K
    p = jnp.arange(L_in)[:, None]            # (L_in, 1)
    j = jnp.arange(L_out)[None, :]           # (1, L_out)
    k = j - p * stride                       # (L_in, L_out)
    valid = (k >= 0) & (k < K)
    kc = jnp.clip(k, 0, K - 1)
    M = W[:, :, kc]                          # (Cin, Cout, L_in, L_out)
    M = jnp.where(valid[None, None], M, 0.0)
    M = jnp.transpose(M, (0, 2, 1, 3)).reshape(Cin * L_in, Cout * L_out)
    return M, L_out


def _round_up(n, m):
    return ((n + m - 1) // m) * m


def _pad2d(a, rows, cols):
    r, c = a.shape
    return jnp.pad(a, ((0, rows - r), (0, cols - c)))


# ----------------------------------------------------------------------------
# Parameters (deterministic synthetic init; no checkpoint)
# ----------------------------------------------------------------------------
def init_params(key, in_features, layers, out_features, out_channels):
    assert len(layers) == 5
    assert layers[1] % 32 == 0

    def nrm(k, shape, scale=0.05):
        return scale * jax.random.normal(k, shape, dtype=jnp.float32)

    keys = iter(jax.random.split(key, 32))
    raw = {}

    # ---- ResNet backbone (approximation, see TODO at top) ----
    H = layers[0]
    raw["fc_in_w"] = nrm(next(keys), (in_features, H))
    raw["fc_in_b"] = nrm(next(keys), (H,))
    for i in range(3):
        raw[f"blk{i}_w"] = nrm(next(keys), (H, H))
        raw[f"blk{i}_b"] = nrm(next(keys), (H,))
    raw["fc_out_w"] = nrm(next(keys), (H, layers[1]))
    raw["fc_out_b"] = nrm(next(keys), (layers[1],))

    # ---- TransposedConvNetUpsample: Unflatten(-1, (-1, 32)) then convs ----
    c0 = layers[1] // 32
    c1, c2, c3 = layers[2], layers[3], layers[4]
    L0 = 32
    raw["w1"] = nrm(next(keys), (c0, c1, 10))            # ConvT1d k=10 s=3
    raw["b1"] = nrm(next(keys), (c1,))
    raw["w2"] = nrm(next(keys), (c1, c2, 32))            # ConvT1d k=32 s=2
    raw["b2"] = nrm(next(keys), (c2,))
    raw["w3"] = nrm(next(keys), (c2, c3, 32))            # ConvT1d k=32 s=2
    raw["b3"] = nrm(next(keys), (c3,))
    raw["w4"] = nrm(next(keys), (out_channels, c3, 1))   # Conv1d k=1
    raw["b4"] = nrm(next(keys), (out_channels,))

    # Banded dense matrices over the channel-major flat layout.
    M1, L1 = convT1d_matrix(raw["w1"], L0, stride=3)
    v1 = jnp.repeat(raw["b1"], L1)
    M2, L2 = convT1d_matrix(raw["w2"], L1, stride=2)
    v2 = jnp.repeat(raw["b2"], L2)
    # Fold the trailing Conv1d(k=1) into the last ConvTranspose1d (no
    # nonlinearity between them): W34[ci,oc,k] = sum_o W3[ci,o,k]*W4[oc,o].
    w34 = jnp.einsum("cok,no->cnk", raw["w3"], raw["w4"][:, :, 0])
    b34 = raw["w4"][:, :, 0] @ raw["b3"] + raw["b4"]
    M34, L3 = convT1d_matrix(w34, L2, stride=2)
    v34 = jnp.repeat(b34, L3)
    assert out_features <= L3

    # Assemble fused-layer list; pad K/N to 128-multiples; cast weights bf16.
    dims = [in_features, H, H, H, H, layers[1], c1 * L1, c2 * L2,
            out_channels * L3]
    wts = [raw["fc_in_w"], raw["blk0_w"], raw["blk1_w"], raw["blk2_w"],
           raw["fc_out_w"], M1, M2, M34]
    bss = [raw["fc_in_b"], raw["blk0_b"], raw["blk1_b"], raw["blk2_b"],
           raw["fc_out_b"], v1, v2, v34]
    pdims = [_round_up(max(d, 128), 128) for d in dims]

    weights, biases = [], []
    for li in range(len(wts)):
        kp_, np_ = pdims[li], pdims[li + 1]
        weights.append(_pad2d(wts[li], kp_, np_).astype(jnp.bfloat16))
        biases.append(jnp.pad(bss[li], (0, np_ - bss[li].shape[0]))
                      .reshape(1, np_).astype(jnp.float32))

    meta = dict(L3=int(L3), dims=dims, pdims=pdims)
    return weights, biases, raw, meta


# ----------------------------------------------------------------------------
# Forward (multiport=False path)
# ----------------------------------------------------------------------------
def transposed_conv_net_forward(x, weights, biases, meta, out_features,
                                out_channels):
    B = x.shape[0]
    B_pad = _round_up(max(B, 8), 8)
    K0_pad = meta["pdims"][0]
    x_pad = jnp.pad(x, ((0, B_pad - B), (0, K0_pad - x.shape[1])))
    h = fused_forward(x_pad, weights, biases)             # (B_pad, N_last_pad)
    L3 = meta["L3"]
    h = h[:B, :out_channels * L3].reshape(B, out_channels, L3)
    h = h[..., :out_features]                             # x[..., :out_features]
    return h.reshape(B, -1)                               # flatten(dim=1..-1)


# ----------------------------------------------------------------------------
# References for validation
# ----------------------------------------------------------------------------
def _reference_matched(x_pad, weights, biases, cfg=_LAYER_CFG):
    """Same padded bf16 math as the kernel, in plain jnp."""
    h = x_pad
    for (act, residual), w, b in zip(cfg, weights, biases):
        y = jnp.dot(h.astype(jnp.bfloat16), w,
                    preferred_element_type=jnp.float32) + b
        if act == "relu":
            y = jnp.maximum(y, 0.0)
        elif act == "silu":
            y = y * jax.nn.sigmoid(y)
        if residual:
            y = y + h
        h = y
    return h


def _reference_f32(raw, x, layers, out_features, out_channels):
    """Full-precision, unfolded (ConvT3 and Conv1x1 separate) reference."""
    def lin(h, w, b, act=None, residual=False):
        y = h @ w + b
        if act == "relu":
            y = jnp.maximum(y, 0.0)
        elif act == "silu":
            y = y * jax.nn.sigmoid(y)
        return y + h if residual else y

    h = lin(x, raw["fc_in_w"], raw["fc_in_b"], act="relu")
    for i in range(3):
        h = lin(h, raw[f"blk{i}_w"], raw[f"blk{i}_b"], act="relu",
                residual=True)
    h = lin(h, raw["fc_out_w"], raw["fc_out_b"])

    L0 = 32
    M1, L1 = convT1d_matrix(raw["w1"], L0, stride=3)
    h = lin(h, M1, jnp.repeat(raw["b1"], L1), act="silu")
    M2, L2 = convT1d_matrix(raw["w2"], L1, stride=2)
    h = lin(h, M2, jnp.repeat(raw["b2"], L2), act="silu")
    M3, L3 = convT1d_matrix(raw["w3"], L2, stride=2)
    h = lin(h, M3, jnp.repeat(raw["b3"], L3))
    B = x.shape[0]
    c3 = layers[4]
    z = h.reshape(B, c3, L3)
    y = jnp.einsum("oc,bcl->bol", raw["w4"][:, :, 0], z) \
        + raw["b4"][None, :, None]
    y = y[..., :out_features]
    return y.reshape(B, -1)


if __name__ == "__main__":
    # Small config consistent with the module's constraints:
    #   len(layers) == 5, layers[1] % 32 == 0, out_features <= L3 (=502 here)
    B = 2
    IN_FEATURES = 16
    LAYERS = [32, 32, 4, 4, 4]
    OUT_FEATURES = 32
    OUT_CHANNELS = 2

    key = jax.random.PRNGKey(0)
    kp, kx = jax.random.split(key)
    weights, biases, raw, meta = init_params(
        kp, IN_FEATURES, LAYERS, OUT_FEATURES, OUT_CHANNELS)
    x = jax.random.normal(kx, (B, IN_FEATURES), dtype=jnp.float32)

    out = transposed_conv_net_forward(x, weights, biases, meta,
                                      OUT_FEATURES, OUT_CHANNELS)
    out = jax.block_until_ready(out)
    assert out.shape == (B, OUT_CHANNELS * OUT_FEATURES), out.shape

    # 1) matched-precision check: same bf16 padded weights, same math
    B_pad = _round_up(max(B, 8), 8)
    x_pad = jnp.pad(x, ((0, B_pad - B), (0, meta["pdims"][0] - IN_FEATURES)))
    ref_m = _reference_matched(x_pad, weights, biases)
    L3 = meta["L3"]
    ref_m = ref_m[:B, :OUT_CHANNELS * L3].reshape(B, OUT_CHANNELS, L3)
    ref_m = ref_m[..., :OUT_FEATURES].reshape(B, -1)
    np.testing.assert_allclose(np.asarray(out), np.asarray(ref_m),
                               rtol=1e-2, atol=1e-5)

    # 2) semantic check vs full-precision, unfolded reference (loose: the
    #    kernel uses bf16 weights/activations)
    ref_f = _reference_f32(raw, x, LAYERS, OUT_FEATURES, OUT_CHANNELS)
    np.testing.assert_allclose(np.asarray(out), np.asarray(ref_f),
                               rtol=1e-1, atol=5e-3)

    print("KERNEL_OK")
</pallas_src>

<mosaic_0001>
module attributes {stable_mosaic.version = 11 : i64} {
  func.func @_fused_forward_kernel(%arg0: i32, %arg1: memref<8x128xf32, #tpu.memory_space<vmem>>, %arg2: memref<128x128xbf16, #tpu.memory_space<vmem>>, %arg3: memref<128x128xbf16, #tpu.memory_space<vmem>>, %arg4: memref<128x128xbf16, #tpu.memory_space<vmem>>, %arg5: memref<128x128xbf16, #tpu.memory_space<vmem>>, %arg6: memref<128x128xbf16, #tpu.memory_space<vmem>>, %arg7: memref<128x512xbf16, #tpu.memory_space<vmem>>, %arg8: memref<512x1024xbf16, #tpu.memory_space<vmem>>, %arg9: memref<1024x1024xbf16, #tpu.memory_space<vmem>>, %arg10: memref<1x128xf32, #tpu.memory_space<vmem>>, %arg11: memref<1x128xf32, #tpu.memory_space<vmem>>, %arg12: memref<1x128xf32, #tpu.memory_space<vmem>>, %arg13: memref<1x128xf32, #tpu.memory_space<vmem>>, %arg14: memref<1x128xf32, #tpu.memory_space<vmem>>, %arg15: memref<1x512xf32, #tpu.memory_space<vmem>>, %arg16: memref<1x1024xf32, #tpu.memory_space<vmem>>, %arg17: memref<1x1024xf32, #tpu.memory_space<vmem>>, %arg18: memref<8x1024xf32, #tpu.memory_space<vmem>>) attributes {dimension_semantics = [#tpu.dimension_semantics<arbitrary>], iteration_bounds = array<i64: 1>, scalar_prefetch = 0 : i64, scratch_operands = 0 : i64, tpu.core_type = #tpu.core_type<tc>, window_params = [{pipeline_mode = #tpu.pipeline_mode<synchronous>, transform_indices = @transform_0, window_bounds = array<i64: 8, 128>}, {pipeline_mode = #tpu.pipeline_mode<synchronous>, transform_indices = @transform_1, window_bounds = array<i64: 128, 128>}, {pipeline_mode = #tpu.pipeline_mode<synchronous>, transform_indices = @transform_2, window_bounds = array<i64: 128, 128>}, {pipeline_mode = #tpu.pipeline_mode<synchronous>, transform_indices = @transform_3, window_bounds = array<i64: 128, 128>}, {pipeline_mode = #tpu.pipeline_mode<synchronous>, transform_indices = @transform_4, window_bounds = array<i64: 128, 128>}, {pipeline_mode = #tpu.pipeline_mode<synchronous>, transform_indices = @transform_5, window_bounds = array<i64: 128, 128>}, {pipeline_mode = #tpu.pipeline_mode<synchronous>, transform_indices = @transform_6, window_bounds = array<i64: 128, 512>}, {pipeline_mode = #tpu.pipeline_mode<synchronous>, transform_indices = @transform_7, window_bounds = array<i64: 512, 1024>}, {pipeline_mode = #tpu.pipeline_mode<synchronous>, transform_indices = @transform_8, window_bounds = array<i64: 1024, 1024>}, {pipeline_mode = #tpu.pipeline_mode<synchronous>, transform_indices = @transform_9, window_bounds = array<i64: 1, 128>}, {pipeline_mode = #tpu.pipeline_mode<synchronous>, transform_indices = @transform_10, window_bounds = array<i64: 1, 128>}, {pipeline_mode = #tpu.pipeline_mode<synchronous>, transform_indices = @transform_11, window_bounds = array<i64: 1, 128>}, {pipeline_mode = #tpu.pipeline_mode<synchronous>, transform_indices = @transform_12, window_bounds = array<i64: 1, 128>}, {pipeline_mode = #tpu.pipeline_mode<synchronous>, transform_indices = @transform_13, window_bounds = array<i64: 1, 128>}, {pipeline_mode = #tpu.pipeline_mode<synchronous>, transform_indices = @transform_14, window_bounds = array<i64: 1, 512>}, {pipeline_mode = #tpu.pipeline_mode<synchronous>, transform_indices = @transform_15, window_bounds = array<i64: 1, 1024>}, {pipeline_mode = #tpu.pipeline_mode<synchronous>, transform_indices = @transform_16, window_bounds = array<i64: 1, 1024>}, {pipeline_mode = #tpu.pipeline_mode<synchronous>, transform_indices = @transform_17, window_bounds = array<i64: 8, 1024>}]} {
    %c0 = arith.constant 0 : index
    %c0_0 = arith.constant 0 : index
    %0 = vector.load %arg1[%c0, %c0_0] : memref<8x128xf32, #tpu.memory_space<vmem>>, vector<8x128xf32>
    %1 = arith.truncf %0 : vector<8x128xf32> to vector<8x128xbf16>
    %c0_1 = arith.constant 0 : index
    %c0_2 = arith.constant 0 : index
    %2 = vector.load %arg2[%c0_1, %c0_2] : memref<128x128xbf16, #tpu.memory_space<vmem>>, vector<128x128xbf16>
    %cst = arith.constant dense<0.000000e+00> : vector<8x128xf32>
    %3 = tpu.matmul %1, %2, %cst {dimension_numbers = #tpu.dot_dimension_numbers<[1], [0], [0], [1], [0, 0, 1, 1], [], []>} : vector<8x128xbf16>, vector<128x128xbf16>, vector<8x128xf32> -> vector<8x128xf32>
    %c0_3 = arith.constant 0 : index
    %c0_4 = arith.constant 0 : index
    %4 = vector.load %arg10[%c0_3, %c0_4] : memref<1x128xf32, #tpu.memory_space<vmem>>, vector<1x128xf32>
    %5 = vector.broadcast %4 : vector<1x128xf32> to vector<8x128xf32>
    %6 = arith.addf %3, %5 : vector<8x128xf32>
    %cst_5 = arith.constant 0.000000e+00 : f32
    %7 = vector.broadcast %cst_5 : f32 to vector<8x128xf32>
    %8 = arith.maximumf %6, %7 : vector<8x128xf32>
    %9 = arith.truncf %8 : vector<8x128xf32> to vector<8x128xbf16>
    %c0_6 = arith.constant 0 : index
    %c0_7 = arith.constant 0 : index
    %10 = vector.load %arg3[%c0_6, %c0_7] : memref<128x128xbf16, #tpu.memory_space<vmem>>, vector<128x128xbf16>
    %cst_8 = arith.constant dense<0.000000e+00> : vector<8x128xf32>
    %11 = tpu.matmul %9, %10, %cst_8 {dimension_numbers = #tpu.dot_dimension_numbers<[1], [0], [0], [1], [0, 0, 1, 1], [], []>} : vector<8x128xbf16>, vector<128x128xbf16>, vector<8x128xf32> -> vector<8x128xf32>
    %c0_9 = arith.constant 0 : index
    %c0_10 = arith.constant 0 : index
    %12 = vector.load %arg11[%c0_9, %c0_10] : memref<1x128xf32, #tpu.memory_space<vmem>>, vector<1x128xf32>
    %13 = vector.broadcast %12 : vector<1x128xf32> to vector<8x128xf32>
    %14 = arith.addf %11, %13 : vector<8x128xf32>
    %cst_11 = arith.constant 0.000000e+00 : f32
    %15 = vector.broadcast %cst_11 : f32 to vector<8x128xf32>
    %16 = arith.maximumf %14, %15 : vector<8x128xf32>
    %17 = arith.addf %16, %8 : vector<8x128xf32>
    %18 = arith.truncf %17 : vector<8x128xf32> to vector<8x128xbf16>
    %c0_12 = arith.constant 0 : index
    %c0_13 = arith.constant 0 : index
    %19 = vector.load %arg4[%c0_12, %c0_13] : memref<128x128xbf16, #tpu.memory_space<vmem>>, vector<128x128xbf16>
    %cst_14 = arith.constant dense<0.000000e+00> : vector<8x128xf32>
    %20 = tpu.matmul %18, %19, %cst_14 {dimension_numbers = #tpu.dot_dimension_numbers<[1], [0], [0], [1], [0, 0, 1, 1], [], []>} : vector<8x128xbf16>, vector<128x128xbf16>, vector<8x128xf32> -> vector<8x128xf32>
    %c0_15 = arith.constant 0 : index
    %c0_16 = arith.constant 0 : index
    %21 = vector.load %arg12[%c0_15, %c0_16] : memref<1x128xf32, #tpu.memory_space<vmem>>, vector<1x128xf32>
    %22 = vector.broadcast %21 : vector<1x128xf32> to vector<8x128xf32>
    %23 = arith.addf %20, %22 : vector<8x128xf32>
    %cst_17 = arith.constant 0.000000e+00 : f32
    %24 = vector.broadcast %cst_17 : f32 to vector<8x128xf32>
    %25 = arith.maximumf %23, %24 : vector<8x128xf32>
    %26 = arith.addf %25, %17 : vector<8x128xf32>
    %27 = arith.truncf %26 : vector<8x128xf32> to vector<8x128xbf16>
    %c0_18 = arith.constant 0 : index
    %c0_19 = arith.constant 0 : index
    %28 = vector.load %arg5[%c0_18, %c0_19] : memref<128x128xbf16, #tpu.memory_space<vmem>>, vector<128x128xbf16>
    %cst_20 = arith.constant dense<0.000000e+00> : vector<8x128xf32>
    %29 = tpu.matmul %27, %28, %cst_20 {dimension_numbers = #tpu.dot_dimension_numbers<[1], [0], [0], [1], [0, 0, 1, 1], [], []>} : vector<8x128xbf16>, vector<128x128xbf16>, vector<8x128xf32> -> vector<8x128xf32>
    %c0_21 = arith.constant 0 : index
    %c0_22 = arith.constant 0 : index
    %30 = vector.load %arg13[%c0_21, %c0_22] : memref<1x128xf32, #tpu.memory_space<vmem>>, vector<1x128xf32>
    %31 = vector.broadcast %30 : vector<1x128xf32> to vector<8x128xf32>
    %32 = arith.addf %29, %31 : vector<8x128xf32>
    %cst_23 = arith.constant 0.000000e+00 : f32
    %33 = vector.broadcast %cst_23 : f32 to vector<8x128xf32>
    %34 = arith.maximumf %32, %33 : vector<8x128xf32>
    %35 = arith.addf %34, %26 : vector<8x128xf32>
    %36 = arith.truncf %35 : vector<8x128xf32> to vector<8x128xbf16>
    %c0_24 = arith.constant 0 : index
    %c0_25 = arith.constant 0 : index
    %37 = vector.load %arg6[%c0_24, %c0_25] : memref<128x128xbf16, #tpu.memory_space<vmem>>, vector<128x128xbf16>
    %cst_26 = arith.constant dense<0.000000e+00> : vector<8x128xf32>
    %38 = tpu.matmul %36, %37, %cst_26 {dimension_numbers = #tpu.dot_dimension_numbers<[1], [0], [0], [1], [0, 0, 1, 1], [], []>} : vector<8x128xbf16>, vector<128x128xbf16>, vector<8x128xf32> -> vector<8x128xf32>
    %c0_27 = arith.constant 0 : index
    %c0_28 = arith.constant 0 : index
    %39 = vector.load %arg14[%c0_27, %c0_28] : memref<1x128xf32, #tpu.memory_space<vmem>>, vector<1x128xf32>
    %40 = vector.broadcast %39 : vector<1x128xf32> to vector<8x128xf32>
    %41 = arith.addf %38, %40 : vector<8x128xf32>
    %42 = arith.truncf %41 : vector<8x128xf32> to vector<8x128xbf16>
    %c0_29 = arith.constant 0 : index
    %c0_30 = arith.constant 0 : index
    %43 = vector.load %arg7[%c0_29, %c0_30] : memref<128x512xbf16, #tpu.memory_space<vmem>>, vector<128x512xbf16>
    %cst_31 = arith.constant dense<0.000000e+00> : vector<8x512xf32>
    %44 = tpu.matmul %42, %43, %cst_31 {dimension_numbers = #tpu.dot_dimension_numbers<[1], [0], [0], [1], [0, 0, 1, 1], [], []>} : vector<8x128xbf16>, vector<128x512xbf16>, vector<8x512xf32> -> vector<8x512xf32>
    %c0_32 = arith.constant 0 : index
    %c0_33 = arith.constant 0 : index
    %45 = vector.load %arg15[%c0_32, %c0_33] : memref<1x512xf32, #tpu.memory_space<vmem>>, vector<1x512xf32>
    %46 = vector.broadcast %45 : vector<1x512xf32> to vector<8x512xf32>
    %47 = arith.addf %44, %46 : vector<8x512xf32>
    %48 = arith.negf %47 : vector<8x512xf32>
    %49 = math.exp %48 : vector<8x512xf32>
    %cst_34 = arith.constant 1.000000e+00 : f32
    %50 = vector.broadcast %cst_34 : f32 to vector<8x512xf32>
    %51 = arith.addf %50, %49 : vector<8x512xf32>
    %52 = arith.divf %50, %51 : vector<8x512xf32>
    %53 = arith.mulf %47, %52 : vector<8x512xf32>
    %54 = arith.truncf %53 : vector<8x512xf32> to vector<8x512xbf16>
    %c0_35 = arith.constant 0 : index
    %c0_36 = arith.constant 0 : index
    %55 = vector.load %arg8[%c0_35, %c0_36] : memref<512x1024xbf16, #tpu.memory_space<vmem>>, vector<512x1024xbf16>
    %cst_37 = arith.constant dense<0.000000e+00> : vector<8x1024xf32>
    %56 = tpu.matmul %54, %55, %cst_37 {dimension_numbers = #tpu.dot_dimension_numbers<[1], [0], [0], [1], [0, 0, 1, 1], [], []>} : vector<8x512xbf16>, vector<512x1024xbf16>, vector<8x1024xf32> -> vector<8x1024xf32>
    %c0_38 = arith.constant 0 : index
    %c0_39 = arith.constant 0 : index
    %57 = vector.load %arg16[%c0_38, %c0_39] : memref<1x1024xf32, #tpu.memory_space<vmem>>, vector<1x1024xf32>
    %58 = vector.broadcast %57 : vector<1x1024xf32> to vector<8x1024xf32>
    %59 = arith.addf %56, %58 : vector<8x1024xf32>
    %60 = arith.negf %59 : vector<8x1024xf32>
    %61 = math.exp %60 : vector<8x1024xf32>
    %cst_40 = arith.constant 1.000000e+00 : f32
    %62 = vector.broadcast %cst_40 : f32 to vector<8x1024xf32>
    %63 = arith.addf %62, %61 : vector<8x1024xf32>
    %64 = arith.divf %62, %63 : vector<8x1024xf32>
    %65 = arith.mulf %59, %64 : vector<8x1024xf32>
    %66 = arith.truncf %65 : vector<8x1024xf32> to vector<8x1024xbf16>
    %c0_41 = arith.constant 0 : index
    %c0_42 = arith.constant 0 : index
    %67 = vector.load %arg9[%c0_41, %c0_42] : memref<1024x1024xbf16, #tpu.memory_space<vmem>>, vector<1024x1024xbf16>
    %cst_43 = arith.constant dense<0.000000e+00> : vector<8x1024xf32>
    %68 = tpu.matmul %66, %67, %cst_43 {dimension_numbers = #tpu.dot_dimension_numbers<[1], [0], [0], [1], [0, 0, 1, 1], [], []>} : vector<8x1024xbf16>, vector<1024x1024xbf16>, vector<8x1024xf32> -> vector<8x1024xf32>
    %c0_44 = arith.constant 0 : index
    %c0_45 = arith.constant 0 : index
    %69 = vector.load %arg17[%c0_44, %c0_45] : memref<1x1024xf32, #tpu.memory_space<vmem>>, vector<1x1024xf32>
    %70 = vector.broadcast %69 : vector<1x1024xf32> to vector<8x1024xf32>
    %71 = arith.addf %68, %70 : vector<8x1024xf32>
    %c0_46 = arith.constant 0 : index
    %c0_47 = arith.constant 0 : index
    %72 = vector.load %arg18[%c0_46, %c0_47] : memref<8x1024xf32, #tpu.memory_space<vmem>>, vector<8x1024xf32>
    tpu.vector_store %arg18[%c0_46, %c0_47], %71 {strides = array<i32>} : memref<8x1024xf32, #tpu.memory_space<vmem>>, vector<8x1024xf32>,
    return
  }
  func.func @transform_0(%arg0: i32) -> (i32, i32) {
    %c0_i32 = arith.constant 0 : i32
    %c0_i32_0 = arith.constant 0 : i32
    %c0_i32_1 = arith.constant 0 : i32
    return %c0_i32, %c0_i32_0 : i32, i32
  }
  func.func @transform_1(%arg0: i32) -> (i32, i32) {
    %c0_i32 = arith.constant 0 : i32
    %c0_i32_0 = arith.constant 0 : i32
    %c0_i32_1 = arith.constant 0 : i32
    return %c0_i32, %c0_i32_0 : i32, i32
  }
  func.func @transform_2(%arg0: i32) -> (i32, i32) {
    %c0_i32 = arith.constant 0 : i32
    %c0_i32_0 = arith.constant 0 : i32
    %c0_i32_1 = arith.constant 0 : i32
    return %c0_i32, %c0_i32_0 : i32, i32
  }
  func.func @transform_3(%arg0: i32) -> (i32, i32) {
    %c0_i32 = arith.constant 0 : i32
    %c0_i32_0 = arith.constant 0 : i32
    %c0_i32_1 = arith.constant 0 : i32
    return %c0_i32, %c0_i32_0 : i32, i32
  }
  func.func @transform_4(%arg0: i32) -> (i32, i32) {
    %c0_i32 = arith.constant 0 : i32
    %c0_i32_0 = arith.constant 0 : i32
    %c0_i32_1 = arith.constant 0 : i32
    return %c0_i32, %c0_i32_0 : i32, i32
  }
  func.func @transform_5(%arg0: i32) -> (i32, i32) {
    %c0_i32 = arith.constant 0 : i32
    %c0_i32_0 = arith.constant 0 : i32
    %c0_i32_1 = arith.constant 0 : i32
    return %c0_i32, %c0_i32_0 : i32, i32
  }
  func.func @transform_6(%arg0: i32) -> (i32, i32) {
    %c0_i32 = arith.constant 0 : i32
    %c0_i32_0 = arith.constant 0 : i32
    %c0_i32_1 = arith.constant 0 : i32
    return %c0_i32, %c0_i32_0 : i32, i32
  }
  func.func @transform_7(%arg0: i32) -> (i32, i32) {
    %c0_i32 = arith.constant 0 : i32
    %c0_i32_0 = arith.constant 0 : i32
    %c0_i32_1 = arith.constant 0 : i32
    return %c0_i32, %c0_i32_0 : i32, i32
  }
  func.func @transform_8(%arg0: i32) -> (i32, i32) {
    %c0_i32 = arith.constant 0 : i32
    %c0_i32_0 = arith.constant 0 : i32
    %c0_i32_1 = arith.constant 0 : i32
    return %c0_i32, %c0_i32_0 : i32, i32
  }
  func.func @transform_9(%arg0: i32) -> (i32, i32) {
    %c0_i32 = arith.constant 0 : i32
    %c0_i32_0 = arith.constant 0 : i32
    %c0_i32_1 = arith.constant 0 : i32
    return %c0_i32, %c0_i32_0 : i32, i32
  }
  func.func @transform_10(%arg0: i32) -> (i32, i32) {
    %c0_i32 = arith.constant 0 : i32
    %c0_i32_0 = arith.constant 0 : i32
    %c0_i32_1 = arith.constant 0 : i32
    return %c0_i32, %c0_i32_0 : i32, i32
  }
  func.func @transform_11(%arg0: i32) -> (i32, i32) {
    %c0_i32 = arith.constant 0 : i32
    %c0_i32_0 = arith.constant 0 : i32
    %c0_i32_1 = arith.constant 0 : i32
    return %c0_i32, %c0_i32_0 : i32, i32
  }
  func.func @transform_12(%arg0: i32) -> (i32, i32) {
    %c0_i32 = arith.constant 0 : i32
    %c0_i32_0 = arith.constant 0 : i32
    %c0_i32_1 = arith.constant 0 : i32
    return %c0_i32, %c0_i32_0 : i32, i32
  }
  func.func @transform_13(%arg0: i32) -> (i32, i32) {
    %c0_i32 = arith.constant 0 : i32
    %c0_i32_0 = arith.constant 0 : i32
    %c0_i32_1 = arith.constant 0 : i32
    return %c0_i32, %c0_i32_0 : i32, i32
  }
  func.func @transform_14(%arg0: i32) -> (i32, i32) {
    %c0_i32 = arith.constant 0 : i32
    %c0_i32_0 = arith.constant 0 : i32
    %c0_i32_1 = arith.constant 0 : i32
    return %c0_i32, %c0_i32_0 : i32, i32
  }
  func.func @transform_15(%arg0: i32) -> (i32, i32) {
    %c0_i32 = arith.constant 0 : i32
    %c0_i32_0 = arith.constant 0 : i32
    %c0_i32_1 = arith.constant 0 : i32
    return %c0_i32, %c0_i32_0 : i32, i32
  }
  func.func @transform_16(%arg0: i32) -> (i32, i32) {
    %c0_i32 = arith.constant 0 : i32
    %c0_i32_0 = arith.constant 0 : i32
    %c0_i32_1 = arith.constant 0 : i32
    return %c0_i32, %c0_i32_0 : i32, i32
  }
  func.func @transform_17(%arg0: i32) -> (i32, i32) {
    %c0_i32 = arith.constant 0 : i32
    %c0_i32_0 = arith.constant 0 : i32
    %c0_i32_1 = arith.constant 0 : i32
    return %c0_i32, %c0_i32_0 : i32, i32
  }
}

</mosaic_0001>

<bundles_post_ra>
// kernel: tpu_custom_call.1
= control target key start
LH: loop header
LB: loop body
LE: loop exit
PB: predicated region body
PF: predicated region fallthrough
CT: control target
= control target key end

     0   :  { %s9226_s0 = inlined_call_operand.hbm [shape: f32[8,128], index: 0, kind: input, shape index: {}]   ;;  %s9227_s1 = inlined_call_operand.hbm [shape: bf16[128,128], index: 1, kind: input, shape index: {}]   ;;  %s9228_s2 = inlined_call_operand.hbm [shape: bf16[128,128], index: 2, kind: input, shape index: {}]   ;;  %s9229_s3 = inlined_call_operand.hbm [shape: bf16[128,128], index: 3, kind: input, shape index: {}]   ;;  %s9230_s4 = inlined_call_operand.hbm [shape: bf16[128,128], index: 4, kind: input, shape index: {}]   ;;  %s9231_s5 = inlined_call_operand.hbm [shape: bf16[128,128], index: 5, kind: input, shape index: {}]   ;;  %s9232_s6 = inlined_call_operand.hbm [shape: bf16[128,512], index: 6, kind: input, shape index: {}]   ;;  %s9233_s7 = inlined_call_operand.hbm [shape: bf16[512,1024], index: 7, kind: input, shape index: {}]   ;;  %s9234_s8 = inlined_call_operand.hbm [shape: bf16[1024,1024], index: 8, kind: input, shape index: {}]   ;;  %s9235_s9 = inlined_call_operand.hbm [shape: f32[1,128], index: 9, kind: input, shape index: {}]   ;;  %s9236_s10 = inlined_call_operand.hbm [shape: f32[1,128], index: 10, kind: input, shape index: {}]   ;;  %s9237_s11 = inlined_call_operand.hbm [shape: f32[1,128], index: 11, kind: input, shape index: {}]   ;;  %s9238_s12 = inlined_call_operand.hbm [shape: f32[1,128], index: 12, kind: input, shape index: {}]   ;;  %s9239_s13 = inlined_call_operand.hbm [shape: f32[1,128], index: 13, kind: input, shape index: {}]   ;;  %s9240_s14 = inlined_call_operand.hbm [shape: f32[1,512], index: 14, kind: input, shape index: {}]   ;;  %s9241_s15 = inlined_call_operand.hbm [shape: f32[1,1024], index: 15, kind: input, shape index: {}]   ;;  %s9242_s16 = inlined_call_operand.hbm [shape: f32[1,1024], index: 16, kind: input, shape index: {}]   ;;  %s9243_s17 = inlined_call_operand.hbm [shape: f32[8,1024], index: 17, kind: output, shape index: {}]  }
   0x1   :  { %9248 = sst [smem:[#allocation40_spill]] %s9226_s0 }
   0x2   :  { %9249 = sst [smem:[#allocation41_spill]] %s9227_s1 }
   0x3   :  { %9250 = sst [smem:[#allocation42_spill]] %s9242_s16 }
   0x4   :  { %9251 = sst [smem:[#allocation43_spill]] %s9243_s17 }
   0x5   :  { %22 = vsyncpa [#allocation3], 0 }
   0x6   :  { %23 = vsyncpa [#allocation6], 0 }
   0x7   :  { %24 = vsyncpa [#allocation9], 0 }
   0x8   :  { %25 = vsyncpa [#allocation12], 0 }
   0x9   :  { %26 = vsyncpa [#allocation15], 0 }
   0xa   :  { %27 = vsyncpa [#allocation18], 0 }
   0xb   :  { %28 = vsyncpa [#allocation21], 0 }
   0xc   :  { %29 = vsyncpa [#allocation24], 0 }
   0xd   :  { %30 = vsyncpa [#allocation27], 0 }
   0xe   :  { %31 = vsyncpa [#allocation4], 0  ;;  %s8600_s24 = smov [#allocation5]   ;;  %s9252_s28 = sld [smem:[#allocation41_spill]] }
   0xf   :  { %s47_s25 = sshll.u32 %s8600_s24, 4  ;;  %s48_s25 = int_to_ptr.vmem [resolvable:$true] %s47_s25 }
  0x14   :  { %s8184_s29 = scalar_lea.hbm %s9252_s28, 1024 }
  0x15   :  { %p8185_p0 = scmp.ne.s32.totalorder %s9252_s28, %s8184_s29  ;;  %p8188_p1 = scmp.lt.u32.totalorder %s8184_s29, %s9252_s28 }
  0x17   :  { %p8190_p2 = pnand %p8188_p1, %p8185_p0 }
  0x19   :  { %8193 = shalt.err (!%p8190_p2)
}
  0x1a   :  { %s8194_s1 = scalar_lea.vmem %s48_s25, 1024  ;;  %p8199_p4 = scmp.lt.s32.totalorder %s48_s25, %s48_s25 }
  0x1b   :  { %p8195_p3 = scmp.ne.s32.totalorder %s48_s25, %s8194_s1  ;;  %p8200_p5 = scmp.lt.s32.totalorder %s8194_s1, %s8194_s1 }
  0x1d   :  { %p8201_p6 = por %p8200_p5, %p8199_p4 }
  0x1f   :  { %p8202_p7 = pnand %p8201_p6, %p8195_p3 }
  0x21   :  { %8205 = shalt.err (!%p8202_p7)
}
  0x22   :  { %s8601_s20 = smov 64   ;;  %s8602_s21 = smov 4  }
  0x23   :  { %53 = dma.hbm_to_vmem [thread:$0]  %s9252_s28, 1024, %s48_s25, [#allocation6], %s8601_s20, %s8601_s20, %s8602_s21  }
  0x24   :  { %s8603_s24 = smov [#allocation8]   ;;  %s8604_s27 = smov [#allocation11]  }
  0x25   :  { %s71_s26 = sshll.u32 %s8603_s24, 4  ;;  %s95_s29 = sshll.u32 %s8604_s27, 4  ;;  %s72_s26 = int_to_ptr.vmem [resolvable:$true] %s71_s26  ;;  %s96_s29 = int_to_ptr.vmem [resolvable:$true] %s95_s29 }
  0x26   :  { %s8206_s18 = scalar_lea.hbm %s9229_s3, 1024 }
  0x27   :  { %p8207_p8 = scmp.ne.s32.totalorder %s9229_s3, %s8206_s18  ;;  %p8210_p9 = scmp.lt.u32.totalorder %s8206_s18, %s9229_s3 }
  0x29   :  { %p8212_p10 = pnand %p8210_p9, %p8207_p8 }
  0x2b   :  { %8215 = shalt.err (!%p8212_p10)
}
  0x2c   :  { %s8216_s25 = scalar_lea.vmem %s72_s26, 1024  ;;  %p8221_p12 = scmp.lt.s32.totalorder %s72_s26, %s72_s26 }
  0x2d   :  { %p8217_p11 = scmp.ne.s32.totalorder %s72_s26, %s8216_s25  ;;  %p8222_p13 = scmp.lt.s32.totalorder %s8216_s25, %s8216_s25 }
  0x2f   :  { %p8223_p0 = por %p8222_p13, %p8221_p12 }
  0x31   :  { %p8224_p1 = pnand %p8223_p0, %p8217_p11 }
  0x33   :  { %8227 = shalt.err (!%p8224_p1)
}
  0x34   :  { %77 = dma.hbm_to_vmem [thread:$0]  %s9229_s3, 1024, %s72_s26, [#allocation9], %s8601_s20, %s8601_s20, %s8602_s21  }
  0x35   :  { %s8228_s17 = scalar_lea.hbm %s9231_s5, 1024 }
  0x36   :  { %p8229_p2 = scmp.ne.s32.totalorder %s9231_s5, %s8228_s17  ;;  %p8232_p3 = scmp.lt.u32.totalorder %s8228_s17, %s9231_s5 }
  0x38   :  { %p8234_p4 = pnand %p8232_p3, %p8229_p2 }
  0x3a   :  { %8237 = shalt.err (!%p8234_p4)
}
  0x3b   :  { %s8238_s18 = scalar_lea.vmem %s96_s29, 1024  ;;  %p8243_p6 = scmp.lt.s32.totalorder %s96_s29, %s96_s29 }
  0x3c   :  { %p8239_p5 = scmp.ne.s32.totalorder %s96_s29, %s8238_s18  ;;  %p8244_p7 = scmp.lt.s32.totalorder %s8238_s18, %s8238_s18 }
  0x3e   :  { %p8245_p8 = por %p8244_p7, %p8243_p6 }
  0x40   :  { %p8246_p9 = pnand %p8245_p8, %p8239_p5 }
  0x42   :  { %8249 = shalt.err (!%p8246_p9)
}
  0x43   :  { %101 = dma.hbm_to_vmem [thread:$0]  %s9231_s5, 1024, %s96_s29, [#allocation12], %s8601_s20, %s8601_s20, %s8602_s21  }
  0x44   :  { %s8605_s19 = smov [#allocation14]   ;;  %s8250_s22 = scalar_lea.hbm %s9233_s7, 32768 }
  0x45   :  { %s119_s1 = sshll.u32 %s8605_s19, 4  ;;  %p8251_p10 = scmp.ne.s32.totalorder %s9233_s7, %s8250_s22  ;;  %s120_s1 = int_to_ptr.vmem [resolvable:$true] %s119_s1 }
  0x46   :  { %p8254_p11 = scmp.lt.u32.totalorder %s8250_s22, %s9233_s7 }
  0x48   :  { %p8256_p12 = pnand %p8254_p11, %p8251_p10 }
  0x4a   :  { %8259 = shalt.err (!%p8256_p12)
}
  0x4b   :  { %s8260_s27 = scalar_lea.vmem %s120_s1, 32768  ;;  %p8265_p0 = scmp.lt.s32.totalorder %s120_s1, %s120_s1 }
  0x4c   :  { %p8261_p13 = scmp.ne.s32.totalorder %s120_s1, %s8260_s27  ;;  %p8266_p1 = scmp.lt.s32.totalorder %s8260_s27, %s8260_s27 }
  0x4e   :  { %p8267_p2 = por %p8266_p1, %p8265_p0 }
  0x50   :  { %p8268_p3 = pnand %p8267_p2, %p8261_p13 }
  0x52   :  { %8271 = shalt.err (!%p8268_p3)
}
  0x53   :  { %s8606_s5 = smov 512   ;;  %s8607_s29 = smov 32  }
  0x54   :  { %125 = dma.hbm_to_vmem [thread:$0]  %s9233_s7, 32768, %s120_s1, [#allocation15], %s8606_s5, %s8606_s5, %s8607_s29  }
  0x55   :  { %s8608_s18 = smov [#allocation17]   ;;  %s8609_s26 = smov [#allocation20]  }
  0x56   :  { %s144_s3 = sshll.u32 %s8608_s18, 4  ;;  %s164_s19 = sshll.u32 %s8609_s26, 4  ;;  %s145_s3 = int_to_ptr.vmem [resolvable:$true] %s144_s3  ;;  %s165_s19 = int_to_ptr.vmem [resolvable:$true] %s164_s19 }
  0x57   :  { %s8272_s22 = scalar_lea.hbm %s9235_s9, 16 }
  0x58   :  { %p8273_p4 = scmp.ne.s32.totalorder %s9235_s9, %s8272_s22  ;;  %p8276_p5 = scmp.lt.u32.totalorder %s8272_s22, %s9235_s9 }
  0x5a   :  { %p8278_p6 = pnand %p8276_p5, %p8273_p4 }
  0x5c   :  { %8281 = shalt.err (!%p8278_p6)
}
  0x5d   :  { %s8282_s7 = scalar_lea.vmem %s145_s3, 16  ;;  %s8286_s1 = scalar_lea.vmem %s145_s3, 32 }
  0x5e   :  { %p8283_p7 = scmp.ne.s32.totalorder %s145_s3, %s8282_s7  ;;  %p8287_p8 = scmp.lt.s32.totalorder %s145_s3, %s145_s3 }
  0x5f   :  { %p8288_p9 = scmp.lt.s32.totalorder %s8286_s1, %s8282_s7 }
  0x61   :  { %p8289_p10 = por %p8288_p9, %p8287_p8 }
  0x63   :  { %p8290_p11 = pnand %p8289_p10, %p8283_p7 }
  0x65   :  { %8293 = shalt.err (!%p8290_p11)
}
  0x66   :  { %147 = dma.hbm_to_vmem [thread:$0]  %s9235_s9, 16, %s145_s3, [#allocation18]  }
  0x67   :  { %s8294_s26 = scalar_lea.hbm %s9237_s11, 16 }
  0x68   :  { %p8295_p12 = scmp.ne.s32.totalorder %s9237_s11, %s8294_s26  ;;  %p8298_p13 = scmp.lt.u32.totalorder %s8294_s26, %s9237_s11 }
  0x6a   :  { %p8300_p0 = pnand %p8298_p13, %p8295_p12 }
  0x6c   :  { %8303 = shalt.err (!%p8300_p0)
}
  0x6d   :  { %s8304_s16 = scalar_lea.vmem %s165_s19, 16  ;;  %s8308_s17 = scalar_lea.vmem %s165_s19, 32 }
  0x6e   :  { %p8305_p1 = scmp.ne.s32.totalorder %s165_s19, %s8304_s16  ;;  %p8309_p2 = scmp.lt.s32.totalorder %s165_s19, %s165_s19 }
  0x6f   :  { %p8310_p3 = scmp.lt.s32.totalorder %s8308_s17, %s8304_s16 }
  0x71   :  { %p8311_p4 = por %p8310_p3, %p8309_p2 }
  0x73   :  { %p8312_p5 = pnand %p8311_p4, %p8305_p1 }
  0x75   :  { %8315 = shalt.err (!%p8312_p5)
}
  0x76   :  { %167 = dma.hbm_to_vmem [thread:$0]  %s9237_s11, 16, %s165_s19, [#allocation21]  }
  0x77   :  { %s8610_s24 = smov [#allocation23]   ;;  %s8611_s1 = smov [#allocation26]  }
  0x78   :  { %s184_s7 = sshll.u32 %s8610_s24, 4  ;;  %s204_s27 = sshll.u32 %s8611_s1, 4  ;;  %s185_s7 = int_to_ptr.vmem [resolvable:$true] %s184_s7  ;;  %s205_s27 = int_to_ptr.vmem [resolvable:$true] %s204_s27 }
  0x79   :  { %s8316_s18 = scalar_lea.hbm %s9239_s13, 16 }
  0x7a   :  { %p8317_p6 = scmp.ne.s32.totalorder %s9239_s13, %s8316_s18  ;;  %p8320_p7 = scmp.lt.u32.totalorder %s8316_s18, %s9239_s13 }
  0x7c   :  { %p8322_p8 = pnand %p8320_p7, %p8317_p6 }
  0x7e   :  { %8325 = shalt.err (!%p8322_p8)
}
  0x7f   :  { %s8326_s11 = scalar_lea.vmem %s185_s7, 16  ;;  %s8330_s19 = scalar_lea.vmem %s185_s7, 32 }
  0x80   :  { %p8327_p9 = scmp.ne.s32.totalorder %s185_s7, %s8326_s11  ;;  %p8331_p10 = scmp.lt.s32.totalorder %s185_s7, %s185_s7 }
  0x81   :  { %p8332_p11 = scmp.lt.s32.totalorder %s8330_s19, %s8326_s11 }
  0x83   :  { %p8333_p12 = por %p8332_p11, %p8331_p10 }
  0x85   :  { %p8334_p13 = pnand %p8333_p12, %p8327_p9 }
  0x87   :  { %8337 = shalt.err (!%p8334_p13)
}
  0x88   :  { %187 = dma.hbm_to_vmem [thread:$0]  %s9239_s13, 16, %s185_s7, [#allocation24]  }
  0x89   :  { %s8338_s3 = scalar_lea.hbm %s9241_s15, 128 }
  0x8a   :  { %p8339_p0 = scmp.ne.s32.totalorder %s9241_s15, %s8338_s3  ;;  %p8342_p1 = scmp.lt.u32.totalorder %s8338_s3, %s9241_s15 }
  0x8c   :  { %p8344_p2 = pnand %p8342_p1, %p8339_p0 }
  0x8e   :  { %8347 = shalt.err (!%p8344_p2)
}
  0x8f   :  { %s8348_s18 = scalar_lea.vmem %s205_s27, 128  ;;  %p8353_p4 = scmp.lt.s32.totalorder %s205_s27, %s205_s27 }
  0x90   :  { %p8349_p3 = scmp.ne.s32.totalorder %s205_s27, %s8348_s18  ;;  %p8354_p5 = scmp.lt.s32.totalorder %s8348_s18, %s8348_s18 }
  0x92   :  { %p8355_p6 = por %p8354_p5, %p8353_p4 }
  0x94   :  { %p8356_p7 = pnand %p8355_p6, %p8349_p3 }
  0x96   :  { %8359 = shalt.err (!%p8356_p7)
}
  0x97   :  { %207 = dma.hbm_to_vmem [thread:$0]  %s9241_s15, 128, %s205_s27, [#allocation27]  }
  0x98   :  { %s8612_s26 = smov [#allocation2]   ;;  %s8613_s28 = smov [#allocation7]  }
  0x99   :  { %s38_s25 = sshll.u32 %s8612_s26, 4  ;;  %s59_s22 = sshll.u32 %s8613_s28, 4  ;;  %s39_s25 = int_to_ptr.vmem [resolvable:$true] %s38_s25  ;;  %s8825_s22 = int_to_ptr.vmem [resolvable:$true] %s59_s22 }
  0x9a   :  { %s9253_s23 = sld [smem:[#allocation40_spill]] }
  0xa0   :  { %s8360_s16 = scalar_lea.hbm %s9253_s23, 128 }
  0xa1   :  { %p8361_p8 = scmp.ne.s32.totalorder %s9253_s23, %s8360_s16  ;;  %p8364_p9 = scmp.lt.u32.totalorder %s8360_s16, %s9253_s23 }
  0xa3   :  { %p8366_p10 = pnand %p8364_p9, %p8361_p8 }
  0xa5   :  { %8369 = shalt.err (!%p8366_p10)
}
  0xa6   :  { %s8370_s15 = scalar_lea.vmem %s39_s25, 128  ;;  %p8375_p12 = scmp.lt.s32.totalorder %s39_s25, %s39_s25 }
  0xa7   :  { %p8371_p11 = scmp.ne.s32.totalorder %s39_s25, %s8370_s15  ;;  %p8376_p13 = scmp.lt.s32.totalorder %s8370_s15, %s8370_s15 }
  0xa9   :  { %p8377_p0 = por %p8376_p13, %p8375_p12 }
  0xab   :  { %p8378_p1 = pnand %p8377_p0, %p8371_p11 }
  0xad   :  { %8381 = shalt.err (!%p8378_p1)
}
  0xae   :  { %41 = dma.hbm_to_vmem [thread:$0]  %s9253_s23, 128, %s39_s25, [#allocation3]  }
  0xaf   :  { %s8382_s18 = scalar_lea.hbm %s9228_s2, 1024 }
  0xb0   :  { %p8383_p2 = scmp.ne.s32.totalorder %s9228_s2, %s8382_s18  ;;  %p8386_p3 = scmp.lt.u32.totalorder %s8382_s18, %s9228_s2 }
  0xb2   :  { %p8388_p4 = pnand %p8386_p3, %p8383_p2 }
  0xb4   :  { %8391 = shalt.err (!%p8388_p4)
}
  0xb5   :  { %s8392_s11 = scalar_lea.vmem %s8825_s22, 1024  ;;  %p8397_p6 = scmp.lt.s32.totalorder %s8825_s22, %s8825_s22 }
  0xb6   :  { %p8393_p5 = scmp.ne.s32.totalorder %s8825_s22, %s8392_s11  ;;  %p8398_p7 = scmp.lt.s32.totalorder %s8392_s11, %s8392_s11 }
  0xb8   :  { %p8399_p8 = por %p8398_p7, %p8397_p6 }
  0xba   :  { %p8400_p9 = pnand %p8399_p8, %p8393_p5 }
  0xbc   :  { %8403 = shalt.err (!%p8400_p9)
}
  0xbd   :  { %65 = dma.hbm_to_vmem [thread:$0]  %s9228_s2, 1024, %s8825_s22, [#allocation6], %s8601_s20, %s8601_s20, %s8602_s21  }
  0xbe   :  { %s8614_s23 = smov [#allocation10]   ;;  %s8615_s17 = smov [#allocation13]  }
  0xbf   :  { %s83_s16 = sshll.u32 %s8614_s23, 4  ;;  %s107_s9 = sshll.u32 %s8615_s17, 4  ;;  %s84_s16 = int_to_ptr.vmem [resolvable:$true] %s83_s16  ;;  %s8859_s9 = int_to_ptr.vmem [resolvable:$true] %s107_s9 }
  0xc0   :  { %s8404_s15 = scalar_lea.hbm %s9230_s4, 1024 }
  0xc1   :  { %p8405_p10 = scmp.ne.s32.totalorder %s9230_s4, %s8404_s15  ;;  %p8408_p11 = scmp.lt.u32.totalorder %s8404_s15, %s9230_s4 }
  0xc3   :  { %p8410_p12 = pnand %p8408_p11, %p8405_p10 }
  0xc5   :  { %8413 = shalt.err (!%p8410_p12)
}
  0xc6   :  { %s8414_s2 = scalar_lea.vmem %s84_s16, 1024  ;;  %p8419_p0 = scmp.lt.s32.totalorder %s84_s16, %s84_s16 }
  0xc7   :  { %p8415_p13 = scmp.ne.s32.totalorder %s84_s16, %s8414_s2  ;;  %p8420_p1 = scmp.lt.s32.totalorder %s8414_s2, %s8414_s2 }
  0xc9   :  { %p8421_p2 = por %p8420_p1, %p8419_p0 }
  0xcb   :  { %p8422_p3 = pnand %p8421_p2, %p8415_p13 }
  0xcd   :  { %8425 = shalt.err (!%p8422_p3)
}
  0xce   :  { %89 = dma.hbm_to_vmem [thread:$0]  %s9230_s4, 1024, %s84_s16, [#allocation9], %s8601_s20, %s8601_s20, %s8602_s21  }
  0xcf   :  { %s8426_s26 = scalar_lea.hbm %s9232_s6, 4096 }
  0xd0   :  { %p8427_p4 = scmp.ne.s32.totalorder %s9232_s6, %s8426_s26  ;;  %p8430_p5 = scmp.lt.u32.totalorder %s8426_s26, %s9232_s6 }
  0xd2   :  { %p8432_p6 = pnand %p8430_p5, %p8427_p4 }
  0xd4   :  { %8435 = shalt.err (!%p8432_p6)
}
  0xd5   :  { %s8436_s23 = scalar_lea.vmem %s8859_s9, 4096  ;;  %p8441_p8 = scmp.lt.s32.totalorder %s8859_s9, %s8859_s9 }
  0xd6   :  { %p8437_p7 = scmp.ne.s32.totalorder %s8859_s9, %s8436_s23  ;;  %p8442_p9 = scmp.lt.s32.totalorder %s8436_s23, %s8436_s23 }
  0xd8   :  { %p8443_p10 = por %p8442_p9, %p8441_p8 }
  0xda   :  { %p8444_p11 = pnand %p8443_p10, %p8437_p7 }
  0xdc   :  { %8447 = shalt.err (!%p8444_p11)
}
  0xdd   :  { %s8616_s4 = smov 256   ;;  %s8617_s20 = smov 16  }
  0xde   :  { %113 = dma.hbm_to_vmem [thread:$0]  %s9232_s6, 4096, %s8859_s9, [#allocation12], %s8616_s4, %s8616_s4, %s8617_s20  }
  0xdf   :  { %s8618_s17 = smov [#allocation16]   ;;  %s8619_s24 = smov [#allocation19]  }
  0xe0   :  { %s131_s3 = sshll.u32 %s8618_s17, 4  ;;  %s154_s15 = sshll.u32 %s8619_s24, 4  ;;  %s132_s3 = int_to_ptr.vmem [resolvable:$true] %s131_s3  ;;  %s155_s15 = int_to_ptr.vmem [resolvable:$true] %s154_s15 }
  0xe1   :  { %s8448_s0 = scalar_lea.hbm %s9234_s8, 65536 }
  0xe2   :  { %p8449_p12 = scmp.ne.s32.totalorder %s9234_s8, %s8448_s0  ;;  %p8452_p13 = scmp.lt.u32.totalorder %s8448_s0, %s9234_s8 }
  0xe4   :  { %p8454_p0 = pnand %p8452_p13, %p8449_p12 }
  0xe6   :  { %8457 = shalt.err (!%p8454_p0)
}
  0xe7   :  { %s8458_s6 = scalar_lea.vmem %s132_s3, 65536  ;;  %p8463_p2 = scmp.lt.s32.totalorder %s132_s3, %s132_s3 }
  0xe8   :  { %p8459_p1 = scmp.ne.s32.totalorder %s132_s3, %s8458_s6  ;;  %p8464_p3 = scmp.lt.s32.totalorder %s8458_s6, %s8458_s6 }
  0xea   :  { %p8465_p4 = por %p8464_p3, %p8463_p2 }
  0xec   :  { %p8466_p5 = pnand %p8465_p4, %p8459_p1 }
  0xee   :  { %8469 = shalt.err (!%p8466_p5)
}
  0xef   :  { %137 = dma.hbm_to_vmem [thread:$0]  %s9234_s8, 65536, %s132_s3, [#allocation15], %s8606_s5, %s8606_s5, %s8607_s29  }
  0xf0   :  { %s8470_s28 = scalar_lea.hbm %s9236_s10, 16 }
  0xf1   :  { %p8471_p6 = scmp.ne.s32.totalorder %s9236_s10, %s8470_s28  ;;  %p8474_p7 = scmp.lt.u32.totalorder %s8470_s28, %s9236_s10 }
  0xf3   :  { %p8476_p8 = pnand %p8474_p7, %p8471_p6 }
  0xf5   :  { %8479 = shalt.err (!%p8476_p8)
}
  0xf6   :  { %s8480_s4 = scalar_lea.vmem %s155_s15, 16  ;;  %s8484_s20 = scalar_lea.vmem %s155_s15, 32 }
  0xf7   :  { %p8481_p9 = scmp.ne.s32.totalorder %s155_s15, %s8480_s4  ;;  %p8485_p10 = scmp.lt.s32.totalorder %s155_s15, %s155_s15 }
  0xf8   :  { %p8486_p11 = scmp.lt.s32.totalorder %s8484_s20, %s8480_s4 }
  0xfa   :  { %p8487_p12 = por %p8486_p11, %p8485_p10 }
  0xfc   :  { %p8488_p13 = pnand %p8487_p12, %p8481_p9 }
  0xfe   :  { %8491 = shalt.err (!%p8488_p13)
}
  0xff   :  { %157 = dma.hbm_to_vmem [thread:$0]  %s9236_s10, 16, %s155_s15, [#allocation18]  }
 0x100   :  { %s8620_s29 = smov [#allocation22]   ;;  %s8621_s16 = smov [#allocation25]  }
 0x101   :  { %s174_s21 = sshll.u32 %s8620_s29, 4  ;;  %s194_s17 = sshll.u32 %s8621_s16, 4  ;;  %s175_s21 = int_to_ptr.vmem [resolvable:$true] %s174_s21  ;;  %s195_s17 = int_to_ptr.vmem [resolvable:$true] %s194_s17 }
 0x102   :  { %s8492_s27 = scalar_lea.hbm %s9238_s12, 16 }
 0x103   :  { %p8493_p0 = scmp.ne.s32.totalorder %s9238_s12, %s8492_s27  ;;  %p8496_p1 = scmp.lt.u32.totalorder %s8492_s27, %s9238_s12 }
 0x105   :  { %p8498_p2 = pnand %p8496_p1, %p8493_p0 }
 0x107   :  { %8501 = shalt.err (!%p8498_p2)
}
 0x108   :  { %s8502_s10 = scalar_lea.vmem %s175_s21, 16  ;;  %s8506_s15 = scalar_lea.vmem %s175_s21, 32 }
 0x109   :  { %p8503_p3 = scmp.ne.s32.totalorder %s175_s21, %s8502_s10  ;;  %p8507_p4 = scmp.lt.s32.totalorder %s175_s21, %s175_s21 }
 0x10a   :  { %p8508_p5 = scmp.lt.s32.totalorder %s8506_s15, %s8502_s10 }
 0x10c   :  { %p8509_p6 = por %p8508_p5, %p8507_p4 }
 0x10e   :  { %p8510_p7 = pnand %p8509_p6, %p8503_p3 }
 0x110   :  { %8513 = shalt.err (!%p8510_p7)
}
 0x111   :  { %177 = dma.hbm_to_vmem [thread:$0]  %s9238_s12, 16, %s175_s21, [#allocation21]  }
 0x112   :  { %s8514_s13 = scalar_lea.hbm %s9240_s14, 64 }
 0x113   :  { %p8515_p8 = scmp.ne.s32.totalorder %s9240_s14, %s8514_s13  ;;  %p8518_p9 = scmp.lt.u32.totalorder %s8514_s13, %s9240_s14 }
 0x115   :  { %p8520_p10 = pnand %p8518_p9, %p8515_p8 }
 0x117   :  { %8523 = shalt.err (!%p8520_p10)
}
 0x118   :  { %s8524_s25 = scalar_lea.vmem %s195_s17, 64  ;;  %p8529_p12 = scmp.lt.s32.totalorder %s195_s17, %s195_s17 }
 0x119   :  { %p8525_p11 = scmp.ne.s32.totalorder %s195_s17, %s8524_s25  ;;  %p8530_p13 = scmp.lt.s32.totalorder %s8524_s25, %s8524_s25 }
 0x11b   :  { %p8531_p0 = por %p8530_p13, %p8529_p12 }
 0x11d   :  { %p8532_p1 = pnand %p8531_p0, %p8525_p11 }
 0x11f   :  { %8535 = shalt.err (!%p8532_p1)
}
 0x120   :  { %197 = dma.hbm_to_vmem [thread:$0]  %s9240_s14, 64, %s195_s17, [#allocation24]  }
 0x121   :  { %s8622_s23 = smov [#allocation28]   ;;  %s9254_s5 = sld [smem:[#allocation42_spill]] }
 0x122   :  { %s214_s4 = sshll.u32 %s8622_s23, 4  ;;  %s215_s4 = int_to_ptr.vmem [resolvable:$true] %s214_s4 }
 0x127   :  { %s8536_s29 = scalar_lea.hbm %s9254_s5, 128 }
 0x128   :  { %p8537_p2 = scmp.ne.s32.totalorder %s9254_s5, %s8536_s29  ;;  %p8540_p3 = scmp.lt.u32.totalorder %s8536_s29, %s9254_s5 }
 0x12a   :  { %p8542_p4 = pnand %p8540_p3, %p8537_p2 }
 0x12c   :  { %8545 = shalt.err (!%p8542_p4)
}
 0x12d   :  { %s8546_s27 = scalar_lea.vmem %s215_s4, 128  ;;  %p8551_p6 = scmp.lt.s32.totalorder %s215_s4, %s215_s4 }
 0x12e   :  { %p8547_p5 = scmp.ne.s32.totalorder %s215_s4, %s8546_s27  ;;  %p8552_p7 = scmp.lt.s32.totalorder %s8546_s27, %s8546_s27 }
 0x130   :  { %p8553_p8 = por %p8552_p7, %p8551_p6 }
 0x132   :  { %p8554_p9 = pnand %p8553_p8, %p8547_p5 }
 0x134   :  { %8557 = shalt.err (!%p8554_p9)
}
 0x135   :  { %217 = dma.hbm_to_vmem [thread:$0]  %s9254_s5, 128, %s215_s4, [#allocation27]  }
 0x136   :  { %8580 = dma.done.wait [#allocation3], 128  }
 0x137   :  { %8581 = vsyncadd [#allocation3], 4294967168 }
 0x138   :  { %8582 = dma.done.wait [#allocation6], 2048  }
 0x139   :  { %8583 = vsyncadd [#allocation6], 4294965248 }
 0x13a   :  { %8584 = dma.done.wait [#allocation9], 2048  }
 0x13b   :  { %8585 = vsyncadd [#allocation9], 4294965248 }
 0x13c   :  { %8586 = dma.done.wait [#allocation12], 5120  }
 0x13d   :  { %8587 = vsyncadd [#allocation12], 4294962176 }
 0x13e   :  { %8588 = dma.done.wait [#allocation15], 98304  }
 0x13f   :  { %8589 = vsyncadd [#allocation15], 4294868992 }
 0x140   :  { %8590 = dma.done.wait [#allocation18], 32  }
 0x141   :  { %8591 = vsyncadd [#allocation18], 4294967264 }
 0x142   :  { %8592 = dma.done.wait [#allocation21], 32  }
 0x143   :  { %8593 = vsyncadd [#allocation21], 4294967264 }
 0x144   :  { %8594 = dma.done.wait [#allocation24], 80  }
 0x145   :  { %8595 = vsyncadd [#allocation24], 4294967216 }
 0x146   :  { %8596 = dma.done.wait [#allocation27], 256  }
 0x147   :  { %8597 = vsyncadd [#allocation27], 4294967040  ;;  %v8623_v0 = vmov 0.0   ;;  %vm8624_vm0 = vmmov 0   ;;  %v8047_v1 = vld [vmem:[#allocation5] sm:$0xff]   ;;  %v8048_v2 = vld [vmem:[#allocation5 + $0x8] sm:$0xff]  }
 0x148   :  { %7840 = vmatprep.subr.bf16.mxu0 %v8623_v0  ;;  %7856 = vmatprep.mubr.msk.bf16.mxu0 %vm8624_vm0, %v8623_v0  ;;  %v8049_v3 = vld [vmem:[#allocation5 + $0x10] sm:$0xff]   ;;  %v8055_v4 = vld [vmem:[#allocation7] sm:$0xff]   ;;  %v8050_v5 = vld [vmem:[#allocation5 + $0x18] sm:$0xff]   ;;  %s8626_s1 = smov [#allocation29]  }
 0x149   :  { %7860 = vmatprep.subr.bf16.mxu1 %v8623_v0  ;;  %7876 = vmatprep.mubr.msk.bf16.mxu1 %vm8624_vm0, %v8623_v0  ;;  %v8056_v6 = vld [vmem:[#allocation7 + $0x8] sm:$0xff]   ;;  %v8051_v7 = vld [vmem:[#allocation5 + $0x20] sm:$0xff]   ;;  %v8057_v8 = vld [vmem:[#allocation7 + $0x10] sm:$0xff]   ;;  %s6921_s0 = sshll.u32 %s8626_s1, 4  ;;  %s6922_s0 = int_to_ptr.vmem [resolvable:$true] %s6921_s0 }
 0x14a   :  { %7841 = vmatpush3.bf16.msra.mxu0 %v8047_v1  ;;  %7861 = vmatpush3.bf16.msra.mxu1 %v8055_v4  ;;  %v8052_v9 = vld [vmem:[#allocation5 + $0x28] sm:$0xff]   ;;  %v8058_v10 = vld [vmem:[#allocation7 + $0x18] sm:$0xff]   ;;  %v8053_v11 = vld [vmem:[#allocation5 + $0x30] sm:$0xff]   ;;  %s8558_s30 = scalar_lea.vmem %s6922_s0, 1024  ;;  %p8563_p11 = scmp.lt.s32.totalorder %s6922_s0, %s6922_s0 }
 0x14b   :  { %7842 = vmatprep.subr.bf16.mxu0 %v8623_v0  ;;  %7862 = vmatprep.subr.bf16.mxu1 %v8623_v0  ;;  %v8059_v12 = vld [vmem:[#allocation7 + $0x20] sm:$0xff]   ;;  %v8054_v13 = vld [vmem:[#allocation5 + $0x38] sm:$0xff]   ;;  %v8060_v15 = vld [vmem:[#allocation7 + $0x28] sm:$0xff]   ;;  %p8559_p10 = scmp.ne.s32.totalorder %s6922_s0, %s8558_s30  ;;  %p8564_p12 = scmp.lt.s32.totalorder %s8558_s30, %s8558_s30 }
 0x14c   :  { %v270_v14 = vld [vmem:[#allocation2] sm:$0xff]  ;;  %v8061_v17 = vld [vmem:[#allocation7 + $0x30] sm:$0xff]   ;;  %v8063_v19 = vld [vmem:[#allocation8] sm:$0xff]  }
 0x14d   :  { %v271_v16 = vpack.c.bf16 %v270_v14, %v270_v14  ;;  %v8062_v18 = vld [vmem:[#allocation7 + $0x38] sm:$0xff]   ;;  %v8064_v20 = vld [vmem:[#allocation8 + $0x8] sm:$0xff]   ;;  %v8065_v21 = vld [vmem:[#allocation8 + $0x10] sm:$0xff]   ;;  %p8565_p13 = por %p8564_p12, %p8563_p11 }
 0x14e   :  { %7843 = vmatpush3.bf16.msra.mxu0 %v8048_v2  ;;  %7863 = vmatpush3.bf16.msra.mxu1 %v8056_v6  ;;  %v8066_v22 = vld [vmem:[#allocation8 + $0x18] sm:$0xff]   ;;  %v8067_v23 = vld [vmem:[#allocation8 + $0x20] sm:$0xff]   ;;  %v8068_v24 = vld [vmem:[#allocation8 + $0x28] sm:$0xff]  }
 0x14f   :  { %7844 = vmatprep.subr.bf16.mxu0 %v8623_v0  ;;  %7864 = vmatprep.subr.bf16.mxu1 %v8623_v0  ;;  %v6938_v25 = vld [vmem:[#allocation17] ss:$0 sm:$0xff]  ;;  %v8069_v33 = vld [vmem:[#allocation8 + $0x30] sm:$0xff]   ;;  %v8070_v34 = vld [vmem:[#allocation8 + $0x38] sm:$0xff]   ;;  %p8566_p0 = pnand %p8565_p13, %p8559_p10 }
 0x150   :  { %v8071_v35 = vld [vmem:[#allocation10] sm:$0xff]   ;;  %v8072_v36 = vld [vmem:[#allocation10 + $0x8] sm:$0xff]   ;;  %v8073_v37 = vld [vmem:[#allocation10 + $0x10] sm:$0xff]  }
 0x151   :  { %v8074_v38 = vld [vmem:[#allocation10 + $0x18] sm:$0xff]   ;;  %v8075_v39 = vld [vmem:[#allocation10 + $0x20] sm:$0xff]   ;;  %v8076_v40 = vld [vmem:[#allocation10 + $0x28] sm:$0xff]  }
 0x152   :  { %7845 = vmatpush3.bf16.msra.mxu0 %v8049_v3  ;;  %7865 = vmatpush3.bf16.msra.mxu1 %v8057_v8  ;;  %v6947_v41 = vld [vmem:[#allocation19] ss:$0 sm:$0xff]  ;;  %v8077_v50 = vld [vmem:[#allocation10 + $0x30] sm:$0xff]   ;;  %v8078_v51 = vld [vmem:[#allocation10 + $0x38] sm:$0xff]  }
 0x153   :  { %7846 = vmatprep.subr.bf16.mxu0 %v8623_v0  ;;  %7866 = vmatprep.subr.bf16.mxu1 %v8623_v0  ;;  %v8079_v52 = vld [vmem:[#allocation11] sm:$0xff]   ;;  %v8080_v53 = vld [vmem:[#allocation11 + $0x8] sm:$0xff]   ;;  %v8081_v54 = vld [vmem:[#allocation11 + $0x10] sm:$0xff]  }
 0x154   :  { %v8082_v55 = vld [vmem:[#allocation11 + $0x18] sm:$0xff]   ;;  %v8083_v56 = vld [vmem:[#allocation11 + $0x20] sm:$0xff]   ;;  %v8084_v57 = vld [vmem:[#allocation11 + $0x28] sm:$0xff]  }
 0x155   :  { %v6956_v58 = vld [vmem:[#allocation20] ss:$0 sm:$0xff]  ;;  %v8085_v4 = vld [vmem:[#allocation11 + $0x30] sm:$0xff]   ;;  %v8092_v8 = vld [vmem:[#allocation13 + $0xc] ss:$16 sps:$4 sm:$0xff]  }
 0x156   :  { %7847 = vmatpush3.bf16.msra.mxu0 %v8050_v5  ;;  %7867 = vmatpush3.bf16.msra.mxu1 %v8058_v10  ;;  %v8086_v5 = vld [vmem:[#allocation11 + $0x38] sm:$0xff]   ;;  %v8087_v6 = vld [vmem:[#allocation13] ss:$16 sps:$4 sm:$0xff]  }
 0x157   :  { %7848 = vmatprep.subr.bf16.mxu0 %v8623_v0  ;;  %7868 = vmatprep.subr.bf16.mxu1 %v8623_v0  ;;  %v8093_v10 = vld [vmem:[#allocation13 + $0x20] ss:$16 sps:$4 sm:$0xff]  }
 0x158   :  { %v8105_v14 = vld [vmem:[#allocation13 + $0x60] ss:$16 sps:$4 sm:$0xff]  }
 0x15a   :  { %7849 = vmatpush3.bf16.msra.mxu0 %v8051_v7  ;;  %7869 = vmatpush3.bf16.msra.mxu1 %v8059_v12  ;;  %v8089_v7 = vld [vmem:[#allocation13 + $0x4] ss:$16 sps:$4 sm:$0xff]   ;;  %v8099_v12 = vld [vmem:[#allocation13 + $0x40] ss:$16 sps:$4 sm:$0xff]  }
 0x15b   :  { %7850 = vmatprep.subr.bf16.mxu0 %v8623_v0  ;;  %7870 = vmatprep.subr.bf16.mxu1 %v8623_v0 }
 0x15e   :  { %7851 = vmatpush3.bf16.msra.mxu0 %v8052_v9  ;;  %7871 = vmatpush3.bf16.msra.mxu1 %v8060_v15  ;;  %v8095_v9 = vld [vmem:[#allocation13 + $0x24] ss:$16 sps:$4 sm:$0xff]   ;;  %v8111_v15 = vld [vmem:[#allocation13 + $0x80] ss:$16 sps:$4 sm:$0xff]  }
 0x15f   :  { %7852 = vmatprep.subr.bf16.mxu0 %v8623_v0  ;;  %7872 = vmatprep.subr.bf16.mxu1 %v8623_v0 }
 0x162   :  { %7853 = vmatpush3.bf16.msra.mxu0 %v8053_v11  ;;  %7873 = vmatpush3.bf16.msra.mxu1 %v8061_v17  ;;  %v8101_v11 = vld [vmem:[#allocation13 + $0x44] ss:$16 sps:$4 sm:$0xff]   ;;  %v8117_v17 = vld [vmem:[#allocation13 + $0xa0] ss:$16 sps:$4 sm:$0xff]  }
 0x163   :  { %7854 = vmatprep.subr.bf16.mxu0 %v8623_v0  ;;  %7874 = vmatprep.subr.bf16.mxu1 %v8623_v0 }
 0x166   :  { %7855 = vmatpush3.bf16.msra.mxu0 %v8054_v13  ;;  %7875 = vmatpush3.bf16.msra.mxu1 %v8062_v18  ;;  %v8107_v13 = vld [vmem:[#allocation13 + $0x64] ss:$16 sps:$4 sm:$0xff]  }
 0x167   :  { %7880 = vmatprep.subr.bf16.mxu0 %v8623_v0  ;;  %7900 = vmatprep.subr.bf16.mxu1 %v8623_v0  ;;  %v8125_v18 = vld [vmem:[#allocation13 + $0xc4] ss:$16 sps:$4 sm:$0xff]  }
 0x169   :  { %7857 = vmatmul.mubr.bf16.vlgmr.msra.gmra.mrb[0].mxu0 %v271_v16  ;;  %v8119_v16 = vld [vmem:[#allocation13 + $0xa4] ss:$16 sps:$4 sm:$0xff]  }
 0x16a   :  { %7896 = vmatprep.mubr.msk.bf16.mxu0 %vm8624_vm0, %v8623_v0  ;;  %7881 = vmatpush3.bf16.msra.mxu0 %v8063_v19  ;;  %v8123_v19 = vld [vmem:[#allocation13 + $0xc0] ss:$16 sps:$4 sm:$0xff]  }
 0x16b   :  { %7882 = vmatprep.subr.bf16.mxu0 %v8623_v0 }
 0x16e   :  { %7883 = vmatpush3.bf16.msra.mxu0 %v8064_v20  ;;  %v6965_v20 = vld [vmem:[#allocation22] ss:$0 sm:$0xff] }
 0x16f   :  { %7884 = vmatprep.subr.bf16.mxu0 %v8623_v0 }
 0x172   :  { %7885 = vmatpush3.bf16.msra.mxu0 %v8065_v21 }
 0x173   :  { %7886 = vmatprep.subr.bf16.mxu0 %v8623_v0 }
 0x176   :  { %7887 = vmatpush3.bf16.msra.mxu0 %v8066_v22 }
 0x177   :  { %7888 = vmatprep.subr.bf16.mxu0 %v8623_v0 }
 0x17a   :  { %7889 = vmatpush3.bf16.msra.mxu0 %v8067_v23 }
 0x17b   :  { %7890 = vmatprep.subr.bf16.mxu0 %v8623_v0 }
 0x17e   :  { %7891 = vmatpush3.bf16.msra.mxu0 %v8068_v24 }
 0x17f   :  { %7892 = vmatprep.subr.bf16.mxu0 %v8623_v0 }
 0x182   :  { %7893 = vmatpush3.bf16.msra.mxu0 %v8069_v33  ;;  %v8102_v33 = vld [vmem:[#allocation13 + $0x48] ss:$16 sps:$4 sm:$0xff]  }
 0x183   :  { %7894 = vmatprep.subr.bf16.mxu0 %v8623_v0 }
 0x186   :  { %7895 = vmatpush3.bf16.msra.mxu0 %v8070_v34  ;;  %v8110_v34 = vld [vmem:[#allocation13 + $0x6c] ss:$16 sps:$4 sm:$0xff]  }
 0x187   :  { %7920 = vmatprep.subr.bf16.mxu0 %v8623_v0 }
 0x23c   :  { %v377_v26 = vpop.f32.mrb[0].mxu0 }
 0x23d   :  { %v378_v27 = vadd.f32 %v6938_v25, %v377_v26  ;;  %v7858_v28 = vpop.f32.mrb[1].mxu0 }
 0x23e   :  { %v380_v29 = vpop.f32.mrb[2].mxu0  ;;  %v8090_v28 = vld [vmem:[#allocation13 + $0x8] ss:$16 sps:$4 sm:$0xff]  }
 0x23f   :  { %v383_v30 = vmax.f32 %v378_v27, 0.0  ;;  %v7859_v31 = vpop.f32.mrb[3].mxu0 }
 0x240   :  { %v8096_v31 = vld [vmem:[#allocation13 + $0x28] ss:$16 sps:$4 sm:$0xff]  }
 0x241   :  { %v384_v32 = vpack.c.bf16 %v383_v30, %v383_v30 }
 0x243   :  { %7877 = vmatmul.mubr.bf16.vlgmr.msra.gmra.mrb[0].mxu1 %v384_v32  ;;  %v8104_v32 = vld [vmem:[#allocation13 + $0x4c] ss:$16 sps:$4 sm:$0xff]  }
 0x244   :  { %7916 = vmatprep.mubr.msk.bf16.mxu1 %vm8624_vm0, %v8623_v0  ;;  %7901 = vmatpush3.bf16.msra.mxu1 %v8071_v35  ;;  %v8108_v35 = vld [vmem:[#allocation13 + $0x68] ss:$16 sps:$4 sm:$0xff]  }
 0x245   :  { %7902 = vmatprep.subr.bf16.mxu1 %v8623_v0 }
 0x248   :  { %7903 = vmatpush3.bf16.msra.mxu1 %v8072_v36  ;;  %v8116_v36 = vld [vmem:[#allocation13 + $0x8c] ss:$16 sps:$4 sm:$0xff]  }
 0x249   :  { %7904 = vmatprep.subr.bf16.mxu1 %v8623_v0 }
 0x24c   :  { %7905 = vmatpush3.bf16.msra.mxu1 %v8073_v37  ;;  %v8114_v37 = vld [vmem:[#allocation13 + $0x88] ss:$16 sps:$4 sm:$0xff]  }
 0x24d   :  { %7906 = vmatprep.subr.bf16.mxu1 %v8623_v0 }
 0x250   :  { %7907 = vmatpush3.bf16.msra.mxu1 %v8074_v38  ;;  %v8122_v38 = vld [vmem:[#allocation13 + $0xac] ss:$16 sps:$4 sm:$0xff]  }
 0x251   :  { %7908 = vmatprep.subr.bf16.mxu1 %v8623_v0 }
 0x254   :  { %7909 = vmatpush3.bf16.msra.mxu1 %v8075_v39  ;;  %v8120_v39 = vld [vmem:[#allocation13 + $0xa8] ss:$16 sps:$4 sm:$0xff]  }
 0x255   :  { %7910 = vmatprep.subr.bf16.mxu1 %v8623_v0 }
 0x258   :  { %7911 = vmatpush3.bf16.msra.mxu1 %v8076_v40  ;;  %v8128_v40 = vld [vmem:[#allocation13 + $0xcc] ss:$16 sps:$4 sm:$0xff]  }
 0x259   :  { %7912 = vmatprep.subr.bf16.mxu1 %v8623_v0 }
 0x25c   :  { %7913 = vmatpush3.bf16.msra.mxu1 %v8077_v50 }
 0x25d   :  { %7914 = vmatprep.subr.bf16.mxu1 %v8623_v0 }
 0x260   :  { %7915 = vmatpush3.bf16.msra.mxu1 %v8078_v51 }
 0x261   :  { %1053 = vmatprep.subr.bf16.mxu1 %v8089_v7  ;;  %v1184_v7 = vld [vmem:[#allocation14 + $0x88] sm:$0xff] }
 0x316   :  { %v490_v42 = vpop.f32.mrb[0].mxu1 }
 0x317   :  { %v491_v43 = vadd.f32 %v6947_v41, %v490_v42  ;;  %v7878_v44 = vpop.f32.mrb[1].mxu1  ;;  %v8126_v41 = vld [vmem:[#allocation13 + $0xc8] ss:$16 sps:$4 sm:$0xff]   ;;  %v8131_v42 = vld [vmem:[#allocation13 + $0xe4] ss:$16 sps:$4 sm:$0xff]  }
 0x318   :  { %v493_v45 = vpop.f32.mrb[2].mxu1  ;;  %v8129_v44 = vld [vmem:[#allocation13 + $0xe0] ss:$16 sps:$4 sm:$0xff]  }
 0x319   :  { %v496_v46 = vmax.f32 %v491_v43, 0.0  ;;  %v7879_v47 = vpop.f32.mrb[3].mxu1  ;;  %v8134_v43 = vld [vmem:[#allocation13 + $0xec] ss:$16 sps:$4 sm:$0xff]   ;;  %v8132_v45 = vld [vmem:[#allocation13 + $0xe8] ss:$16 sps:$4 sm:$0xff]  }
 0x31a   :  { %v1167_v47 = vld [vmem:[#allocation14] sm:$0xff] }
 0x31b   :  { %v497_v48 = vadd.f32 %v496_v46, %v383_v30  ;;  %v8098_v30 = vld [vmem:[#allocation13 + $0x2c] ss:$16 sps:$4 sm:$0xff]   ;;  %v8625_v46 = vmov 0  }
 0x31d   :  { %v498_v49 = vpack.c.bf16 %v497_v48, %v497_v48 }
 0x31f   :  { %7897 = vmatmul.mubr.bf16.vlgmr.msra.gmra.mrb[4].mxu0 %v498_v49  ;;  %v1168_v49 = vld [vmem:[#allocation14 + $0x8] sm:$0xff] }
 0x320   :  { %7936 = vmatprep.mubr.msk.bf16.mxu0 %vm8624_vm0, %v8623_v0  ;;  %7921 = vmatpush3.bf16.msra.mxu0 %v8079_v52  ;;  %v1172_v52 = vld [vmem:[#allocation14 + $0x28] sm:$0xff] }
 0x321   :  { %7922 = vmatprep.subr.bf16.mxu0 %v8623_v0 }
 0x324   :  { %7923 = vmatpush3.bf16.msra.mxu0 %v8080_v53  ;;  %v7021_v53 = vcombine.low %v1168_v49, %v1172_v52 }
 0x325   :  { %7924 = vmatprep.subr.bf16.mxu0 %v8623_v0 }
 0x328   :  { %7925 = vmatpush3.bf16.msra.mxu0 %v8081_v54  ;;  %v7022_v54 = vcombine.high %v1168_v49, %v1172_v52 }
 0x329   :  { %7926 = vmatprep.subr.bf16.mxu0 %v8623_v0 }
 0x32c   :  { %7927 = vmatpush3.bf16.msra.mxu0 %v8082_v55  ;;  %v6974_v55 = vld [vmem:[#allocation23] ss:$0 sm:$0xff] }
 0x32d   :  { %7928 = vmatprep.subr.bf16.mxu0 %v8623_v0 }
 0x330   :  { %7929 = vmatpush3.bf16.msra.mxu0 %v8083_v56  ;;  %v1175_v56 = vld [vmem:[#allocation14 + $0x40] sm:$0xff] }
 0x331   :  { %7930 = vmatprep.subr.bf16.mxu0 %v8623_v0 }
 0x334   :  { %7931 = vmatpush3.bf16.msra.mxu0 %v8084_v57 }
 0x335   :  { %7932 = vmatprep.subr.bf16.mxu0 %v8623_v0 }
 0x338   :  { %7933 = vmatpush3.bf16.msra.mxu0 %v8085_v4 }
 0x339   :  { %7934 = vmatprep.subr.bf16.mxu0 %v8623_v0  ;;  %v8113_v0 = vld [vmem:[#allocation13 + $0x84] ss:$16 sps:$4 sm:$0xff]  }
 0x33c   :  { %7935 = vmatpush3.bf16.msra.mxu0 %v8086_v5  ;;  %v1183_v5 = vld [vmem:[#allocation14 + $0x80] sm:$0xff] }
 0x33d   :  { %1094 = vmatprep.subr.bf16.mxu0 %v8092_v8  ;;  %v1188_v8 = vld [vmem:[#allocation14 + $0xa8] sm:$0xff] }
 0x3f2   :  { %v604_v59 = vpop.f32.mrb[4].mxu0 }
 0x3f3   :  { %v605_v60 = vadd.f32 %v6956_v58, %v604_v59  ;;  %v7898_v61 = vpop.f32.mrb[5].mxu0  ;;  %v1179_v58 = vld [vmem:[#allocation14 + $0x60] sm:$0xff]  ;;  %v1176_v59 = vld [vmem:[#allocation14 + $0x48] sm:$0xff] }
 0x3f4   :  { %v607_v62 = vpop.f32.mrb[6].mxu0 }
 0x3f5   :  { %v610_v63 = vmax.f32 %v605_v60, 0.0  ;;  %v7899_v1 = vpop.f32.mrb[7].mxu0  ;;  %v1180_v60 = vld [vmem:[#allocation14 + $0x68] sm:$0xff] }
 0x3f6   :  { %v7030_v4 = vcombine.high %v1176_v59, %v1180_v60 }
 0x3f7   :  { %v611_v2 = vadd.f32 %v610_v63, %v497_v48  ;;  %v1171_v48 = vld [vmem:[#allocation14 + $0x20] sm:$0xff] }
 0x3f8   :  { %v7019_v50 = vcombine.low %v1167_v47, %v1171_v48  ;;  %v7020_v51 = vcombine.high %v1167_v47, %v1171_v48  ;;  %v1228_v47 = vld [vmem:[#allocation14 + $0x1e8] sm:$0xff] }
 0x3f9   :  { %v612_v3 = vpack.c.bf16 %v611_v2, %v611_v2 }
 0x3fb   :  { %7917 = vmatmul.mubr.bf16.vlgmr.msra.gmra.mrb[4].mxu1 %v612_v3  ;;  %v7028_v3 = vcombine.high %v1175_v56, %v1179_v58 }
 0x3fc   :  { %1054 = vmatpush1.bf16.msra.mxu1 %v8087_v6  ;;  %1085 = vmatprep.mubr.bf16.mxu1 %v8625_v46  ;;  %v1187_v6 = vld [vmem:[#allocation14 + $0xa0] sm:$0xff] }
 0x3fd   :  { %1055 = vmatprep.subr.bf16.mxu1 %v8095_v9  ;;  %v7027_v9 = vcombine.low %v1175_v56, %v1179_v58  ;;  %v1232_v56 = vld [vmem:[#allocation14 + $0x208] sm:$0xff] }
 0x3fe   :  { %v1236_v58 = vld [vmem:[#allocation14 + $0x228] sm:$0xff] }
 0x400   :  { %1056 = vmatpush1.bf16.msra.mxu1 %v8093_v10  ;;  %v7029_v10 = vcombine.low %v1176_v59, %v1180_v60  ;;  %v7085_v60 = vcombine.low %v1232_v56, %v1236_v58 }
 0x401   :  { %1057 = vmatprep.subr.bf16.mxu1 %v8101_v11  ;;  %v7036_v11 = vcombine.high %v1183_v5, %v1187_v6 }
 0x404   :  { %1058 = vmatpush1.bf16.msra.mxu1 %v8099_v12  ;;  %v7038_v12 = vcombine.high %v1184_v7, %v1188_v8 }
 0x405   :  { %1059 = vmatprep.subr.bf16.mxu1 %v8107_v13  ;;  %v1191_v13 = vld [vmem:[#allocation14 + $0xc0] sm:$0xff] }
 0x408   :  { %1060 = vmatpush1.bf16.msra.mxu1 %v8105_v14  ;;  %v1195_v14 = vld [vmem:[#allocation14 + $0xe0] sm:$0xff] }
 0x409   :  { %1061 = vmatprep.subr.bf16.mxu1 %v8113_v0  ;;  %v1192_v0 = vld [vmem:[#allocation14 + $0xc8] sm:$0xff] }
 0x40c   :  { %1062 = vmatpush1.bf16.msra.mxu1 %v8111_v15  ;;  %v1196_v15 = vld [vmem:[#allocation14 + $0xe8] sm:$0xff] }
 0x40d   :  { %1063 = vmatprep.subr.bf16.mxu1 %v8119_v16  ;;  %v7035_v16 = vcombine.low %v1183_v5, %v1187_v6 }
 0x410   :  { %1064 = vmatpush1.bf16.msra.mxu1 %v8117_v17  ;;  %v7037_v17 = vcombine.low %v1184_v7, %v1188_v8  ;;  %v1247_v7 = vld [vmem:[#allocation14 + $0x280] sm:$0xff] }
 0x411   :  { %1065 = vmatprep.subr.bf16.mxu1 %v8125_v18  ;;  %v7044_v18 = vcombine.high %v1191_v13, %v1195_v14  ;;  %v1251_v8 = vld [vmem:[#allocation14 + $0x2a0] sm:$0xff] }
 0x414   :  { %1066 = vmatpush1.bf16.msra.mxu1 %v8123_v19  ;;  %v7046_v19 = vcombine.high %v1192_v0, %v1196_v15 }
 0x415   :  { %1067 = vmatprep.subr.bf16.mxu1 %v8131_v42 }
 0x418   :  { %1068 = vmatpush1.bf16.msra.mxu1 %v8129_v44  ;;  %v1223_v44 = vld [vmem:[#allocation14 + $0x1c0] sm:$0xff] }
 0x419   :  { %2745 = vmatprep.subr.bf16.mxu1 %v7020_v51 }
 0x4ce   :  { %v718_v21 = vpop.f32.mrb[4].mxu1 }
 0x4cf   :  { %v719_v22 = vadd.f32 %v6965_v20, %v718_v21  ;;  %v7918_v23 = vpop.f32.mrb[5].mxu1  ;;  %v1199_v20 = vld [vmem:[#allocation14 + $0x100] sm:$0xff] }
 0x4d0   :  { %v721_v24 = vpop.f32.mrb[6].mxu1  ;;  %v1203_v21 = vld [vmem:[#allocation14 + $0x120] sm:$0xff]  ;;  %v1204_v23 = vld [vmem:[#allocation14 + $0x128] sm:$0xff] }
 0x4d1   :  { %v724_v25 = vmax.f32 %v719_v22, 0.0  ;;  %v7919_v26 = vpop.f32.mrb[7].mxu1  ;;  %v1200_v22 = vld [vmem:[#allocation14 + $0x108] sm:$0xff]  ;;  %v7043_v24 = vcombine.low %v1191_v13, %v1195_v14 }
 0x4d2   :  { %v7052_v26 = vcombine.high %v1199_v20, %v1203_v21 }
 0x4d3   :  { %v725_v27 = vadd.f32 %v724_v25, %v611_v2  ;;  %v7045_v25 = vcombine.low %v1192_v0, %v1196_v15  ;;  %v1255_v0 = vld [vmem:[#allocation14 + $0x2c0] sm:$0xff] }
 0x4d4   :  { %v1259_v15 = vld [vmem:[#allocation14 + $0x2e0] sm:$0xff] }
 0x4d5   :  { %v726_v29 = vpack.c.bf16 %v725_v27, %v725_v27  ;;  %v7054_v27 = vcombine.high %v1200_v22, %v1204_v23 }
 0x4d7   :  { %7937 = vmatmul.mubr.bf16.vlgmr.msra.gmra.mrb[8].mxu0 %v726_v29  ;;  %v1211_v29 = vld [vmem:[#allocation14 + $0x160] sm:$0xff] }
 0x4d8   :  { %1095 = vmatpush1.bf16.msra.mxu0 %v8090_v28  ;;  %1126 = vmatprep.mubr.bf16.mxu0 %v8625_v46  ;;  %v1207_v28 = vld [vmem:[#allocation14 + $0x140] sm:$0xff]  ;;  %v1224_v46 = vld [vmem:[#allocation14 + $0x1c8] sm:$0xff] }
 0x4d9   :  { %1096 = vmatprep.subr.bf16.mxu0 %v8098_v30  ;;  %v1208_v30 = vld [vmem:[#allocation14 + $0x148] sm:$0xff]  ;;  %v7078_v51 = vcombine.high %v1224_v46, %v1228_v47 }
 0x4dc   :  { %1097 = vmatpush1.bf16.msra.mxu0 %v8096_v31  ;;  %v1212_v31 = vld [vmem:[#allocation14 + $0x168] sm:$0xff] }
 0x4dd   :  { %1098 = vmatprep.subr.bf16.mxu0 %v8104_v32  ;;  %v7051_v32 = vcombine.low %v1199_v20, %v1203_v21 }
 0x4e0   :  { %1099 = vmatpush1.bf16.msra.mxu0 %v8102_v33  ;;  %v7053_v33 = vcombine.low %v1200_v22, %v1204_v23  ;;  %v1263_v22 = vld [vmem:[#allocation14 + $0x300] sm:$0xff] }
 0x4e1   :  { %1100 = vmatprep.subr.bf16.mxu0 %v8110_v34  ;;  %v7060_v34 = vcombine.high %v1207_v28, %v1211_v29  ;;  %v1267_v23 = vld [vmem:[#allocation14 + $0x320] sm:$0xff] }
 0x4e4   :  { %1101 = vmatpush1.bf16.msra.mxu0 %v8108_v35  ;;  %v7062_v35 = vcombine.high %v1208_v30, %v1212_v31 }
 0x4e5   :  { %1102 = vmatprep.subr.bf16.mxu0 %v8116_v36  ;;  %v1215_v36 = vld [vmem:[#allocation14 + $0x180] sm:$0xff] }
 0x4e8   :  { %1103 = vmatpush1.bf16.msra.mxu0 %v8114_v37  ;;  %v1219_v37 = vld [vmem:[#allocation14 + $0x1a0] sm:$0xff] }
 0x4e9   :  { %1104 = vmatprep.subr.bf16.mxu0 %v8122_v38  ;;  %v1216_v38 = vld [vmem:[#allocation14 + $0x188] sm:$0xff]  ;;  %v7068_v42 = vcombine.high %v1215_v36, %v1219_v37  ;;  %v7067_v48 = vcombine.low %v1215_v36, %v1219_v37 }
 0x4ec   :  { %1105 = vmatpush1.bf16.msra.mxu0 %v8120_v39  ;;  %v1220_v39 = vld [vmem:[#allocation14 + $0x1a8] sm:$0xff] }
 0x4ed   :  { %1106 = vmatprep.subr.bf16.mxu0 %v8128_v40  ;;  %v7059_v40 = vcombine.low %v1207_v28, %v1211_v29  ;;  %v7069_v49 = vcombine.low %v1216_v38, %v1220_v39 }
 0x4f0   :  { %1107 = vmatpush1.bf16.msra.mxu0 %v8126_v41  ;;  %v7061_v41 = vcombine.low %v1208_v30, %v1212_v31  ;;  %v1271_v30 = vld [vmem:[#allocation14 + $0x340] sm:$0xff] }
 0x4f1   :  { %1108 = vmatprep.subr.bf16.mxu0 %v8134_v43  ;;  %v7070_v43 = vcombine.high %v1216_v38, %v1220_v39  ;;  %v1275_v31 = vld [vmem:[#allocation14 + $0x360] sm:$0xff] }
 0x4f2   :  { %v1279_v38 = vld [vmem:[#allocation14 + $0x380] sm:$0xff] }
 0x4f3   :  { %v1283_v39 = vld [vmem:[#allocation14 + $0x3a0] sm:$0xff] }
 0x4f4   :  { %1109 = vmatpush1.bf16.msra.mxu0 %v8132_v45  ;;  %v1227_v45 = vld [vmem:[#allocation14 + $0x1e0] sm:$0xff] }
 0x4f5   :  { %2827 = vmatprep.subr.bf16.mxu0 %v7022_v54  ;;  %v7075_v52 = vcombine.low %v1223_v44, %v1227_v45  ;;  %v1231_v54 = vld [vmem:[#allocation14 + $0x200] sm:$0xff] }
 0x5aa   :  { %v832_v57 = vpop.f32.mrb[8].mxu0 }
 0x5ab   :  { %v833_v61 = vadd.f32 %v6974_v55, %v832_v57  ;;  %v7938_v62 = vpop.f32.mrb[9].mxu0  ;;  %v1235_v55 = vld [vmem:[#allocation14 + $0x220] sm:$0xff] }
 0x5ac   :  { %v835_v63 = vpop.f32.mrb[10].mxu0  ;;  %v7084_v57 = vcombine.high %v1231_v54, %v1235_v55  ;;  %v7083_v59 = vcombine.low %v1231_v54, %v1235_v55  ;;  %v1239_v62 = vld [vmem:[#allocation14 + $0x240] sm:$0xff] }
 0x5ad   :  { %v838_v1 = vpack.c.bf16 %v833_v61, %v833_v61  ;;  %v7939_v2 = vpop.f32.mrb[11].mxu0  ;;  %v7086_v61 = vcombine.high %v1232_v56, %v1236_v58  ;;  %v1243_v63 = vld [vmem:[#allocation14 + $0x260] sm:$0xff]  ;;  %v9010_v56 = vld [vmem:[#allocation14 + $0x408] sm:$0xff] }
 0x5ae   :  { %v7092_v2 = vcombine.high %v1239_v62, %v1243_v63  ;;  %v9006_v54 = vld [vmem:[#allocation14 + $0x400] sm:$0xff]  ;;  %v9014_v58 = vld [vmem:[#allocation14 + $0x428] sm:$0xff] }
 0x5af   :  { %1086 = vmatmul.mubr.bf16.vlgmr.msra.gmra.mrb[8].mxu1 %v838_v1  ;;  %1127 = vmatmul.mubr.bf16.vlgmr.msra.gmra.mrb[12].mxu0 %v838_v1  ;;  %v1240_v1 = vld [vmem:[#allocation14 + $0x248] sm:$0xff]  ;;  %v9008_v55 = vld [vmem:[#allocation14 + $0x420] sm:$0xff] }
 0x5b0   :  { %2746 = vmatpush1.bf16.msra.mxu1 %v7019_v50  ;;  %2828 = vmatpush1.bf16.msra.mxu0 %v7021_v53  ;;  %v7076_v50 = vcombine.high %v1223_v44, %v1227_v45  ;;  %v7077_v53 = vcombine.low %v1224_v46, %v1228_v47  ;;  %v1287_v46 = vld [vmem:[#allocation14 + $0x3c0] sm:$0xff] }
 0x5b1   :  { %2747 = vmatprep.subr.bf16.mxu1 %v7028_v3  ;;  %2829 = vmatprep.subr.bf16.mxu0 %v7030_v4  ;;  %v1244_v3 = vld [vmem:[#allocation14 + $0x268] sm:$0xff]  ;;  %v7091_v4 = vcombine.low %v1239_v62, %v1243_v63  ;;  %v1291_v47 = vld [vmem:[#allocation14 + $0x3e0] sm:$0xff]  ;;  %v873_v62 = vlaneseq }
 0x5b2   :  { %v7093_v5 = vcombine.low %v1240_v1, %v1244_v3  ;;  %v7094_v6 = vcombine.high %v1240_v1, %v1244_v3 }
 0x5b3   :  { %v9022_v63 = vshrl.u32 %v873_v62, 7 }
 0x5b4   :  { %2748 = vmatpush1.bf16.msra.mxu1 %v7027_v9  ;;  %2830 = vmatpush1.bf16.msra.mxu0 %v7029_v10  ;;  %v1248_v9 = vld [vmem:[#allocation14 + $0x288] sm:$0xff]  ;;  %v7100_v10 = vcombine.high %v1247_v7, %v1251_v8 }
 0x5b5   :  { %2749 = vmatprep.subr.bf16.mxu1 %v7036_v11  ;;  %2831 = vmatprep.subr.bf16.mxu0 %v7038_v12  ;;  %v1252_v11 = vld [vmem:[#allocation14 + $0x2a8] sm:$0xff]  ;;  %v7099_v12 = vcombine.low %v1247_v7, %v1251_v8  ;;  %v9025_v1 = vsub.s32 0, %v9022_v63  ;;  %v9030_v3 = vsub.s32 1, %v9022_v63 }
 0x5b6   :  { %v7101_v13 = vcombine.low %v1248_v9, %v1252_v11  ;;  %v7102_v14 = vcombine.high %v1248_v9, %v1252_v11 }
 0x5b8   :  { %2750 = vmatpush1.bf16.msra.mxu1 %v7035_v16  ;;  %2832 = vmatpush1.bf16.msra.mxu0 %v7037_v17  ;;  %v1256_v16 = vld [vmem:[#allocation14 + $0x2c8] sm:$0xff]  ;;  %v7108_v17 = vcombine.high %v1255_v0, %v1259_v15 }
 0x5b9   :  { %2751 = vmatprep.subr.bf16.mxu1 %v7044_v18  ;;  %2833 = vmatprep.subr.bf16.mxu0 %v7046_v19  ;;  %v1260_v18 = vld [vmem:[#allocation14 + $0x2e8] sm:$0xff]  ;;  %v7107_v19 = vcombine.low %v1255_v0, %v1259_v15 }
 0x5ba   :  { %v7109_v20 = vcombine.low %v1256_v16, %v1260_v18  ;;  %v7110_v21 = vcombine.high %v1256_v16, %v1260_v18 }
 0x5bc   :  { %2752 = vmatpush1.bf16.msra.mxu1 %v7043_v24  ;;  %2834 = vmatpush1.bf16.msra.mxu0 %v7045_v25  ;;  %v1264_v24 = vld [vmem:[#allocation14 + $0x308] sm:$0xff]  ;;  %v7116_v25 = vcombine.high %v1263_v22, %v1267_v23 }
 0x5bd   :  { %2753 = vmatprep.subr.bf16.mxu1 %v7052_v26  ;;  %2835 = vmatprep.subr.bf16.mxu0 %v7054_v27  ;;  %v1268_v26 = vld [vmem:[#allocation14 + $0x328] sm:$0xff]  ;;  %v7115_v27 = vcombine.low %v1263_v22, %v1267_v23 }
 0x5be   :  { %v7117_v28 = vcombine.low %v1264_v24, %v1268_v26  ;;  %v7118_v29 = vcombine.high %v1264_v24, %v1268_v26 }
 0x5c0   :  { %2754 = vmatpush1.bf16.msra.mxu1 %v7051_v32  ;;  %2836 = vmatpush1.bf16.msra.mxu0 %v7053_v33  ;;  %v1272_v32 = vld [vmem:[#allocation14 + $0x348] sm:$0xff]  ;;  %v7124_v33 = vcombine.high %v1271_v30, %v1275_v31 }
 0x5c1   :  { %2755 = vmatprep.subr.bf16.mxu1 %v7060_v34  ;;  %2837 = vmatprep.subr.bf16.mxu0 %v7062_v35  ;;  %v1276_v34 = vld [vmem:[#allocation14 + $0x368] sm:$0xff]  ;;  %v7123_v35 = vcombine.low %v1271_v30, %v1275_v31 }
 0x5c2   :  { %v7125_v36 = vcombine.low %v1272_v32, %v1276_v34  ;;  %v7126_v37 = vcombine.high %v1272_v32, %v1276_v34  ;;  %v1303_v32 = vld [vmem:[#allocation14 + $0x440] sm:$0xff] }
 0x5c3   :  { %v1307_v34 = vld [vmem:[#allocation14 + $0x460] sm:$0xff] }
 0x5c4   :  { %2756 = vmatpush1.bf16.msra.mxu1 %v7059_v40  ;;  %2838 = vmatpush1.bf16.msra.mxu0 %v7061_v41  ;;  %v1280_v40 = vld [vmem:[#allocation14 + $0x388] sm:$0xff]  ;;  %v7132_v41 = vcombine.high %v1279_v38, %v1283_v39 }
 0x5c5   :  { %2757 = vmatprep.subr.bf16.mxu1 %v7068_v42  ;;  %2839 = vmatprep.subr.bf16.mxu0 %v7070_v43  ;;  %v1284_v42 = vld [vmem:[#allocation14 + $0x3a8] sm:$0xff]  ;;  %v7131_v43 = vcombine.low %v1279_v38, %v1283_v39  ;;  %v1311_v39 = vld [vmem:[#allocation14 + $0x480] sm:$0xff] }
 0x5c6   :  { %v7133_v44 = vcombine.low %v1280_v40, %v1284_v42  ;;  %v7134_v45 = vcombine.high %v1280_v40, %v1284_v42  ;;  %v7156_v40 = vcombine.high %v1303_v32, %v1307_v34  ;;  %v1315_v42 = vld [vmem:[#allocation14 + $0x4a0] sm:$0xff] }
 0x5c8   :  { %2758 = vmatpush1.bf16.msra.mxu1 %v7067_v48  ;;  %2840 = vmatpush1.bf16.msra.mxu0 %v7069_v49  ;;  %v1288_v48 = vld [vmem:[#allocation14 + $0x3c8] sm:$0xff]  ;;  %v7140_v49 = vcombine.high %v1287_v46, %v1291_v47 }
 0x5c9   :  { %2759 = vmatprep.subr.bf16.mxu1 %v7076_v50  ;;  %2841 = vmatprep.subr.bf16.mxu0 %v7078_v51  ;;  %v1292_v50 = vld [vmem:[#allocation14 + $0x3e8] sm:$0xff]  ;;  %v7139_v51 = vcombine.low %v1287_v46, %v1291_v47  ;;  %v7155_v46 = vcombine.low %v1303_v32, %v1307_v34  ;;  %v1359_v34 = vld [vmem:[#allocation14 + $0x600] sm:$0xff] }
 0x5cc   :  { %2760 = vmatpush1.bf16.msra.mxu1 %v7075_v52  ;;  %2842 = vmatpush1.bf16.msra.mxu0 %v7077_v53  ;;  %v7141_v52 = vcombine.low %v1288_v48, %v1292_v50  ;;  %v7142_v53 = vcombine.high %v1288_v48, %v1292_v50  ;;  %v7164_v48 = vcombine.high %v1311_v39, %v1315_v42  ;;  %v1319_v50 = vld [vmem:[#allocation14 + $0x4c0] sm:$0xff] }
 0x5cd   :  { %2761 = vmatprep.subr.bf16.mxu1 %v7084_v57  ;;  %2843 = vmatprep.subr.bf16.mxu0 %v7086_v61  ;;  %v7148_v57 = vcombine.high %v9006_v54, %v9008_v55  ;;  %v7150_v61 = vcombine.high %v9010_v56, %v9014_v58 }
 0x5d0   :  { %2762 = vmatpush1.bf16.msra.mxu1 %v7083_v59  ;;  %2844 = vmatpush1.bf16.msra.mxu0 %v7085_v60  ;;  %v7147_v59 = vcombine.low %v9006_v54, %v9008_v55  ;;  %v7149_v60 = vcombine.low %v9010_v56, %v9014_v58  ;;  %v7163_v54 = vcombine.low %v1311_v39, %v1315_v42  ;;  %v1327_v58 = vld [vmem:[#allocation14 + $0x500] sm:$0xff]  ;;  %v1364_v39 = vld [vmem:[#allocation14 + $0x628] sm:$0xff] }
 0x5d1   :  { %2763 = vmatprep.subr.bf16.mxu1 %v7092_v2  ;;  %2845 = vmatprep.subr.bf16.mxu0 %v7094_v6  ;;  %v9027_v2 = vld [vmem:[#allocation25] sm:$0xf] }
 0x5d2   :  { %v880_v6 = vrot.slane %v9027_v2, %v9030_v3 }
 0x5d4   :  { %2764 = vmatpush1.bf16.msra.mxu1 %v7091_v4  ;;  %2846 = vmatpush1.bf16.msra.mxu0 %v7093_v5  ;;  %v9033_v4 = vsub.s32 3, %v9022_v63  ;;  %v876_v5 = vrot.slane %v9027_v2, %v9025_v1 }
 0x5d5   :  { %2765 = vmatprep.subr.bf16.mxu1 %v7100_v10  ;;  %2847 = vmatprep.subr.bf16.mxu0 %v7102_v14 }
 0x5d6   :  { %v888_v7 = vrot.slane %v9027_v2, %v9033_v4 }
 0x5d8   :  { %2766 = vmatpush1.bf16.msra.mxu1 %v7099_v12  ;;  %2848 = vmatpush1.bf16.msra.mxu0 %v7101_v13 }
 0x5d9   :  { %2767 = vmatprep.subr.bf16.mxu1 %v7108_v17  ;;  %2849 = vmatprep.subr.bf16.mxu0 %v7110_v21 }
 0x5dc   :  { %2768 = vmatpush1.bf16.msra.mxu1 %v7107_v19  ;;  %2850 = vmatpush1.bf16.msra.mxu0 %v7109_v20 }
 0x5dd   :  { %2769 = vmatprep.subr.bf16.mxu1 %v7116_v25  ;;  %2851 = vmatprep.subr.bf16.mxu0 %v7118_v29 }
 0x5e0   :  { %2770 = vmatpush1.bf16.msra.mxu1 %v7115_v27  ;;  %2852 = vmatpush1.bf16.msra.mxu0 %v7117_v28 }
 0x5e1   :  { %2771 = vmatprep.subr.bf16.mxu1 %v7124_v33  ;;  %2853 = vmatprep.subr.bf16.mxu0 %v7126_v37 }
 0x5e4   :  { %2772 = vmatpush1.bf16.msra.mxu1 %v7123_v35  ;;  %2854 = vmatpush1.bf16.msra.mxu0 %v7125_v36  ;;  %v1304_v35 = vld [vmem:[#allocation14 + $0x448] sm:$0xff] }
 0x5e5   :  { %2773 = vmatprep.subr.bf16.mxu1 %v7132_v41  ;;  %2855 = vmatprep.subr.bf16.mxu0 %v7134_v45  ;;  %v1308_v36 = vld [vmem:[#allocation14 + $0x468] sm:$0xff] }
 0x5e6   :  { %v7158_v41 = vcombine.high %v1304_v35, %v1308_v36  ;;  %v7157_v47 = vcombine.low %v1304_v35, %v1308_v36  ;;  %v1363_v35 = vld [vmem:[#allocation14 + $0x620] sm:$0xff]  ;;  %v1360_v36 = vld [vmem:[#allocation14 + $0x608] sm:$0xff] }
 0x5e8   :  { %2774 = vmatpush1.bf16.msra.mxu1 %v7131_v43  ;;  %2856 = vmatpush1.bf16.msra.mxu0 %v7133_v44  ;;  %v1312_v43 = vld [vmem:[#allocation14 + $0x488] sm:$0xff] }
 0x5e9   :  { %2775 = vmatprep.subr.bf16.mxu1 %v7140_v49  ;;  %2857 = vmatprep.subr.bf16.mxu0 %v7142_v53  ;;  %v1316_v44 = vld [vmem:[#allocation14 + $0x4a8] sm:$0xff] }
 0x5ea   :  { %v7166_v49 = vcombine.high %v1312_v43, %v1316_v44  ;;  %v1324_v53 = vld [vmem:[#allocation14 + $0x4e8] sm:$0xff]  ;;  %v7165_v55 = vcombine.low %v1312_v43, %v1316_v44  ;;  %v7214_v43 = vcombine.high %v1360_v36, %v1364_v39  ;;  %v1367_v44 = vld [vmem:[#allocation14 + $0x640] sm:$0xff] }
 0x5ec   :  { %2776 = vmatpush1.bf16.msra.mxu1 %v7139_v51  ;;  %2858 = vmatpush1.bf16.msra.mxu0 %v7141_v52  ;;  %v1323_v51 = vld [vmem:[#allocation14 + $0x4e0] sm:$0xff]  ;;  %v1320_v52 = vld [vmem:[#allocation14 + $0x4c8] sm:$0xff] }
 0x5ed   :  { %2786 = vmatprep.subr.bf16.mxu1 %v7148_v57  ;;  %2868 = vmatprep.subr.bf16.mxu0 %v7150_v61  ;;  %v7172_v56 = vcombine.high %v1319_v50, %v1323_v51  ;;  %v7174_v57 = vcombine.high %v1320_v52, %v1324_v53  ;;  %v1332_v61 = vld [vmem:[#allocation14 + $0x528] sm:$0xff]  ;;  %v7171_v62 = vcombine.low %v1319_v50, %v1323_v51 }
 0x5ee   :  { %v7213_v50 = vcombine.low %v1360_v36, %v1364_v39 }
 0x682   :  { %v1087_v8 = vpop.f32.mrb[8].mxu1  ;;  %v9041_v9 = vpop.f32.mrb[12].mxu0 }
 0x683   :  { %v1088_v10 = vadd.f32 %v1087_v8, %v876_v5  ;;  %v1089_v11 = vpop.f32.mrb[9].mxu1  ;;  %v1130_v12 = vpop.f32.mrb[13].mxu0  ;;  %v7173_v5 = vcombine.low %v1320_v52, %v1324_v53  ;;  %v1335_v8 = vld [vmem:[#allocation14 + $0x540] sm:$0xff] }
 0x684   :  { %v1090_v13 = vadd.f32 %v1089_v11, %v880_v6  ;;  %v1131_v14 = vadd.f32 %v1130_v12, %v888_v7  ;;  %v1091_v0 = vpop.f32.mrb[10].mxu1  ;;  %v1132_v15 = vpop.f32.mrb[14].mxu0  ;;  %v1336_v11 = vld [vmem:[#allocation14 + $0x548] sm:$0xff]  ;;  %v1375_v53 = vld [vmem:[#allocation14 + $0x680] sm:$0xff] }
 0x685   :  { %v7015_v16 = vmul.f32 -1.442695, %v1088_v10  ;;  %v1092_v17 = vpop.f32.mrb[11].mxu1  ;;  %v1133_v18 = vpop.f32.mrb[15].mxu0  ;;  %v1340_v12 = vld [vmem:[#allocation14 + $0x568] sm:$0xff] }
 0x686   :  { %v7016_v19 = vmul.f32 -1.442695, %v1090_v13  ;;  %v7018_v20 = vmul.f32 -1.442695, %v1131_v14  ;;  %v1343_v17 = vld [vmem:[#allocation14 + $0x580] sm:$0xff] }
 0x687   :  { %8135 = vpow2.f32 %v7015_v16  ;;  %v7190_v16 = vcombine.high %v1336_v11, %v1340_v12  ;;  %v1347_v18 = vld [vmem:[#allocation14 + $0x5a0] sm:$0xff] }
 0x688   :  { %8137 = vpow2.f32 %v7016_v19  ;;  %v1344_v19 = vld [vmem:[#allocation14 + $0x588] sm:$0xff] }
 0x689   :  { %8139 = vpow2.f32 %v7018_v20  ;;  %v1348_v20 = vld [vmem:[#allocation14 + $0x5a8] sm:$0xff] }
 0x68a   :  { %v7197_v32 = vcombine.low %v1344_v19, %v1348_v20 }
 0x691   :  { %v8136_v21 = vpop.eup %8135 }
 0x692   :  { %v1147_v22 = vadd.f32 1.0, %v8136_v21  ;;  %v8138_v23 = vpop.eup %8137 }
 0x693   :  { %v8140_v24 = vpop.eup %8139  ;;  %v1148_v25 = vadd.f32 1.0, %v8138_v23  ;;  %v7189_v23 = vcombine.low %v1336_v11, %v1340_v12 }
 0x694   :  { %8141 = vrcp.f32 %v1147_v22  ;;  %v1150_v26 = vadd.f32 1.0, %v8140_v24  ;;  %v7196_v24 = vcombine.high %v1343_v17, %v1347_v18 }
 0x695   :  { %8143 = vrcp.f32 %v1148_v25  ;;  %v7198_v25 = vcombine.high %v1344_v19, %v1348_v20 }
 0x696   :  { %8145 = vrcp.f32 %v1150_v26  ;;  %v1351_v26 = vld [vmem:[#allocation14 + $0x5c0] sm:$0xff] }
 0x69e   :  { %v8142_v27 = vpop.eup %8141 }
 0x69f   :  { %v8144_v28 = vpop.eup %8143  ;;  %v1159_v29 = vmul.f32 %v8142_v27, %v1088_v10  ;;  %v1339_v10 = vld [vmem:[#allocation14 + $0x560] sm:$0xff] }
 0x6a0   :  { %v8146_v30 = vpop.eup %8145  ;;  %v1160_v31 = vmul.f32 %v8144_v28, %v1090_v13  ;;  %v9056_v13 = vsub.s32 2, %v9022_v63  ;;  %v7188_v15 = vcombine.high %v1335_v8, %v1339_v10  ;;  %v7187_v22 = vcombine.low %v1335_v8, %v1339_v10  ;;  %v1355_v27 = vld [vmem:[#allocation14 + $0x5e0] sm:$0xff]  ;;  %v1352_v28 = vld [vmem:[#allocation14 + $0x5c8] sm:$0xff] }
 0x6a1   :  { %v1162_v33 = vmul.f32 %v8146_v30, %v1131_v14  ;;  %v9045_v38 = vpack.c.bf16 %v1159_v29, %v1159_v29  ;;  %v1356_v29 = vld [vmem:[#allocation14 + $0x5e8] sm:$0xff] }
 0x6a2   :  { %v9043_v37 = vpack.c.bf16 %v1160_v31, %v1160_v31  ;;  %v884_v21 = vrot.slane %v9027_v2, %v9056_v13  ;;  %v7195_v31 = vcombine.low %v1343_v17, %v1347_v18  ;;  %v7204_v2 = vcombine.high %v1351_v26, %v1355_v27 }
 0x6a3   :  { %v9049_v45 = vpack.c.bf16 %v1162_v33, %v1162_v33  ;;  %v7206_v33 = vcombine.high %v1352_v28, %v1356_v29  ;;  %v7205_v42 = vcombine.low %v1352_v28, %v1356_v29 }
 0x6a4   :  { %2777 = vmatprep.mubr.bf16.mxu1 %v9043_v37  ;;  %2859 = vmatprep.mubr.bf16.mxu0 %v9043_v37  ;;  %v9061_v30 = vadd.f32 %v9041_v9, %v884_v21  ;;  %v7212_v9 = vcombine.high %v1359_v34, %v1363_v35 }
 0x6a5   :  { %2778 = vmatmul.mubr.bf16.vlgmr.msra.gmra.mrb[12].mxu1 %v9045_v38  ;;  %2860 = vmatmul.mubr.bf16.vlgmr.msra.gmra.mrb[16].mxu0 %v9045_v38 }
 0x6a6   :  { %2787 = vmatpush1.bf16.msra.mxu1 %v7147_v59  ;;  %2869 = vmatpush1.bf16.msra.mxu0 %v7149_v60  ;;  %v1331_v59 = vld [vmem:[#allocation14 + $0x520] sm:$0xff]  ;;  %v1328_v60 = vld [vmem:[#allocation14 + $0x508] sm:$0xff] }
 0x6a7   :  { %2818 = vmatprep.mubr.bf16.mxu1 %v9049_v45  ;;  %2900 = vmatprep.mubr.bf16.mxu0 %v9049_v45  ;;  %v7180_v6 = vcombine.high %v1327_v58, %v1331_v59  ;;  %v7182_v7 = vcombine.high %v1328_v60, %v1332_v61  ;;  %v7179_v14 = vcombine.low %v1327_v58, %v1331_v59 }
 0x6a8   :  { %2788 = vmatprep.subr.bf16.mxu1 %v7156_v40  ;;  %2870 = vmatprep.subr.bf16.mxu0 %v7158_v41  ;;  %v7181_v0 = vcombine.low %v1328_v60, %v1332_v61  ;;  %v7017_v40 = vmul.f32 -1.442695, %v9061_v30  ;;  %v7203_v41 = vcombine.low %v1351_v26, %v1355_v27  ;;  %v1383_v61 = vld [vmem:[#allocation14 + $0x6c0] sm:$0xff] }
 0x6aa   :  { %2789 = vmatpush1.bf16.msra.mxu1 %v7155_v46  ;;  %2871 = vmatpush1.bf16.msra.mxu0 %v7157_v47  ;;  %v1371_v46 = vld [vmem:[#allocation14 + $0x660] sm:$0xff]  ;;  %v1368_v47 = vld [vmem:[#allocation14 + $0x648] sm:$0xff]  ;;  %8147 = vpow2.f32 %v7017_v40 }
 0x6ab   :  { %2790 = vmatprep.subr.bf16.mxu1 %v7164_v48  ;;  %2872 = vmatprep.subr.bf16.mxu0 %v7166_v49  ;;  %v1372_v48 = vld [vmem:[#allocation14 + $0x668] sm:$0xff]  ;;  %v7211_v49 = vcombine.low %v1359_v34, %v1363_v35  ;;  %v7220_v51 = vcombine.high %v1367_v44, %v1371_v46  ;;  %v1415_v40 = vld [vmem:[#allocation14 + $0x7c0] sm:$0xff] }
 0x6ac   :  { %v7222_v52 = vcombine.high %v1368_v47, %v1372_v48  ;;  %v7221_v58 = vcombine.low %v1368_v47, %v1372_v48  ;;  %v1169_v48 = vld [vmem:[#allocation14 + $0x10] sm:$0xff] }
 0x6ae   :  { %2791 = vmatpush1.bf16.msra.mxu1 %v7163_v54  ;;  %2873 = vmatpush1.bf16.msra.mxu0 %v7165_v55  ;;  %v1379_v54 = vld [vmem:[#allocation14 + $0x6a0] sm:$0xff]  ;;  %v1376_v55 = vld [vmem:[#allocation14 + $0x688] sm:$0xff] }
 0x6af   :  { %2792 = vmatprep.subr.bf16.mxu1 %v7172_v56  ;;  %2874 = vmatprep.subr.bf16.mxu0 %v7174_v57  ;;  %v1380_v56 = vld [vmem:[#allocation14 + $0x6a8] sm:$0xff]  ;;  %v7219_v57 = vcombine.low %v1367_v44, %v1371_v46  ;;  %v7228_v59 = vcombine.high %v1375_v53, %v1379_v54 }
 0x6b0   :  { %v7230_v60 = vcombine.high %v1376_v55, %v1380_v56  ;;  %v7229_v8 = vcombine.low %v1376_v55, %v1380_v56 }
 0x6b2   :  { %2793 = vmatpush1.bf16.msra.mxu1 %v7171_v62  ;;  %2875 = vmatpush1.bf16.msra.mxu0 %v7173_v5  ;;  %v1387_v62 = vld [vmem:[#allocation14 + $0x6e0] sm:$0xff]  ;;  %v1384_v5 = vld [vmem:[#allocation14 + $0x6c8] sm:$0xff] }
 0x6b3   :  { %2794 = vmatprep.subr.bf16.mxu1 %v7180_v6  ;;  %2876 = vmatprep.subr.bf16.mxu0 %v7182_v7  ;;  %v1388_v6 = vld [vmem:[#allocation14 + $0x6e8] sm:$0xff]  ;;  %v7227_v7 = vcombine.low %v1375_v53, %v1379_v54  ;;  %v7236_v11 = vcombine.high %v1383_v61, %v1387_v62  ;;  %v7235_v18 = vcombine.low %v1383_v61, %v1387_v62  ;;  %v1182_v61 = vld [vmem:[#allocation14 + $0x78] sm:$0xff] }
 0x6b4   :  { %v8148_v10 = vpop.eup %8147  ;;  %v7238_v12 = vcombine.high %v1384_v5, %v1388_v6  ;;  %v7237_v19 = vcombine.low %v1384_v5, %v1388_v6 }
 0x6b5   :  { %v1149_v17 = vadd.f32 1.0, %v8148_v10  ;;  %v1185_v10 = vld [vmem:[#allocation14 + $0x90] sm:$0xff] }
 0x6b6   :  { %2795 = vmatpush1.bf16.msra.mxu1 %v7179_v14  ;;  %2877 = vmatpush1.bf16.msra.mxu0 %v7181_v0  ;;  %v1391_v14 = vld [vmem:[#allocation14 + $0x700] sm:$0xff] }
 0x6b7   :  { %2796 = vmatprep.subr.bf16.mxu1 %v7188_v15  ;;  %2878 = vmatprep.subr.bf16.mxu0 %v7190_v16  ;;  %v1395_v0 = vld [vmem:[#allocation14 + $0x720] sm:$0xff]  ;;  %v1392_v15 = vld [vmem:[#allocation14 + $0x708] sm:$0xff]  ;;  %8149 = vrcp.f32 %v1149_v17  ;;  %v1193_v17 = vld [vmem:[#allocation14 + $0xd0] sm:$0xff] }
 0x6b8   :  { %v1396_v16 = vld [vmem:[#allocation14 + $0x728] sm:$0xff]  ;;  %v7244_v20 = vcombine.high %v1391_v14, %v1395_v0  ;;  %v7243_v26 = vcombine.low %v1391_v14, %v1395_v0 }
 0x6b9   :  { %v7246_v21 = vcombine.high %v1392_v15, %v1396_v16  ;;  %v7245_v27 = vcombine.low %v1392_v15, %v1396_v16 }
 0x6ba   :  { %2797 = vmatpush1.bf16.msra.mxu1 %v7187_v22  ;;  %2879 = vmatpush1.bf16.msra.mxu0 %v7189_v23  ;;  %v1399_v22 = vld [vmem:[#allocation14 + $0x740] sm:$0xff] }
 0x6bb   :  { %2798 = vmatprep.subr.bf16.mxu1 %v7196_v24  ;;  %2880 = vmatprep.subr.bf16.mxu0 %v7198_v25  ;;  %v1403_v23 = vld [vmem:[#allocation14 + $0x760] sm:$0xff]  ;;  %v1400_v24 = vld [vmem:[#allocation14 + $0x748] sm:$0xff] }
 0x6bc   :  { %v1404_v25 = vld [vmem:[#allocation14 + $0x768] sm:$0xff]  ;;  %v7252_v28 = vcombine.high %v1399_v22, %v1403_v23  ;;  %v7251_v34 = vcombine.low %v1399_v22, %v1403_v23 }
 0x6bd   :  { %v7254_v29 = vcombine.high %v1400_v24, %v1404_v25  ;;  %v7253_v35 = vcombine.low %v1400_v24, %v1404_v25  ;;  %v1201_v25 = vld [vmem:[#allocation14 + $0x110] sm:$0xff] }
 0x6be   :  { %2799 = vmatpush1.bf16.msra.mxu1 %v7195_v31  ;;  %2881 = vmatpush1.bf16.msra.mxu0 %v7197_v32  ;;  %v1407_v31 = vld [vmem:[#allocation14 + $0x780] sm:$0xff] }
 0x6bf   :  { %2800 = vmatprep.subr.bf16.mxu1 %v7204_v2  ;;  %2882 = vmatprep.subr.bf16.mxu0 %v7206_v33  ;;  %v1411_v32 = vld [vmem:[#allocation14 + $0x7a0] sm:$0xff]  ;;  %v1408_v2 = vld [vmem:[#allocation14 + $0x788] sm:$0xff] }
 0x6c0   :  { %v1412_v33 = vld [vmem:[#allocation14 + $0x7a8] sm:$0xff]  ;;  %v7260_v36 = vcombine.high %v1407_v31, %v1411_v32 }
 0x6c1   :  { %v7262_v39 = vcombine.high %v1408_v2, %v1412_v33  ;;  %v7261_v44 = vcombine.low %v1408_v2, %v1412_v33  ;;  %v1209_v2 = vld [vmem:[#allocation14 + $0x150] sm:$0xff] }
 0x6c2   :  { %2801 = vmatpush1.bf16.msra.mxu1 %v7203_v41  ;;  %2883 = vmatpush1.bf16.msra.mxu0 %v7205_v42  ;;  %v1419_v41 = vld [vmem:[#allocation14 + $0x7e0] sm:$0xff]  ;;  %v1416_v42 = vld [vmem:[#allocation14 + $0x7c8] sm:$0xff]  ;;  %v1213_v33 = vld [vmem:[#allocation14 + $0x170] sm:$0xff] }
 0x6c3   :  { %2802 = vmatprep.subr.bf16.mxu1 %v7212_v9  ;;  %2884 = vmatprep.subr.bf16.mxu0 %v7214_v43  ;;  %v1420_v9 = vld [vmem:[#allocation14 + $0x7e8] sm:$0xff]  ;;  %v7259_v43 = vcombine.low %v1407_v31, %v1411_v32  ;;  %v7268_v46 = vcombine.high %v1415_v40, %v1419_v41  ;;  %v7267_v53 = vcombine.low %v1415_v40, %v1419_v41 }
 0x6c4   :  { %v7270_v47 = vcombine.high %v1416_v42, %v1420_v9  ;;  %v7269_v54 = vcombine.low %v1416_v42, %v1420_v9  ;;  %v7064_v40 = vcombine.high %v1209_v2, %v1213_v33  ;;  %v1217_v42 = vld [vmem:[#allocation14 + $0x190] sm:$0xff] }
 0x6c5   :  { %v1221_v9 = vld [vmem:[#allocation14 + $0x1b0] sm:$0xff] }
 0x6c6   :  { %2803 = vmatpush1.bf16.msra.mxu1 %v7211_v49  ;;  %2885 = vmatpush1.bf16.msra.mxu0 %v7213_v50  ;;  %v8150_v49 = vpop.eup %8149  ;;  %v1173_v50 = vld [vmem:[#allocation14 + $0x30] sm:$0xff] }
 0x6c7   :  { %2804 = vmatprep.subr.bf16.mxu1 %v7220_v51  ;;  %2886 = vmatprep.subr.bf16.mxu0 %v7222_v52  ;;  %v1170_v51 = vld [vmem:[#allocation14 + $0x18] sm:$0xff]  ;;  %v1161_v55 = vmul.f32 %v8150_v49, %v9061_v30  ;;  %v7024_v56 = vcombine.high %v1169_v48, %v1173_v50  ;;  %v7023_v62 = vcombine.low %v1169_v48, %v1173_v50  ;;  %v1189_v30 = vld [vmem:[#allocation14 + $0xb0] sm:$0xff] }
 0x6c8   :  { %v1174_v52 = vld [vmem:[#allocation14 + $0x38] sm:$0xff]  ;;  %v7040_v15 = vcombine.high %v1185_v10, %v1189_v30  ;;  %v7072_v48 = vcombine.high %v1217_v42, %v1221_v9  ;;  %v1225_v50 = vld [vmem:[#allocation14 + $0x1d0] sm:$0xff] }
 0x6c9   :  { %v9065_v5 = vpack.c.bf16 %v1161_v55, %v1161_v55  ;;  %v7025_v6 = vcombine.low %v1170_v51, %v1174_v52 }
 0x6ca   :  { %2805 = vmatpush1.bf16.msra.mxu1 %v7219_v57  ;;  %2887 = vmatpush1.bf16.msra.mxu0 %v7221_v58  ;;  %v7026_v57 = vcombine.high %v1170_v51, %v1174_v52  ;;  %v1177_v58 = vld [vmem:[#allocation14 + $0x50] sm:$0xff]  ;;  %v1226_v52 = vld [vmem:[#allocation14 + $0x1d8] sm:$0xff] }
 0x6cb   :  { %2806 = vmatprep.subr.bf16.mxu1 %v7228_v59  ;;  %2888 = vmatprep.subr.bf16.mxu0 %v7230_v60  ;;  %v1181_v59 = vld [vmem:[#allocation14 + $0x70] sm:$0xff]  ;;  %v1178_v60 = vld [vmem:[#allocation14 + $0x58] sm:$0xff] }
 0x6cc   :  { %v7031_v14 = vcombine.low %v1177_v58, %v1181_v59  ;;  %v7033_v0 = vcombine.low %v1178_v60, %v1182_v61  ;;  %v1229_v51 = vld [vmem:[#allocation14 + $0x1f0] sm:$0xff] }
 0x6ce   :  { %2807 = vmatpush1.bf16.msra.mxu1 %v7227_v7  ;;  %2889 = vmatpush1.bf16.msra.mxu0 %v7229_v8  ;;  %v7032_v7 = vcombine.high %v1177_v58, %v1181_v59  ;;  %v7034_v8 = vcombine.high %v1178_v60, %v1182_v61  ;;  %v1233_v58 = vld [vmem:[#allocation14 + $0x210] sm:$0xff]  ;;  %v1234_v60 = vld [vmem:[#allocation14 + $0x218] sm:$0xff] }
 0x6cf   :  { %2808 = vmatprep.subr.bf16.mxu1 %v7236_v11  ;;  %2890 = vmatprep.subr.bf16.mxu0 %v7238_v12  ;;  %v1186_v11 = vld [vmem:[#allocation14 + $0x98] sm:$0xff]  ;;  %v1237_v59 = vld [vmem:[#allocation14 + $0x230] sm:$0xff] }
 0x6d0   :  { %v1190_v12 = vld [vmem:[#allocation14 + $0xb8] sm:$0xff] }
 0x6d1   :  { %v7042_v16 = vcombine.high %v1186_v11, %v1190_v12  ;;  %v7041_v22 = vcombine.low %v1186_v11, %v1190_v12  ;;  %v1238_v61 = vld [vmem:[#allocation14 + $0x238] sm:$0xff] }
 0x6d2   :  { %2809 = vmatpush1.bf16.msra.mxu1 %v7235_v18  ;;  %2891 = vmatpush1.bf16.msra.mxu0 %v7237_v19  ;;  %v1197_v18 = vld [vmem:[#allocation14 + $0xf0] sm:$0xff]  ;;  %v1194_v19 = vld [vmem:[#allocation14 + $0xd8] sm:$0xff] }
 0x6d3   :  { %2810 = vmatprep.subr.bf16.mxu1 %v7244_v20  ;;  %2892 = vmatprep.subr.bf16.mxu0 %v7246_v21  ;;  %v1198_v20 = vld [vmem:[#allocation14 + $0xf8] sm:$0xff]  ;;  %v7039_v21 = vcombine.low %v1185_v10, %v1189_v30  ;;  %v7048_v23 = vcombine.high %v1193_v17, %v1197_v18  ;;  %v1241_v10 = vld [vmem:[#allocation14 + $0x250] sm:$0xff] }
 0x6d4   :  { %v7050_v24 = vcombine.high %v1194_v19, %v1198_v20  ;;  %v1245_v30 = vld [vmem:[#allocation14 + $0x270] sm:$0xff]  ;;  %v1242_v11 = vld [vmem:[#allocation14 + $0x258] sm:$0xff] }
 0x6d5   :  { %v1246_v12 = vld [vmem:[#allocation14 + $0x278] sm:$0xff] }
 0x6d6   :  { %2811 = vmatpush1.bf16.msra.mxu1 %v7243_v26  ;;  %2893 = vmatpush1.bf16.msra.mxu0 %v7245_v27  ;;  %v1205_v26 = vld [vmem:[#allocation14 + $0x130] sm:$0xff]  ;;  %v1206_v27 = vld [vmem:[#allocation14 + $0x138] sm:$0xff] }
 0x6d7   :  { %2812 = vmatprep.subr.bf16.mxu1 %v7252_v28  ;;  %2894 = vmatprep.subr.bf16.mxu0 %v7254_v29  ;;  %v7047_v28 = vcombine.low %v1193_v17, %v1197_v18  ;;  %v7049_v29 = vcombine.low %v1194_v19, %v1198_v20  ;;  %v7056_v31 = vcombine.high %v1201_v25, %v1205_v26  ;;  %v1249_v17 = vld [vmem:[#allocation14 + $0x290] sm:$0xff]  ;;  %v1250_v19 = vld [vmem:[#allocation14 + $0x298] sm:$0xff] }
 0x6d8   :  { %v1253_v18 = vld [vmem:[#allocation14 + $0x2b0] sm:$0xff]  ;;  %v1254_v20 = vld [vmem:[#allocation14 + $0x2b8] sm:$0xff] }
 0x6da   :  { %2813 = vmatpush1.bf16.msra.mxu1 %v7251_v34  ;;  %2895 = vmatpush1.bf16.msra.mxu0 %v7253_v35  ;;  %v1210_v34 = vld [vmem:[#allocation14 + $0x158] sm:$0xff] }
 0x6db   :  { %2814 = vmatprep.subr.bf16.mxu1 %v7260_v36  ;;  %2896 = vmatprep.subr.bf16.mxu0 %v7262_v39  ;;  %v1214_v35 = vld [vmem:[#allocation14 + $0x178] sm:$0xff]  ;;  %v7055_v36 = vcombine.low %v1201_v25, %v1205_v26  ;;  %v1257_v25 = vld [vmem:[#allocation14 + $0x2d0] sm:$0xff] }
 0x6dc   :  { %v7066_v41 = vcombine.high %v1210_v34, %v1214_v35  ;;  %v1261_v26 = vld [vmem:[#allocation14 + $0x2f0] sm:$0xff] }
 0x6de   :  { %2815 = vmatpush1.bf16.msra.mxu1 %v7259_v43  ;;  %2897 = vmatpush1.bf16.msra.mxu0 %v7261_v44  ;;  %v1218_v43 = vld [vmem:[#allocation14 + $0x198] sm:$0xff] }
 0x6df   :  { %2816 = vmatprep.subr.bf16.mxu1 %v7268_v46  ;;  %2898 = vmatprep.subr.bf16.mxu0 %v7270_v47  ;;  %v1222_v44 = vld [vmem:[#allocation14 + $0x1b8] sm:$0xff]  ;;  %v7063_v46 = vcombine.low %v1209_v2, %v1213_v33  ;;  %v7065_v47 = vcombine.low %v1210_v34, %v1214_v35  ;;  %v1265_v2 = vld [vmem:[#allocation14 + $0x310] sm:$0xff] }
 0x6e0   :  { %v7074_v49 = vcombine.high %v1218_v43, %v1222_v44  ;;  %v7073_v55 = vcombine.low %v1218_v43, %v1222_v44  ;;  %v1269_v33 = vld [vmem:[#allocation14 + $0x330] sm:$0xff]  ;;  %v1266_v34 = vld [vmem:[#allocation14 + $0x318] sm:$0xff] }
 0x6e1   :  { %v1270_v35 = vld [vmem:[#allocation14 + $0x338] sm:$0xff] }
 0x6e2   :  { %2817 = vmatpush1.bf16.msra.mxu1 %v7267_v53  ;;  %2899 = vmatpush1.bf16.msra.mxu0 %v7269_v54  ;;  %v1230_v53 = vld [vmem:[#allocation14 + $0x1f8] sm:$0xff]  ;;  %v7071_v54 = vcombine.low %v1217_v42, %v1221_v9  ;;  %v1273_v42 = vld [vmem:[#allocation14 + $0x350] sm:$0xff] }
 0x6e3   :  { %2909 = vmatprep.subr.bf16.mxu1 %v7024_v56  ;;  %2991 = vmatprep.subr.bf16.mxu0 %v7026_v57  ;;  %v7080_v56 = vcombine.high %v1225_v50, %v1229_v51  ;;  %v7082_v57 = vcombine.high %v1226_v52, %v1230_v53  ;;  %v1277_v9 = vld [vmem:[#allocation14 + $0x370] sm:$0xff]  ;;  %v1274_v43 = vld [vmem:[#allocation14 + $0x358] sm:$0xff] }
 0x6e4   :  { %v1278_v44 = vld [vmem:[#allocation14 + $0x378] sm:$0xff] }
 0x6e5   :  { %2819 = vmatmul.mubr.bf16.vlgmr.msra.gmra.mrb[12].mxu1 %v9065_v5  ;;  %2901 = vmatmul.mubr.bf16.vlgmr.msra.gmra.mrb[16].mxu0 %v9065_v5 }
 0x6e6   :  { %2910 = vmatpush1.bf16.msra.mxu1 %v7023_v62  ;;  %2941 = vmatprep.mubr.bf16.mxu1 %v9043_v37  ;;  %v7079_v62 = vcombine.low %v1225_v50, %v1229_v51  ;;  %v1281_v50 = vld [vmem:[#allocation14 + $0x390] sm:$0xff] }
 0x6e7   :  { %2992 = vmatpush1.bf16.msra.mxu0 %v7025_v6  ;;  %3023 = vmatprep.mubr.bf16.mxu0 %v9043_v37  ;;  %v1202_v37 = vld [vmem:[#allocation14 + $0x118] sm:$0xff]  ;;  %v7081_v6 = vcombine.low %v1226_v52, %v1230_v53  ;;  %v1285_v51 = vld [vmem:[#allocation14 + $0x3b0] sm:$0xff] }
 0x6e8   :  { %2911 = vmatprep.subr.bf16.mxu1 %v7032_v7  ;;  %2993 = vmatprep.subr.bf16.mxu0 %v7034_v8  ;;  %v7058_v32 = vcombine.high %v1202_v37, %v1206_v27  ;;  %v7057_v39 = vcombine.low %v1202_v37, %v1206_v27  ;;  %v7088_v7 = vcombine.high %v1233_v58, %v1237_v59  ;;  %v1258_v37 = vld [vmem:[#allocation14 + $0x2d8] sm:$0xff] }
 0x6e9   :  { %v7090_v8 = vcombine.high %v1234_v60, %v1238_v61  ;;  %v1262_v27 = vld [vmem:[#allocation14 + $0x2f8] sm:$0xff] }
 0x6ea   :  { %2912 = vmatpush1.bf16.msra.mxu1 %v7031_v14  ;;  %v7087_v14 = vcombine.low %v1233_v58, %v1237_v59  ;;  %v1282_v52 = vld [vmem:[#allocation14 + $0x398] sm:$0xff]  ;;  %v1289_v58 = vld [vmem:[#allocation14 + $0x3d0] sm:$0xff] }
 0x6eb   :  { %2994 = vmatpush1.bf16.msra.mxu0 %v7033_v0  ;;  %2913 = vmatprep.subr.bf16.mxu1 %v7040_v15  ;;  %v7089_v0 = vcombine.low %v1234_v60, %v1238_v61  ;;  %v7096_v15 = vcombine.high %v1241_v10, %v1245_v30  ;;  %v1286_v53 = vld [vmem:[#allocation14 + $0x3b8] sm:$0xff]  ;;  %v1293_v59 = vld [vmem:[#allocation14 + $0x3f0] sm:$0xff] }
 0x6ec   :  { %2995 = vmatprep.subr.bf16.mxu0 %v7042_v16  ;;  %v7098_v16 = vcombine.high %v1242_v11, %v1246_v12  ;;  %v1290_v60 = vld [vmem:[#allocation14 + $0x3d8] sm:$0xff] }
 0x6ed   :  { %v1294_v61 = vld [vmem:[#allocation14 + $0x3f8] sm:$0xff] }
 0x6ee   :  { %2914 = vmatpush1.bf16.msra.mxu1 %v7039_v21  ;;  %v7095_v21 = vcombine.low %v1241_v10, %v1245_v30  ;;  %v1297_v10 = vld [vmem:[#allocation14 + $0x410] sm:$0xff] }
 0x6ef   :  { %2996 = vmatpush1.bf16.msra.mxu0 %v7041_v22  ;;  %2915 = vmatprep.subr.bf16.mxu1 %v7048_v23  ;;  %v7097_v22 = vcombine.low %v1242_v11, %v1246_v12  ;;  %v7104_v23 = vcombine.high %v1249_v17, %v1253_v18  ;;  %v1301_v30 = vld [vmem:[#allocation14 + $0x430] sm:$0xff]  ;;  %v1298_v11 = vld [vmem:[#allocation14 + $0x418] sm:$0xff] }
 0x6f0   :  { %2997 = vmatprep.subr.bf16.mxu0 %v7050_v24  ;;  %v7106_v24 = vcombine.high %v1250_v19, %v1254_v20  ;;  %v1302_v12 = vld [vmem:[#allocation14 + $0x438] sm:$0xff] }
 0x6f2   :  { %2916 = vmatpush1.bf16.msra.mxu1 %v7047_v28  ;;  %v7103_v28 = vcombine.low %v1249_v17, %v1253_v18  ;;  %v1305_v17 = vld [vmem:[#allocation14 + $0x450] sm:$0xff] }
 0x6f3   :  { %2998 = vmatpush1.bf16.msra.mxu0 %v7049_v29  ;;  %2917 = vmatprep.subr.bf16.mxu1 %v7056_v31  ;;  %v7105_v29 = vcombine.low %v1250_v19, %v1254_v20  ;;  %v7112_v31 = vcombine.high %v1257_v25, %v1261_v26  ;;  %v1309_v18 = vld [vmem:[#allocation14 + $0x470] sm:$0xff]  ;;  %v7151_v19 = vcombine.low %v1297_v10, %v1301_v30  ;;  %v1306_v20 = vld [vmem:[#allocation14 + $0x458] sm:$0xff] }
 0x6f4   :  { %2999 = vmatprep.subr.bf16.mxu0 %v7058_v32  ;;  %v7114_v32 = vcombine.high %v1258_v37, %v1262_v27 }
 0x6f6   :  { %2918 = vmatpush1.bf16.msra.mxu1 %v7055_v36  ;;  %v7111_v36 = vcombine.low %v1257_v25, %v1261_v26  ;;  %v1317_v25 = vld [vmem:[#allocation14 + $0x4b0] sm:$0xff] }
 0x6f7   :  { %3000 = vmatpush1.bf16.msra.mxu0 %v7057_v39  ;;  %2919 = vmatprep.subr.bf16.mxu1 %v7064_v40  ;;  %v7113_v39 = vcombine.low %v1258_v37, %v1262_v27  ;;  %v7120_v40 = vcombine.high %v1265_v2, %v1269_v33  ;;  %v1314_v37 = vld [vmem:[#allocation14 + $0x498] sm:$0xff] }
 0x6f8   :  { %3001 = vmatprep.subr.bf16.mxu0 %v7066_v41  ;;  %v7122_v41 = vcombine.high %v1266_v34, %v1270_v35  ;;  %v1318_v27 = vld [vmem:[#allocation14 + $0x4b8] sm:$0xff] }
 0x6fa   :  { %2920 = vmatpush1.bf16.msra.mxu1 %v7063_v46  ;;  %v7119_v46 = vcombine.low %v1265_v2, %v1269_v33  ;;  %v1321_v2 = vld [vmem:[#allocation14 + $0x4d0] sm:$0xff] }
 0x6fb   :  { %3002 = vmatpush1.bf16.msra.mxu0 %v7065_v47  ;;  %2921 = vmatprep.subr.bf16.mxu1 %v7072_v48  ;;  %v7121_v47 = vcombine.low %v1266_v34, %v1270_v35  ;;  %v7128_v48 = vcombine.high %v1273_v42, %v1277_v9  ;;  %v1325_v33 = vld [vmem:[#allocation14 + $0x4f0] sm:$0xff]  ;;  %v1322_v34 = vld [vmem:[#allocation14 + $0x4d8] sm:$0xff] }
 0x6fc   :  { %3003 = vmatprep.subr.bf16.mxu0 %v7074_v49  ;;  %v7130_v49 = vcombine.high %v1274_v43, %v1278_v44  ;;  %v1326_v35 = vld [vmem:[#allocation14 + $0x4f8] sm:$0xff] }
 0x6fe   :  { %2922 = vmatpush1.bf16.msra.mxu1 %v7071_v54  ;;  %v7127_v54 = vcombine.low %v1273_v42, %v1277_v9  ;;  %v1333_v42 = vld [vmem:[#allocation14 + $0x530] sm:$0xff]  ;;  %v1330_v9 = vld [vmem:[#allocation14 + $0x518] sm:$0xff] }
 0x6ff   :  { %3004 = vmatpush1.bf16.msra.mxu0 %v7073_v55  ;;  %2923 = vmatprep.subr.bf16.mxu1 %v7080_v56  ;;  %v7129_v55 = vcombine.low %v1274_v43, %v1278_v44  ;;  %v7136_v56 = vcombine.high %v1281_v50, %v1285_v51  ;;  %v1334_v43 = vld [vmem:[#allocation14 + $0x538] sm:$0xff]  ;;  %v7177_v44 = vcombine.low %v1322_v34, %v1326_v35 }
 0x700   :  { %3005 = vmatprep.subr.bf16.mxu0 %v7082_v57  ;;  %v7138_v57 = vcombine.high %v1282_v52, %v1286_v53 }
 0x702   :  { %2924 = vmatpush1.bf16.msra.mxu1 %v7079_v62  ;;  %v7135_v62 = vcombine.low %v1281_v50, %v1285_v51  ;;  %v1338_v50 = vld [vmem:[#allocation14 + $0x558] sm:$0xff] }
 0x703   :  { %3006 = vmatpush1.bf16.msra.mxu0 %v7081_v6  ;;  %2925 = vmatprep.subr.bf16.mxu1 %v7088_v7  ;;  %v7137_v6 = vcombine.low %v1282_v52, %v1286_v53  ;;  %v7144_v7 = vcombine.high %v1289_v58, %v1293_v59  ;;  %v1342_v51 = vld [vmem:[#allocation14 + $0x578] sm:$0xff]  ;;  %v7185_v53 = vcombine.low %v1330_v9, %v1334_v43 }
 0x704   :  { %3007 = vmatprep.subr.bf16.mxu0 %v7090_v8  ;;  %v7146_v8 = vcombine.high %v1290_v60, %v1294_v61 }
 0x706   :  { %2926 = vmatpush1.bf16.msra.mxu1 %v7087_v14  ;;  %v7143_v14 = vcombine.low %v1289_v58, %v1293_v59  ;;  %v1346_v58 = vld [vmem:[#allocation14 + $0x598] sm:$0xff] }
 0x707   :  { %3008 = vmatpush1.bf16.msra.mxu0 %v7089_v0  ;;  %2927 = vmatprep.subr.bf16.mxu1 %v7096_v15  ;;  %v7145_v0 = vcombine.low %v1290_v60, %v1294_v61  ;;  %v7152_v15 = vcombine.high %v1297_v10, %v1301_v30  ;;  %v1350_v59 = vld [vmem:[#allocation14 + $0x5b8] sm:$0xff]  ;;  %v7193_v61 = vcombine.low %v1338_v50, %v1342_v51 }
 0x708   :  { %3009 = vmatprep.subr.bf16.mxu0 %v7098_v16  ;;  %v7154_v16 = vcombine.high %v1298_v11, %v1302_v12  ;;  %v1354_v10 = vld [vmem:[#allocation14 + $0x5d8] sm:$0xff] }
 0x709   :  { %v1358_v30 = vld [vmem:[#allocation14 + $0x5f8] sm:$0xff] }
 0x70a   :  { %2928 = vmatpush1.bf16.msra.mxu1 %v7095_v21  ;;  %v1310_v21 = vld [vmem:[#allocation14 + $0x478] sm:$0xff] }
 0x70b   :  { %3010 = vmatpush1.bf16.msra.mxu0 %v7097_v22  ;;  %2929 = vmatprep.subr.bf16.mxu1 %v7104_v23  ;;  %v7153_v22 = vcombine.low %v1298_v11, %v1302_v12  ;;  %v7160_v23 = vcombine.high %v1305_v17, %v1309_v18  ;;  %v7162_v26 = vcombine.high %v1306_v20, %v1310_v21 }
 0x70c   :  { %3011 = vmatprep.subr.bf16.mxu0 %v7106_v24  ;;  %v1313_v24 = vld [vmem:[#allocation14 + $0x490] sm:$0xff]  ;;  %v7201_v12 = vcombine.low %v1346_v58, %v1350_v59 }
 0x70e   :  { %2930 = vmatpush1.bf16.msra.mxu1 %v7103_v28  ;;  %v7159_v28 = vcombine.low %v1305_v17, %v1309_v18  ;;  %v1362_v17 = vld [vmem:[#allocation14 + $0x618] sm:$0xff] }
 0x70f   :  { %3012 = vmatpush1.bf16.msra.mxu0 %v7105_v29  ;;  %2931 = vmatprep.subr.bf16.mxu1 %v7112_v31  ;;  %v7161_v29 = vcombine.low %v1306_v20, %v1310_v21  ;;  %v7168_v31 = vcombine.high %v1313_v24, %v1317_v25  ;;  %v1366_v18 = vld [vmem:[#allocation14 + $0x638] sm:$0xff]  ;;  %v7209_v20 = vcombine.low %v1354_v10, %v1358_v30 }
 0x710   :  { %3013 = vmatprep.subr.bf16.mxu0 %v7114_v32  ;;  %v7170_v32 = vcombine.high %v1314_v37, %v1318_v27 }
 0x712   :  { %2932 = vmatpush1.bf16.msra.mxu1 %v7111_v36  ;;  %v7167_v36 = vcombine.low %v1313_v24, %v1317_v25  ;;  %v1373_v24 = vld [vmem:[#allocation14 + $0x670] sm:$0xff]  ;;  %v1370_v25 = vld [vmem:[#allocation14 + $0x658] sm:$0xff] }
 0x713   :  { %3014 = vmatpush1.bf16.msra.mxu0 %v7113_v39  ;;  %2933 = vmatprep.subr.bf16.mxu1 %v7120_v40  ;;  %v7176_v39 = vcombine.high %v1321_v2, %v1325_v33  ;;  %v7178_v40 = vcombine.high %v1322_v34, %v1326_v35 }
 0x714   :  { %3015 = vmatprep.subr.bf16.mxu0 %v7122_v41  ;;  %v1329_v41 = vld [vmem:[#allocation14 + $0x510] sm:$0xff] }
 0x715   :  { %v7183_v52 = vcombine.low %v1329_v41, %v1333_v42 }
 0x716   :  { %2934 = vmatpush1.bf16.msra.mxu1 %v7119_v46  ;;  %v7184_v46 = vcombine.high %v1329_v41, %v1333_v42  ;;  %v1386_v41 = vld [vmem:[#allocation14 + $0x6d8] sm:$0xff] }
 0x717   :  { %3016 = vmatpush1.bf16.msra.mxu0 %v7121_v47  ;;  %2935 = vmatprep.subr.bf16.mxu1 %v7128_v48  ;;  %v7186_v47 = vcombine.high %v1330_v9, %v1334_v43  ;;  %v1337_v48 = vld [vmem:[#allocation14 + $0x550] sm:$0xff]  ;;  %v1390_v42 = vld [vmem:[#allocation14 + $0x6f8] sm:$0xff] }
 0x718   :  { %3017 = vmatprep.subr.bf16.mxu0 %v7130_v49  ;;  %v1341_v49 = vld [vmem:[#allocation14 + $0x570] sm:$0xff] }
 0x719   :  { %v7191_v60 = vcombine.low %v1337_v48, %v1341_v49 }
 0x71a   :  { %2936 = vmatpush1.bf16.msra.mxu1 %v7127_v54  ;;  %v7192_v54 = vcombine.high %v1337_v48, %v1341_v49  ;;  %v1394_v48 = vld [vmem:[#allocation14 + $0x718] sm:$0xff] }
 0x71b   :  { %3018 = vmatpush1.bf16.msra.mxu0 %v7129_v55  ;;  %2937 = vmatprep.subr.bf16.mxu1 %v7136_v56  ;;  %v7194_v55 = vcombine.high %v1338_v50, %v1342_v51  ;;  %v1345_v56 = vld [vmem:[#allocation14 + $0x590] sm:$0xff]  ;;  %v1398_v49 = vld [vmem:[#allocation14 + $0x738] sm:$0xff]  ;;  %v7241_v51 = vcombine.low %v1386_v41, %v1390_v42 }
 0x71c   :  { %3019 = vmatprep.subr.bf16.mxu0 %v7138_v57  ;;  %v1349_v57 = vld [vmem:[#allocation14 + $0x5b0] sm:$0xff] }
 0x71d   :  { %v7199_v11 = vcombine.low %v1345_v56, %v1349_v57 }
 0x71e   :  { %2938 = vmatpush1.bf16.msra.mxu1 %v7135_v62  ;;  %v7200_v62 = vcombine.high %v1345_v56, %v1349_v57  ;;  %v1402_v56 = vld [vmem:[#allocation14 + $0x758] sm:$0xff] }
 0x71f   :  { %3020 = vmatpush1.bf16.msra.mxu0 %v7137_v6  ;;  %2939 = vmatprep.subr.bf16.mxu1 %v7144_v7  ;;  %v7202_v6 = vcombine.high %v1346_v58, %v1350_v59  ;;  %v1353_v7 = vld [vmem:[#allocation14 + $0x5d0] sm:$0xff]  ;;  %v1406_v57 = vld [vmem:[#allocation14 + $0x778] sm:$0xff]  ;;  %v7249_v59 = vcombine.low %v1394_v48, %v1398_v49 }
 0x720   :  { %3021 = vmatprep.subr.bf16.mxu0 %v7146_v8  ;;  %v1357_v8 = vld [vmem:[#allocation14 + $0x5f0] sm:$0xff] }
 0x722   :  { %2940 = vmatpush1.bf16.msra.mxu1 %v7143_v14  ;;  %v7208_v14 = vcombine.high %v1353_v7, %v1357_v8 }
 0x723   :  { %3022 = vmatpush1.bf16.msra.mxu0 %v7145_v0  ;;  %2950 = vmatprep.subr.bf16.mxu1 %v7152_v15  ;;  %v7210_v0 = vcombine.high %v1354_v10, %v1358_v30  ;;  %v1361_v15 = vld [vmem:[#allocation14 + $0x610] sm:$0xff]  ;;  %v7257_v30 = vcombine.low %v1402_v56, %v1406_v57 }
 0x724   :  { %3032 = vmatprep.subr.bf16.mxu0 %v7154_v16  ;;  %v1365_v16 = vld [vmem:[#allocation14 + $0x630] sm:$0xff] }
 0x725   :  { %2942 = vmatmul.mubr.bf16.vlgmr.msra.gmra.mrb[16].mxu1 %v9045_v38  ;;  %v7216_v21 = vcombine.high %v1361_v15, %v1365_v16 }
 0x726   :  { %3024 = vmatmul.mubr.bf16.vlgmr.msra.gmra.mrb[20].mxu0 %v9045_v38  ;;  %2951 = vmatpush1.bf16.msra.mxu1 %v7151_v19  ;;  %v7169_v38 = vcombine.low %v1314_v37, %v1318_v27  ;;  %v7207_v19 = vcombine.low %v1353_v7, %v1357_v8  ;;  %v7215_v37 = vcombine.low %v1361_v15, %v1365_v16  ;;  %v1410_v7 = vld [vmem:[#allocation14 + $0x798] sm:$0xff] }
 0x727   :  { %2982 = vmatprep.mubr.bf16.mxu1 %v9049_v45  ;;  %3033 = vmatpush1.bf16.msra.mxu0 %v7153_v22  ;;  %v7218_v22 = vcombine.high %v1362_v17, %v1366_v18  ;;  %v7217_v27 = vcombine.low %v1362_v17, %v1366_v18  ;;  %v1414_v8 = vld [vmem:[#allocation14 + $0x7b8] sm:$0xff] }
 0x728   :  { %3064 = vmatprep.mubr.bf16.mxu0 %v9049_v45  ;;  %2952 = vmatprep.subr.bf16.mxu1 %v7160_v23  ;;  %v7175_v45 = vcombine.low %v1321_v2, %v1325_v33  ;;  %v1369_v23 = vld [vmem:[#allocation14 + $0x650] sm:$0xff]  ;;  %v1378_v2 = vld [vmem:[#allocation14 + $0x698] sm:$0xff]  ;;  %v7265_v18 = vcombine.low %v1410_v7, %v1414_v8 }
 0x729   :  { %3034 = vmatprep.subr.bf16.mxu0 %v7162_v26  ;;  %v1374_v26 = vld [vmem:[#allocation14 + $0x678] sm:$0xff]  ;;  %v7223_v34 = vcombine.low %v1369_v23, %v1373_v24 }
 0x72a   :  { %2953 = vmatpush1.bf16.msra.mxu1 %v7159_v28  ;;  %v7224_v28 = vcombine.high %v1369_v23, %v1373_v24  ;;  %v1382_v33 = vld [vmem:[#allocation14 + $0x6b8] sm:$0xff]  ;;  %v7225_v35 = vcombine.low %v1370_v25, %v1374_v26  ;;  %v3138_v23 = vld [vmem:[#allocation16 + $0x8] sm:$0xff] }
 0x72b   :  { %3035 = vmatpush1.bf16.msra.mxu0 %v7161_v29  ;;  %2954 = vmatprep.subr.bf16.mxu1 %v7168_v31  ;;  %v7226_v29 = vcombine.high %v1370_v25, %v1374_v26  ;;  %v1377_v31 = vld [vmem:[#allocation14 + $0x690] sm:$0xff]  ;;  %v7233_v43 = vcombine.low %v1378_v2, %v1382_v33  ;;  %v1418_v15 = vld [vmem:[#allocation14 + $0x7d8] sm:$0xff]  ;;  %v3142_v24 = vld [vmem:[#allocation16 + $0x28] sm:$0xff] }
 0x72c   :  { %3036 = vmatprep.subr.bf16.mxu0 %v7170_v32  ;;  %v1381_v32 = vld [vmem:[#allocation14 + $0x6b0] sm:$0xff]  ;;  %v1422_v16 = vld [vmem:[#allocation14 + $0x7f8] sm:$0xff] }
 0x72d   :  { %v7231_v9 = vcombine.low %v1377_v31, %v1381_v32  ;;  %v7273_v26 = vcombine.low %v1418_v15, %v1422_v16 }
 0x72e   :  { %2955 = vmatpush1.bf16.msra.mxu1 %v7167_v36  ;;  %v7232_v36 = vcombine.high %v1377_v31, %v1381_v32  ;;  %v3146_v31 = vld [vmem:[#allocation16 + $0x48] sm:$0xff] }
 0x72f   :  { %3037 = vmatpush1.bf16.msra.mxu0 %v7169_v38  ;;  %2956 = vmatprep.subr.bf16.mxu1 %v7176_v39  ;;  %v7234_v38 = vcombine.high %v1378_v2, %v1382_v33  ;;  %v1385_v39 = vld [vmem:[#allocation14 + $0x6d0] sm:$0xff]  ;;  %v3150_v32 = vld [vmem:[#allocation16 + $0x68] sm:$0xff]  ;;  %v7285_v33 = vcombine.low %v3138_v23, %v3142_v24 }
 0x730   :  { %3038 = vmatprep.subr.bf16.mxu0 %v7178_v40  ;;  %v1389_v40 = vld [vmem:[#allocation14 + $0x6f0] sm:$0xff] }
 0x731   :  { %v7239_v50 = vcombine.low %v1385_v39, %v1389_v40 }
 0x732   :  { %2957 = vmatpush1.bf16.msra.mxu1 %v7175_v45  ;;  %v7240_v45 = vcombine.high %v1385_v39, %v1389_v40  ;;  %v3154_v39 = vld [vmem:[#allocation16 + $0x88] sm:$0xff] }
 0x733   :  { %3039 = vmatpush1.bf16.msra.mxu0 %v7177_v44  ;;  %2958 = vmatprep.subr.bf16.mxu1 %v7184_v46  ;;  %v7242_v44 = vcombine.high %v1386_v41, %v1390_v42  ;;  %v1393_v46 = vld [vmem:[#allocation14 + $0x710] sm:$0xff]  ;;  %v3158_v40 = vld [vmem:[#allocation16 + $0xa8] sm:$0xff]  ;;  %v7293_v42 = vcombine.low %v3146_v31, %v3150_v32 }
 0x734   :  { %3040 = vmatprep.subr.bf16.mxu0 %v7186_v47  ;;  %v1397_v47 = vld [vmem:[#allocation14 + $0x730] sm:$0xff] }
 0x735   :  { %v7247_v58 = vcombine.low %v1393_v46, %v1397_v47 }
 0x736   :  { %2959 = vmatpush1.bf16.msra.mxu1 %v7183_v52  ;;  %v7248_v52 = vcombine.high %v1393_v46, %v1397_v47  ;;  %v3162_v46 = vld [vmem:[#allocation16 + $0xc8] sm:$0xff] }
 0x737   :  { %3041 = vmatpush1.bf16.msra.mxu0 %v7185_v53  ;;  %2960 = vmatprep.subr.bf16.mxu1 %v7192_v54  ;;  %v7250_v53 = vcombine.high %v1394_v48, %v1398_v49  ;;  %v1401_v54 = vld [vmem:[#allocation14 + $0x750] sm:$0xff]  ;;  %v3166_v47 = vld [vmem:[#allocation16 + $0xe8] sm:$0xff]  ;;  %v7301_v49 = vcombine.low %v3154_v39, %v3158_v40 }
 0x738   :  { %3042 = vmatprep.subr.bf16.mxu0 %v7194_v55  ;;  %v1405_v55 = vld [vmem:[#allocation14 + $0x770] sm:$0xff] }
 0x739   :  { %v7255_v10 = vcombine.low %v1401_v54, %v1405_v55 }
 0x73a   :  { %2961 = vmatpush1.bf16.msra.mxu1 %v7191_v60  ;;  %v7256_v60 = vcombine.high %v1401_v54, %v1405_v55  ;;  %v3174_v54 = vld [vmem:[#allocation16 + $0x128] sm:$0xff] }
 0x73b   :  { %3043 = vmatpush1.bf16.msra.mxu0 %v7193_v61  ;;  %2962 = vmatprep.subr.bf16.mxu1 %v7200_v62  ;;  %v7258_v61 = vcombine.high %v1402_v56, %v1406_v57  ;;  %v1409_v62 = vld [vmem:[#allocation14 + $0x790] sm:$0xff]  ;;  %v7309_v56 = vcombine.low %v3162_v46, %v3166_v47 }
 0x73c   :  { %3044 = vmatprep.subr.bf16.mxu0 %v7202_v6  ;;  %v1413_v6 = vld [vmem:[#allocation14 + $0x7b0] sm:$0xff] }
 0x73d   :  { %v7263_v17 = vcombine.low %v1409_v62, %v1413_v6 }
 0x73e   :  { %2963 = vmatpush1.bf16.msra.mxu1 %v7199_v11  ;;  %v7264_v11 = vcombine.high %v1409_v62, %v1413_v6  ;;  %v3182_v62 = vld [vmem:[#allocation16 + $0x168] sm:$0xff] }
 0x73f   :  { %3045 = vmatpush1.bf16.msra.mxu0 %v7201_v12  ;;  %2964 = vmatprep.subr.bf16.mxu1 %v7208_v14  ;;  %v7266_v12 = vcombine.high %v1410_v7, %v1414_v8  ;;  %v1417_v14 = vld [vmem:[#allocation14 + $0x7d0] sm:$0xff] }
 0x740   :  { %3046 = vmatprep.subr.bf16.mxu0 %v7210_v0  ;;  %v1421_v0 = vld [vmem:[#allocation14 + $0x7f0] sm:$0xff] }
 0x741   :  { %v7271_v25 = vcombine.low %v1417_v14, %v1421_v0 }
 0x742   :  { %2965 = vmatpush1.bf16.msra.mxu1 %v7207_v19  ;;  %v7272_v19 = vcombine.high %v1417_v14, %v1421_v0  ;;  %v3190_v14 = vld [vmem:[#allocation16 + $0x1a8] sm:$0xff] }
 0x743   :  { %3047 = vmatpush1.bf16.msra.mxu0 %v7209_v20  ;;  %2966 = vmatprep.subr.bf16.mxu1 %v7216_v21  ;;  %v7274_v20 = vcombine.high %v1418_v15, %v1422_v16  ;;  %v3137_v21 = vld [vmem:[#allocation16] sm:$0xff] }
 0x744   :  { %3048 = vmatprep.subr.bf16.mxu0 %v7218_v22  ;;  %v3141_v22 = vld [vmem:[#allocation16 + $0x20] sm:$0xff] }
 0x745   :  { %v7283_v2 = vcombine.low %v3137_v21, %v3141_v22 }
 0x746   :  { %2967 = vmatpush1.bf16.msra.mxu1 %v7215_v37  ;;  %v7284_v37 = vcombine.high %v3137_v21, %v3141_v22  ;;  %v3198_v21 = vld [vmem:[#allocation16 + $0x1e8] sm:$0xff] }
 0x747   :  { %3049 = vmatpush1.bf16.msra.mxu0 %v7217_v27  ;;  %2968 = vmatprep.subr.bf16.mxu1 %v7224_v28  ;;  %v7286_v27 = vcombine.high %v3138_v23, %v3142_v24  ;;  %v3145_v28 = vld [vmem:[#allocation16 + $0x40] sm:$0xff] }
 0x748   :  { %3050 = vmatprep.subr.bf16.mxu0 %v7226_v29  ;;  %v3149_v29 = vld [vmem:[#allocation16 + $0x60] sm:$0xff] }
 0x749   :  { %v7291_v41 = vcombine.low %v3145_v28, %v3149_v29 }
 0x74a   :  { %2969 = vmatpush1.bf16.msra.mxu1 %v7223_v34  ;;  %v7292_v34 = vcombine.high %v3145_v28, %v3149_v29  ;;  %v3206_v28 = vld [vmem:[#allocation16 + $0x228] sm:$0xff] }
 0x74b   :  { %3051 = vmatpush1.bf16.msra.mxu0 %v7225_v35  ;;  %2970 = vmatprep.subr.bf16.mxu1 %v7232_v36  ;;  %v7294_v35 = vcombine.high %v3146_v31, %v3150_v32  ;;  %v3153_v36 = vld [vmem:[#allocation16 + $0x80] sm:$0xff] }
 0x74c   :  { %3052 = vmatprep.subr.bf16.mxu0 %v7234_v38  ;;  %v3157_v38 = vld [vmem:[#allocation16 + $0xa0] sm:$0xff] }
 0x74d   :  { %v7299_v48 = vcombine.low %v3153_v36, %v3157_v38 }
 0x74e   :  { %2971 = vmatpush1.bf16.msra.mxu1 %v7231_v9  ;;  %v7300_v9 = vcombine.high %v3153_v36, %v3157_v38  ;;  %v3214_v36 = vld [vmem:[#allocation16 + $0x268] sm:$0xff] }
 0x74f   :  { %3053 = vmatpush1.bf16.msra.mxu0 %v7233_v43  ;;  %2972 = vmatprep.subr.bf16.mxu1 %v7240_v45  ;;  %v7302_v43 = vcombine.high %v3154_v39, %v3158_v40  ;;  %v3161_v45 = vld [vmem:[#allocation16 + $0xc0] sm:$0xff] }
 0x750   :  { %3054 = vmatprep.subr.bf16.mxu0 %v7242_v44  ;;  %v3165_v44 = vld [vmem:[#allocation16 + $0xe0] sm:$0xff] }
 0x751   :  { %v7307_v55 = vcombine.low %v3161_v45, %v3165_v44 }
 0x752   :  { %2973 = vmatpush1.bf16.msra.mxu1 %v7239_v50  ;;  %v7308_v50 = vcombine.high %v3161_v45, %v3165_v44  ;;  %v3222_v45 = vld [vmem:[#allocation16 + $0x2a8] sm:$0xff] }
 0x753   :  { %3055 = vmatpush1.bf16.msra.mxu0 %v7241_v51  ;;  %2974 = vmatprep.subr.bf16.mxu1 %v7248_v52  ;;  %v3169_v51 = vld [vmem:[#allocation16 + $0x100] sm:$0xff] }
 0x754   :  { %3056 = vmatprep.subr.bf16.mxu0 %v7250_v53  ;;  %v3173_v52 = vld [vmem:[#allocation16 + $0x120] sm:$0xff]  ;;  %v3170_v53 = vld [vmem:[#allocation16 + $0x108] sm:$0xff] }
 0x755   :  { %v7316_v57 = vcombine.high %v3169_v51, %v3173_v52  ;;  %v7315_v6 = vcombine.low %v3169_v51, %v3173_v52  ;;  %v7317_v7 = vcombine.low %v3170_v53, %v3174_v54  ;;  %v3230_v51 = vld [vmem:[#allocation16 + $0x2e8] sm:$0xff] }
 0x756   :  { %2975 = vmatpush1.bf16.msra.mxu1 %v7247_v58  ;;  %v7318_v58 = vcombine.high %v3170_v53, %v3174_v54 }
 0x757   :  { %3057 = vmatpush1.bf16.msra.mxu0 %v7249_v59  ;;  %2976 = vmatprep.subr.bf16.mxu1 %v7256_v60  ;;  %v3177_v59 = vld [vmem:[#allocation16 + $0x140] sm:$0xff] }
 0x758   :  { %3058 = vmatprep.subr.bf16.mxu0 %v7258_v61  ;;  %v3181_v60 = vld [vmem:[#allocation16 + $0x160] sm:$0xff]  ;;  %v3178_v61 = vld [vmem:[#allocation16 + $0x148] sm:$0xff] }
 0x759   :  { %v7324_v8 = vcombine.high %v3177_v59, %v3181_v60  ;;  %v7323_v0 = vcombine.low %v3177_v59, %v3181_v60  ;;  %v7325_v15 = vcombine.low %v3178_v61, %v3182_v62  ;;  %v3238_v59 = vld [vmem:[#allocation16 + $0x328] sm:$0xff] }
 0x75a   :  { %2977 = vmatpush1.bf16.msra.mxu1 %v7255_v10  ;;  %v7326_v10 = vcombine.high %v3178_v61, %v3182_v62 }
 0x75b   :  { %3059 = vmatpush1.bf16.msra.mxu0 %v7257_v30  ;;  %2978 = vmatprep.subr.bf16.mxu1 %v7264_v11  ;;  %v3185_v30 = vld [vmem:[#allocation16 + $0x180] sm:$0xff] }
 0x75c   :  { %3060 = vmatprep.subr.bf16.mxu0 %v7266_v12  ;;  %v3189_v11 = vld [vmem:[#allocation16 + $0x1a0] sm:$0xff]  ;;  %v3186_v12 = vld [vmem:[#allocation16 + $0x188] sm:$0xff] }
 0x75d   :  { %v7332_v16 = vcombine.high %v3185_v30, %v3189_v11  ;;  %v7331_v22 = vcombine.low %v3185_v30, %v3189_v11  ;;  %v7333_v23 = vcombine.low %v3186_v12, %v3190_v14  ;;  %v3246_v30 = vld [vmem:[#allocation16 + $0x368] sm:$0xff] }
 0x75e   :  { %2979 = vmatpush1.bf16.msra.mxu1 %v7263_v17  ;;  %v7334_v17 = vcombine.high %v3186_v12, %v3190_v14 }
 0x75f   :  { %3061 = vmatpush1.bf16.msra.mxu0 %v7265_v18  ;;  %2980 = vmatprep.subr.bf16.mxu1 %v7272_v19  ;;  %v3193_v18 = vld [vmem:[#allocation16 + $0x1c0] sm:$0xff] }
 0x760   :  { %3062 = vmatprep.subr.bf16.mxu0 %v7274_v20  ;;  %v3197_v19 = vld [vmem:[#allocation16 + $0x1e0] sm:$0xff]  ;;  %v3194_v20 = vld [vmem:[#allocation16 + $0x1c8] sm:$0xff] }
 0x761   :  { %v7340_v24 = vcombine.high %v3193_v18, %v3197_v19  ;;  %v7339_v29 = vcombine.low %v3193_v18, %v3197_v19  ;;  %v7341_v31 = vcombine.low %v3194_v20, %v3198_v21  ;;  %v3254_v18 = vld [vmem:[#allocation16 + $0x3a8] sm:$0xff] }
 0x762   :  { %2981 = vmatpush1.bf16.msra.mxu1 %v7271_v25  ;;  %v7342_v25 = vcombine.high %v3194_v20, %v3198_v21 }
 0x763   :  { %3063 = vmatpush1.bf16.msra.mxu0 %v7273_v26  ;;  %6251 = vmatprep.subr.bf16.mxu1 %v7284_v37  ;;  %v3201_v26 = vld [vmem:[#allocation16 + $0x200] sm:$0xff] }
 0x764   :  { %6415 = vmatprep.subr.bf16.mxu0 %v7286_v27  ;;  %v3205_v37 = vld [vmem:[#allocation16 + $0x220] sm:$0xff]  ;;  %v3202_v27 = vld [vmem:[#allocation16 + $0x208] sm:$0xff] }
 0x765   :  { %2983 = vmatmul.mubr.bf16.vlgmr.msra.gmra.mrb[16].mxu1 %v9065_v5  ;;  %v7348_v32 = vcombine.high %v3201_v26, %v3205_v37  ;;  %v7347_v38 = vcombine.low %v3201_v26, %v3205_v37  ;;  %v7349_v39 = vcombine.low %v3202_v27, %v3206_v28  ;;  %v3262_v26 = vld [vmem:[#allocation16 + $0x3e8] sm:$0xff] }
 0x766   :  { %3065 = vmatmul.mubr.bf16.vlgmr.msra.gmra.mrb[20].mxu0 %v9065_v5  ;;  %6252 = vmatpush1.bf16.msra.mxu1 %v7283_v2  ;;  %v7310_v5 = vcombine.high %v3162_v46, %v3166_v47  ;;  %v7350_v2 = vcombine.high %v3202_v27, %v3206_v28 }
 0x767   :  { %6416 = vmatpush1.bf16.msra.mxu0 %v7285_v33  ;;  %6253 = vmatprep.subr.bf16.mxu1 %v7292_v34  ;;  %v3209_v33 = vld [vmem:[#allocation16 + $0x240] sm:$0xff] }
 0x768   :  { %6417 = vmatprep.subr.bf16.mxu0 %v7294_v35  ;;  %v3213_v34 = vld [vmem:[#allocation16 + $0x260] sm:$0xff]  ;;  %v3210_v35 = vld [vmem:[#allocation16 + $0x248] sm:$0xff] }
 0x769   :  { %v7356_v40 = vcombine.high %v3209_v33, %v3213_v34  ;;  %v7355_v44 = vcombine.low %v3209_v33, %v3213_v34  ;;  %v7357_v46 = vcombine.low %v3210_v35, %v3214_v36  ;;  %v9083_v33 = vld [vmem:[#allocation16 + $0x428] sm:$0xff] }
 0x76a   :  { %6254 = vmatpush1.bf16.msra.mxu1 %v7291_v41  ;;  %v7358_v41 = vcombine.high %v3210_v35, %v3214_v36 }
 0x76b   :  { %6418 = vmatpush1.bf16.msra.mxu0 %v7293_v42  ;;  %6255 = vmatprep.subr.bf16.mxu1 %v7300_v9  ;;  %v3217_v42 = vld [vmem:[#allocation16 + $0x280] sm:$0xff] }
 0x76c   :  { %6419 = vmatprep.subr.bf16.mxu0 %v7302_v43  ;;  %v3221_v9 = vld [vmem:[#allocation16 + $0x2a0] sm:$0xff]  ;;  %v3218_v43 = vld [vmem:[#allocation16 + $0x288] sm:$0xff] }
 0x76d   :  { %v7364_v47 = vcombine.high %v3217_v42, %v3221_v9  ;;  %v7363_v52 = vcombine.low %v3217_v42, %v3221_v9  ;;  %v7365_v53 = vcombine.low %v3218_v43, %v3222_v45 }
 0x76e   :  { %6256 = vmatpush1.bf16.msra.mxu1 %v7299_v48  ;;  %v7366_v48 = vcombine.high %v3218_v43, %v3222_v45 }
 0x76f   :  { %6420 = vmatpush1.bf16.msra.mxu0 %v7301_v49  ;;  %6257 = vmatprep.subr.bf16.mxu1 %v7308_v50  ;;  %v3225_v49 = vld [vmem:[#allocation16 + $0x2c0] sm:$0xff] }
 0x770   :  { %6421 = vmatprep.subr.bf16.mxu0 %v7310_v5  ;;  %v3229_v50 = vld [vmem:[#allocation16 + $0x2e0] sm:$0xff]  ;;  %v3226_v5 = vld [vmem:[#allocation16 + $0x2c8] sm:$0xff] }
 0x771   :  { %v7372_v54 = vcombine.high %v3225_v49, %v3229_v50  ;;  %v7371_v60 = vcombine.low %v3225_v49, %v3229_v50  ;;  %v7373_v61 = vcombine.low %v3226_v5, %v3230_v51 }
 0x772   :  { %6258 = vmatpush1.bf16.msra.mxu1 %v7307_v55  ;;  %v7374_v55 = vcombine.high %v3226_v5, %v3230_v51 }
 0x773   :  { %6422 = vmatpush1.bf16.msra.mxu0 %v7309_v56  ;;  %6259 = vmatprep.subr.bf16.mxu1 %v7316_v57  ;;  %v3233_v56 = vld [vmem:[#allocation16 + $0x300] sm:$0xff] }
 0x774   :  { %6423 = vmatprep.subr.bf16.mxu0 %v7318_v58  ;;  %v3237_v57 = vld [vmem:[#allocation16 + $0x320] sm:$0xff]  ;;  %v3234_v58 = vld [vmem:[#allocation16 + $0x308] sm:$0xff] }
 0x775   :  { %v7380_v62 = vcombine.high %v3233_v56, %v3237_v57  ;;  %v7379_v11 = vcombine.low %v3233_v56, %v3237_v57  ;;  %v7381_v12 = vcombine.low %v3234_v58, %v3238_v59 }
 0x776   :  { %6260 = vmatpush1.bf16.msra.mxu1 %v7315_v6  ;;  %v7382_v6 = vcombine.high %v3234_v58, %v3238_v59 }
 0x777   :  { %6424 = vmatpush1.bf16.msra.mxu0 %v7317_v7  ;;  %6261 = vmatprep.subr.bf16.mxu1 %v7324_v8  ;;  %v3241_v7 = vld [vmem:[#allocation16 + $0x340] sm:$0xff] }
 0x778   :  { %6425 = vmatprep.subr.bf16.mxu0 %v7326_v10  ;;  %v3245_v8 = vld [vmem:[#allocation16 + $0x360] sm:$0xff]  ;;  %v3242_v10 = vld [vmem:[#allocation16 + $0x348] sm:$0xff] }
 0x779   :  { %v7388_v14 = vcombine.high %v3241_v7, %v3245_v8  ;;  %v7387_v19 = vcombine.low %v3241_v7, %v3245_v8  ;;  %v7389_v20 = vcombine.low %v3242_v10, %v3246_v30 }
 0x77a   :  { %6262 = vmatpush1.bf16.msra.mxu1 %v7323_v0  ;;  %v7390_v0 = vcombine.high %v3242_v10, %v3246_v30  ;;  %v3273_v10 = vld [vmem:[#allocation16 + $0x440] sm:$0xff] }
 0x77b   :  { %6426 = vmatpush1.bf16.msra.mxu0 %v7325_v15  ;;  %6263 = vmatprep.subr.bf16.mxu1 %v7332_v16  ;;  %v3249_v15 = vld [vmem:[#allocation16 + $0x380] sm:$0xff] }
 0x77c   :  { %6427 = vmatprep.subr.bf16.mxu0 %v7334_v17  ;;  %v3253_v16 = vld [vmem:[#allocation16 + $0x3a0] sm:$0xff]  ;;  %v3250_v17 = vld [vmem:[#allocation16 + $0x388] sm:$0xff] }
 0x77d   :  { %v7396_v21 = vcombine.high %v3249_v15, %v3253_v16  ;;  %v7395_v37 = vcombine.low %v3249_v15, %v3253_v16  ;;  %v7397_v27 = vcombine.low %v3250_v17, %v3254_v18 }
 0x77e   :  { %6264 = vmatpush1.bf16.msra.mxu1 %v7331_v22  ;;  %v7398_v22 = vcombine.high %v3250_v17, %v3254_v18  ;;  %v3281_v18 = vld [vmem:[#allocation16 + $0x480] sm:$0xff] }
 0x77f   :  { %6428 = vmatpush1.bf16.msra.mxu0 %v7333_v23  ;;  %6265 = vmatprep.subr.bf16.mxu1 %v7340_v24  ;;  %v3257_v23 = vld [vmem:[#allocation16 + $0x3c0] sm:$0xff] }
 0x780   :  { %6429 = vmatprep.subr.bf16.mxu0 %v7342_v25  ;;  %v3261_v24 = vld [vmem:[#allocation16 + $0x3e0] sm:$0xff]  ;;  %v3258_v25 = vld [vmem:[#allocation16 + $0x3c8] sm:$0xff] }
 0x781   :  { %v7404_v28 = vcombine.high %v3257_v23, %v3261_v24  ;;  %v7403_v34 = vcombine.low %v3257_v23, %v3261_v24  ;;  %v7405_v35 = vcombine.low %v3258_v25, %v3262_v26  ;;  %v3286_v23 = vld [vmem:[#allocation16 + $0x4a8] sm:$0xff] }
 0x782   :  { %6266 = vmatpush1.bf16.msra.mxu1 %v7339_v29  ;;  %v7406_v29 = vcombine.high %v3258_v25, %v3262_v26 }
 0x783   :  { %6430 = vmatpush1.bf16.msra.mxu0 %v7341_v31  ;;  %6267 = vmatprep.subr.bf16.mxu1 %v7348_v32  ;;  %v9077_v31 = vld [vmem:[#allocation16 + $0x400] sm:$0xff] }
 0x784   :  { %6431 = vmatprep.subr.bf16.mxu0 %v7350_v2  ;;  %v9079_v32 = vld [vmem:[#allocation16 + $0x420] sm:$0xff]  ;;  %v9081_v2 = vld [vmem:[#allocation16 + $0x408] sm:$0xff] }
 0x785   :  { %v7412_v36 = vcombine.high %v9077_v31, %v9079_v32  ;;  %v7411_v15 = vcombine.low %v9077_v31, %v9079_v32  ;;  %v7413_v16 = vcombine.low %v9081_v2, %v9083_v33  ;;  %v3290_v31 = vld [vmem:[#allocation16 + $0x4c8] sm:$0xff] }
 0x786   :  { %6268 = vmatpush1.bf16.msra.mxu1 %v7347_v38  ;;  %v7414_v38 = vcombine.high %v9081_v2, %v9083_v33  ;;  %v3294_v32 = vld [vmem:[#allocation16 + $0x4e8] sm:$0xff] }
 0x787   :  { %6432 = vmatpush1.bf16.msra.mxu0 %v7349_v39  ;;  %6269 = vmatprep.subr.bf16.mxu1 %v7356_v40  ;;  %v9089_v39 = vld [vmem:[#allocation26] sm:$0xff] }
 0x788   :  { %6433 = vmatprep.subr.bf16.mxu0 %v7358_v41  ;;  %v1428_v40 = vrot.slane %v9089_v39, %v9025_v1  ;;  %v1432_v41 = vrot.slane %v9089_v39, %v9030_v3  ;;  %v1440_v42 = vrot.slane %v9089_v39, %v9033_v4 }
 0x78a   :  { %6270 = vmatpush1.bf16.msra.mxu1 %v7355_v44 }
 0x78b   :  { %6434 = vmatpush1.bf16.msra.mxu0 %v7357_v46  ;;  %6271 = vmatprep.subr.bf16.mxu1 %v7364_v47 }
 0x78c   :  { %6435 = vmatprep.subr.bf16.mxu0 %v7366_v48 }
 0x78e   :  { %6272 = vmatpush1.bf16.msra.mxu1 %v7363_v52 }
 0x78f   :  { %6436 = vmatpush1.bf16.msra.mxu0 %v7365_v53  ;;  %6273 = vmatprep.subr.bf16.mxu1 %v7372_v54 }
 0x790   :  { %6437 = vmatprep.subr.bf16.mxu0 %v7374_v55 }
 0x792   :  { %6274 = vmatpush1.bf16.msra.mxu1 %v7371_v60 }
 0x793   :  { %6438 = vmatpush1.bf16.msra.mxu0 %v7373_v61  ;;  %6275 = vmatprep.subr.bf16.mxu1 %v7380_v62 }
 0x794   :  { %6439 = vmatprep.subr.bf16.mxu0 %v7382_v6 }
 0x796   :  { %6276 = vmatpush1.bf16.msra.mxu1 %v7379_v11  ;;  %v3277_v11 = vld [vmem:[#allocation16 + $0x460] sm:$0xff] }
 0x797   :  { %6440 = vmatpush1.bf16.msra.mxu0 %v7381_v12  ;;  %6277 = vmatprep.subr.bf16.mxu1 %v7388_v14  ;;  %v3274_v12 = vld [vmem:[#allocation16 + $0x448] sm:$0xff]  ;;  %v7419_v25 = vcombine.low %v3273_v10, %v3277_v11 }
 0x798   :  { %6441 = vmatprep.subr.bf16.mxu0 %v7390_v0  ;;  %v3278_v14 = vld [vmem:[#allocation16 + $0x468] sm:$0xff] }
 0x799   :  { %v7421_v26 = vcombine.low %v3274_v12, %v3278_v14 }
 0x79a   :  { %6278 = vmatpush1.bf16.msra.mxu1 %v7387_v19  ;;  %v7420_v19 = vcombine.high %v3273_v10, %v3277_v11 }
 0x79b   :  { %6442 = vmatpush1.bf16.msra.mxu0 %v7389_v20  ;;  %6279 = vmatprep.subr.bf16.mxu1 %v7396_v21  ;;  %v7422_v20 = vcombine.high %v3274_v12, %v3278_v14  ;;  %v3285_v21 = vld [vmem:[#allocation16 + $0x4a0] sm:$0xff] }
 0x79c   :  { %6443 = vmatprep.subr.bf16.mxu0 %v7398_v22  ;;  %v3282_v22 = vld [vmem:[#allocation16 + $0x488] sm:$0xff]  ;;  %v7427_v2 = vcombine.low %v3281_v18, %v3285_v21 }
 0x79d   :  { %v7429_v33 = vcombine.low %v3282_v22, %v3286_v23 }
 0x79e   :  { %6280 = vmatpush1.bf16.msra.mxu1 %v7395_v37  ;;  %v7428_v37 = vcombine.high %v3281_v18, %v3285_v21  ;;  %v3330_v18 = vld [vmem:[#allocation16 + $0x608] sm:$0xff] }
 0x79f   :  { %6444 = vmatpush1.bf16.msra.mxu0 %v7397_v27  ;;  %6281 = vmatprep.subr.bf16.mxu1 %v7404_v28  ;;  %v7430_v27 = vcombine.high %v3282_v22, %v3286_v23  ;;  %v3289_v28 = vld [vmem:[#allocation16 + $0x4c0] sm:$0xff] }
 0x7a0   :  { %6445 = vmatprep.subr.bf16.mxu0 %v7406_v29  ;;  %v3293_v29 = vld [vmem:[#allocation16 + $0x4e0] sm:$0xff] }
 0x7a2   :  { %6282 = vmatpush1.bf16.msra.mxu1 %v7403_v34  ;;  %v7436_v34 = vcombine.high %v3289_v28, %v3293_v29 }
 0x7a3   :  { %6446 = vmatpush1.bf16.msra.mxu0 %v7405_v35  ;;  %6292 = vmatprep.subr.bf16.mxu1 %v7412_v36  ;;  %v7438_v35 = vcombine.high %v3290_v31, %v3294_v32  ;;  %v3297_v36 = vld [vmem:[#allocation16 + $0x500] sm:$0xff] }
 0x7a4   :  { %6456 = vmatprep.subr.bf16.mxu0 %v7414_v38  ;;  %v3301_v38 = vld [vmem:[#allocation16 + $0x520] sm:$0xff] }
 0x7b8   :  { %v2820_v9 = vpop.f32.mrb[12].mxu1  ;;  %v9097_v43 = vpop.f32.mrb[16].mxu0 }
 0x7b9   :  { %v7940_v45 = vadd.f32 %v2820_v9, %v1428_v40  ;;  %v2822_v44 = vpop.f32.mrb[13].mxu1  ;;  %v2904_v46 = vpop.f32.mrb[17].mxu0  ;;  %v3298_v40 = vld [vmem:[#allocation16 + $0x508] sm:$0xff]  ;;  %v7437_v9 = vcombine.low %v3290_v31, %v3294_v32 }
 0x7ba   :  { %v7941_v47 = vadd.f32 %v2822_v44, %v1432_v41  ;;  %v7943_v48 = vadd.f32 %v2904_v46, %v1440_v42  ;;  %v2824_v49 = vpop.f32.mrb[14].mxu1  ;;  %v2906_v50 = vpop.f32.mrb[18].mxu0  ;;  %v3302_v41 = vld [vmem:[#allocation16 + $0x528] sm:$0xff]  ;;  %v7435_v42 = vcombine.low %v3289_v28, %v3293_v29  ;;  %v3305_v46 = vld [vmem:[#allocation16 + $0x540] sm:$0xff] }
 0x7bb   :  { %v7275_v5 = vmul.f32 -1.442695, %v7940_v45  ;;  %v2825_v51 = vpop.f32.mrb[15].mxu1  ;;  %v2907_v52 = vpop.f32.mrb[19].mxu0  ;;  %v7446_v44 = vcombine.high %v3298_v40, %v3302_v41  ;;  %v3310_v49 = vld [vmem:[#allocation16 + $0x568] sm:$0xff]  ;;  %v7443_v50 = vcombine.low %v3297_v36, %v3301_v38 }
 0x7bc   :  { %v7276_v53 = vmul.f32 -1.442695, %v7941_v47  ;;  %v7278_v54 = vmul.f32 -1.442695, %v7943_v48 }
 0x7bd   :  { %8151 = vpow2.f32 %v7275_v5  ;;  %v7445_v5 = vcombine.low %v3298_v40, %v3302_v41 }
 0x7be   :  { %8153 = vpow2.f32 %v7276_v53  ;;  %v3313_v53 = vld [vmem:[#allocation16 + $0x580] sm:$0xff] }
 0x7bf   :  { %8155 = vpow2.f32 %v7278_v54  ;;  %v3317_v54 = vld [vmem:[#allocation16 + $0x5a0] sm:$0xff] }
 0x7c7   :  { %v8152_v55 = vpop.eup %8151 }
 0x7c8   :  { %v3097_v56 = vadd.f32 1.0, %v8152_v55  ;;  %v8154_v57 = vpop.eup %8153  ;;  %v3314_v55 = vld [vmem:[#allocation16 + $0x588] sm:$0xff] }
 0x7c9   :  { %v8156_v58 = vpop.eup %8155  ;;  %v3098_v59 = vadd.f32 1.0, %v8154_v57  ;;  %v1436_v57 = vrot.slane %v9089_v39, %v9056_v13 }
 0x7ca   :  { %8157 = vrcp.f32 %v3097_v56  ;;  %v3100_v60 = vadd.f32 1.0, %v8156_v58  ;;  %v3318_v56 = vld [vmem:[#allocation16 + $0x5a8] sm:$0xff] }
 0x7cb   :  { %8159 = vrcp.f32 %v3098_v59  ;;  %v9118_v10 = vadd.f32 %v9097_v43, %v1436_v57  ;;  %v7461_v11 = vcombine.low %v3314_v55, %v3318_v56 }
 0x7cc   :  { %8161 = vrcp.f32 %v3100_v60  ;;  %v7460_v60 = vcombine.high %v3313_v53, %v3317_v54 }
 0x7d4   :  { %v8158_v61 = vpop.eup %8157 }
 0x7d5   :  { %v8160_v62 = vpop.eup %8159  ;;  %v3121_v6 = vmul.f32 %v8158_v61, %v7940_v45  ;;  %v7444_v45 = vcombine.high %v3297_v36, %v3301_v38  ;;  %v7462_v61 = vcombine.high %v3314_v55, %v3318_v56 }
 0x7d6   :  { %v8162_v7 = vpop.eup %8161  ;;  %v3122_v8 = vmul.f32 %v8160_v62, %v7941_v47  ;;  %v3309_v47 = vld [vmem:[#allocation16 + $0x560] sm:$0xff] }
 0x7d7   :  { %v3124_v30 = vmul.f32 %v8162_v7, %v7943_v48  ;;  %v9105_v17 = vpack.c.bf16 %v3121_v6, %v3121_v6  ;;  %v3306_v48 = vld [vmem:[#allocation16 + $0x548] sm:$0xff]  ;;  %v7452_v51 = vcombine.high %v3305_v46, %v3309_v47  ;;  %v7451_v58 = vcombine.low %v3305_v46, %v3309_v47  ;;  %v3321_v62 = vld [vmem:[#allocation16 + $0x5c0] sm:$0xff] }
 0x7d8   :  { %v9099_v0 = vpack.c.bf16 %v3122_v8, %v3122_v8  ;;  %v7454_v52 = vcombine.high %v3306_v48, %v3310_v49  ;;  %v7453_v59 = vcombine.low %v3306_v48, %v3310_v49  ;;  %v3325_v6 = vld [vmem:[#allocation16 + $0x5e0] sm:$0xff]  ;;  %v3322_v7 = vld [vmem:[#allocation16 + $0x5c8] sm:$0xff] }
 0x7d9   :  { %v9109_v24 = vpack.c.bf16 %v3124_v30, %v3124_v30  ;;  %v3326_v8 = vld [vmem:[#allocation16 + $0x5e8] sm:$0xff]  ;;  %v7459_v30 = vcombine.low %v3313_v53, %v3317_v54  ;;  %v7468_v12 = vcombine.high %v3321_v62, %v3325_v6  ;;  %v7467_v21 = vcombine.low %v3321_v62, %v3325_v6 }
 0x7da   :  { %6283 = vmatprep.mubr.bf16.mxu1 %v9099_v0  ;;  %6447 = vmatprep.mubr.bf16.mxu0 %v9099_v0  ;;  %v7470_v14 = vcombine.high %v3322_v7, %v3326_v8  ;;  %v7469_v22 = vcombine.low %v3322_v7, %v3326_v8  ;;  %v3366_v53 = vld [vmem:[#allocation16 + $0x728] sm:$0xff] }
 0x7db   :  { %6284 = vmatmul.mubr.bf16.vlgmr.msra.gmra.mrb[20].mxu1 %v9105_v17  ;;  %6448 = vmatmul.mubr.bf16.vlgmr.msra.gmra.mrb[24].mxu0 %v9105_v17  ;;  %v3374_v62 = vld [vmem:[#allocation16 + $0x768] sm:$0xff] }
 0x7dc   :  { %6293 = vmatpush1.bf16.msra.mxu1 %v7411_v15  ;;  %6457 = vmatpush1.bf16.msra.mxu0 %v7413_v16  ;;  %v3329_v15 = vld [vmem:[#allocation16 + $0x600] sm:$0xff] }
 0x7dd   :  { %6324 = vmatprep.mubr.bf16.mxu1 %v9109_v24  ;;  %6488 = vmatprep.mubr.bf16.mxu0 %v9109_v24  ;;  %v3333_v16 = vld [vmem:[#allocation16 + $0x620] sm:$0xff] }
 0x7de   :  { %6294 = vmatprep.subr.bf16.mxu1 %v7420_v19  ;;  %6458 = vmatprep.subr.bf16.mxu0 %v7422_v20  ;;  %v3334_v19 = vld [vmem:[#allocation16 + $0x628] sm:$0xff]  ;;  %v7277_v20 = vmul.f32 -1.442695, %v9118_v10  ;;  %v7476_v43 = vcombine.high %v3329_v15, %v3333_v16  ;;  %v7475_v28 = vcombine.low %v3329_v15, %v3333_v16 }
 0x7df   :  { %v7478_v23 = vcombine.high %v3330_v18, %v3334_v19  ;;  %v7477_v29 = vcombine.low %v3330_v18, %v3334_v19  ;;  %v3382_v15 = vld [vmem:[#allocation16 + $0x7a8] sm:$0xff] }
 0x7e0   :  { %6295 = vmatpush1.bf16.msra.mxu1 %v7419_v25  ;;  %6459 = vmatpush1.bf16.msra.mxu0 %v7421_v26  ;;  %v3337_v25 = vld [vmem:[#allocation16 + $0x640] sm:$0xff]  ;;  %8163 = vpow2.f32 %v7277_v20 }
 0x7e1   :  { %6296 = vmatprep.subr.bf16.mxu1 %v7428_v37  ;;  %6460 = vmatprep.subr.bf16.mxu0 %v7430_v27  ;;  %v3341_v26 = vld [vmem:[#allocation16 + $0x660] sm:$0xff]  ;;  %v3338_v37 = vld [vmem:[#allocation16 + $0x648] sm:$0xff] }
 0x7e2   :  { %v3342_v27 = vld [vmem:[#allocation16 + $0x668] sm:$0xff]  ;;  %v7484_v31 = vcombine.high %v3337_v25, %v3341_v26  ;;  %v7483_v36 = vcombine.low %v3337_v25, %v3341_v26 }
 0x7e3   :  { %v7486_v32 = vcombine.high %v3338_v37, %v3342_v27  ;;  %v7485_v38 = vcombine.low %v3338_v37, %v3342_v27 }
 0x7e4   :  { %6297 = vmatpush1.bf16.msra.mxu1 %v7427_v2  ;;  %6461 = vmatpush1.bf16.msra.mxu0 %v7429_v33  ;;  %v3345_v2 = vld [vmem:[#allocation16 + $0x680] sm:$0xff] }
 0x7e5   :  { %6298 = vmatprep.subr.bf16.mxu1 %v7436_v34  ;;  %6462 = vmatprep.subr.bf16.mxu0 %v7438_v35  ;;  %v3349_v33 = vld [vmem:[#allocation16 + $0x6a0] sm:$0xff]  ;;  %v3346_v34 = vld [vmem:[#allocation16 + $0x688] sm:$0xff] }
 0x7e6   :  { %v3350_v35 = vld [vmem:[#allocation16 + $0x6a8] sm:$0xff]  ;;  %v7492_v40 = vcombine.high %v3345_v2, %v3349_v33  ;;  %v7491_v46 = vcombine.low %v3345_v2, %v3349_v33 }
 0x7e7   :  { %v7494_v41 = vcombine.high %v3346_v34, %v3350_v35  ;;  %v7493_v47 = vcombine.low %v3346_v34, %v3350_v35  ;;  %v3398_v2 = vld [vmem:[#allocation16 + $0x828] sm:$0xff] }
 0x7e8   :  { %6299 = vmatpush1.bf16.msra.mxu1 %v7435_v42  ;;  %6463 = vmatpush1.bf16.msra.mxu0 %v7437_v9  ;;  %v3353_v42 = vld [vmem:[#allocation16 + $0x6c0] sm:$0xff] }
 0x7e9   :  { %6300 = vmatprep.subr.bf16.mxu1 %v7444_v45  ;;  %6464 = vmatprep.subr.bf16.mxu0 %v7446_v44  ;;  %v3357_v9 = vld [vmem:[#allocation16 + $0x6e0] sm:$0xff]  ;;  %v3354_v45 = vld [vmem:[#allocation16 + $0x6c8] sm:$0xff] }
 0x7ea   :  { %v3358_v44 = vld [vmem:[#allocation16 + $0x6e8] sm:$0xff]  ;;  %v8164_v48 = vpop.eup %8163  ;;  %v7500_v49 = vcombine.high %v3353_v42, %v3357_v9  ;;  %v7499_v55 = vcombine.low %v3353_v42, %v3357_v9 }
 0x7eb   :  { %v3099_v54 = vadd.f32 1.0, %v8164_v48  ;;  %v7501_v56 = vcombine.low %v3354_v45, %v3358_v44  ;;  %v3402_v42 = vld [vmem:[#allocation16 + $0x848] sm:$0xff] }
 0x7ec   :  { %6301 = vmatpush1.bf16.msra.mxu1 %v7443_v50  ;;  %6465 = vmatpush1.bf16.msra.mxu0 %v7445_v5  ;;  %v7502_v50 = vcombine.high %v3354_v45, %v3358_v44  ;;  %v3361_v5 = vld [vmem:[#allocation16 + $0x700] sm:$0xff]  ;;  %v3406_v9 = vld [vmem:[#allocation16 + $0x868] sm:$0xff] }
 0x7ed   :  { %6302 = vmatprep.subr.bf16.mxu1 %v7452_v51  ;;  %6466 = vmatprep.subr.bf16.mxu0 %v7454_v52  ;;  %v3365_v51 = vld [vmem:[#allocation16 + $0x720] sm:$0xff]  ;;  %v3362_v52 = vld [vmem:[#allocation16 + $0x708] sm:$0xff]  ;;  %8165 = vrcp.f32 %v3099_v54  ;;  %v7550_v48 = vcombine.high %v3402_v42, %v3406_v9 }
 0x7ee   :  { %v7508_v57 = vcombine.high %v3361_v5, %v3365_v51  ;;  %v7507_v6 = vcombine.low %v3361_v5, %v3365_v51  ;;  %v7509_v7 = vcombine.low %v3362_v52, %v3366_v53  ;;  %v3414_v5 = vld [vmem:[#allocation16 + $0x8a8] sm:$0xff] }
 0x7f0   :  { %6303 = vmatpush1.bf16.msra.mxu1 %v7451_v58  ;;  %6467 = vmatpush1.bf16.msra.mxu0 %v7453_v59  ;;  %v7510_v58 = vcombine.high %v3362_v52, %v3366_v53  ;;  %v3369_v59 = vld [vmem:[#allocation16 + $0x740] sm:$0xff]  ;;  %v7549_v52 = vcombine.low %v3402_v42, %v3406_v9  ;;  %v1447_v9 = vsub.s32 5, %v9022_v63 }
 0x7f1   :  { %6304 = vmatprep.subr.bf16.mxu1 %v7460_v60  ;;  %6468 = vmatprep.subr.bf16.mxu0 %v7462_v61  ;;  %v3373_v60 = vld [vmem:[#allocation16 + $0x760] sm:$0xff]  ;;  %v3370_v61 = vld [vmem:[#allocation16 + $0x748] sm:$0xff] }
 0x7f2   :  { %v7516_v8 = vcombine.high %v3369_v59, %v3373_v60  ;;  %v7515_v16 = vcombine.low %v3369_v59, %v3373_v60  ;;  %v7517_v18 = vcombine.low %v3370_v61, %v3374_v62 }
 0x7f4   :  { %6305 = vmatpush1.bf16.msra.mxu1 %v7459_v30  ;;  %6469 = vmatpush1.bf16.msra.mxu0 %v7461_v11  ;;  %v7518_v30 = vcombine.high %v3370_v61, %v3374_v62  ;;  %v3377_v11 = vld [vmem:[#allocation16 + $0x780] sm:$0xff] }
 0x7f5   :  { %6306 = vmatprep.subr.bf16.mxu1 %v7468_v12  ;;  %6470 = vmatprep.subr.bf16.mxu0 %v7470_v14  ;;  %v3381_v12 = vld [vmem:[#allocation16 + $0x7a0] sm:$0xff]  ;;  %v3378_v14 = vld [vmem:[#allocation16 + $0x788] sm:$0xff] }
 0x7f6   :  { %v7524_v19 = vcombine.high %v3377_v11, %v3381_v12  ;;  %v7526_v20 = vcombine.high %v3378_v14, %v3382_v15  ;;  %v7523_v25 = vcombine.low %v3377_v11, %v3381_v12  ;;  %v7525_v26 = vcombine.low %v3378_v14, %v3382_v15 }
 0x7f8   :  { %6307 = vmatpush1.bf16.msra.mxu1 %v7467_v21  ;;  %6471 = vmatpush1.bf16.msra.mxu0 %v7469_v22  ;;  %v3385_v21 = vld [vmem:[#allocation16 + $0x7c0] sm:$0xff] }
 0x7f9   :  { %6308 = vmatprep.subr.bf16.mxu1 %v7476_v43  ;;  %6472 = vmatprep.subr.bf16.mxu0 %v7478_v23  ;;  %v3389_v22 = vld [vmem:[#allocation16 + $0x7e0] sm:$0xff]  ;;  %v3386_v43 = vld [vmem:[#allocation16 + $0x7c8] sm:$0xff] }
 0x7fa   :  { %v3390_v23 = vld [vmem:[#allocation16 + $0x7e8] sm:$0xff]  ;;  %v7532_v37 = vcombine.high %v3385_v21, %v3389_v22  ;;  %v7531_v33 = vcombine.low %v3385_v21, %v3389_v22 }
 0x7fb   :  { %v7534_v27 = vcombine.high %v3386_v43, %v3390_v23  ;;  %v7533_v34 = vcombine.low %v3386_v43, %v3390_v23 }
 0x7fc   :  { %6309 = vmatpush1.bf16.msra.mxu1 %v7475_v28  ;;  %6473 = vmatpush1.bf16.msra.mxu0 %v7477_v29  ;;  %v3393_v28 = vld [vmem:[#allocation16 + $0x800] sm:$0xff]  ;;  %v8166_v29 = vpop.eup %8165 }
 0x7fd   :  { %6310 = vmatprep.subr.bf16.mxu1 %v7484_v31  ;;  %6474 = vmatprep.subr.bf16.mxu0 %v7486_v32  ;;  %v3397_v31 = vld [vmem:[#allocation16 + $0x820] sm:$0xff]  ;;  %v3394_v32 = vld [vmem:[#allocation16 + $0x808] sm:$0xff]  ;;  %v3123_v35 = vmul.f32 %v8166_v29, %v9118_v10 }
 0x7fe   :  { %v7539_v45 = vcombine.low %v3393_v28, %v3397_v31  ;;  %v7541_v44 = vcombine.low %v3394_v32, %v3398_v2  ;;  %v3413_v10 = vld [vmem:[#allocation16 + $0x8a0] sm:$0xff] }
 0x800   :  { %6311 = vmatpush1.bf16.msra.mxu1 %v7483_v36  ;;  %6475 = vmatpush1.bf16.msra.mxu0 %v7485_v38  ;;  %v7540_v36 = vcombine.high %v3393_v28, %v3397_v31  ;;  %v7542_v38 = vcombine.high %v3394_v32, %v3398_v2  ;;  %v3449_v2 = vld [vmem:[#allocation16 + $0x9c0] sm:$0xff] }
 0x801   :  { %6312 = vmatprep.subr.bf16.mxu1 %v7492_v40  ;;  %6476 = vmatprep.subr.bf16.mxu0 %v7494_v41  ;;  %v3401_v40 = vld [vmem:[#allocation16 + $0x840] sm:$0xff] }
 0x802   :  { %v3405_v41 = vld [vmem:[#allocation16 + $0x860] sm:$0xff] }
 0x803   :  { %v7547_v51 = vcombine.low %v3401_v40, %v3405_v41 }
 0x804   :  { %6313 = vmatpush1.bf16.msra.mxu1 %v7491_v46  ;;  %6477 = vmatpush1.bf16.msra.mxu0 %v7493_v47  ;;  %v9122_v46 = vpack.c.bf16 %v3123_v35, %v3123_v35  ;;  %v7548_v47 = vcombine.high %v3401_v40, %v3405_v41  ;;  %v3454_v35 = vld [vmem:[#allocation16 + $0x9e8] sm:$0xff]  ;;  %v1443_v40 = vsub.s32 4, %v9022_v63 }
 0x805   :  { %6314 = vmatprep.subr.bf16.mxu1 %v7500_v49  ;;  %6478 = vmatprep.subr.bf16.mxu0 %v7502_v50  ;;  %v3409_v49 = vld [vmem:[#allocation16 + $0x880] sm:$0xff]  ;;  %v3410_v50 = vld [vmem:[#allocation16 + $0x888] sm:$0xff] }
 0x806   :  { %v7556_v53 = vcombine.high %v3409_v49, %v3413_v10  ;;  %v7558_v54 = vcombine.high %v3410_v50, %v3414_v5  ;;  %v7555_v59 = vcombine.low %v3409_v49, %v3413_v10  ;;  %v7557_v60 = vcombine.low %v3410_v50, %v3414_v5  ;;  %v3462_v49 = vld [vmem:[#allocation16 + $0xa28] sm:$0xff] }
 0x807   :  { %v1444_v5 = vrot.slane %v9089_v39, %v1443_v40 }
 0x808   :  { %6315 = vmatpush1.bf16.msra.mxu1 %v7499_v55  ;;  %6479 = vmatpush1.bf16.msra.mxu0 %v7501_v56  ;;  %v3417_v55 = vld [vmem:[#allocation16 + $0x8c0] sm:$0xff] }
 0x809   :  { %6316 = vmatprep.subr.bf16.mxu1 %v7508_v57  ;;  %6480 = vmatprep.subr.bf16.mxu0 %v7510_v58  ;;  %v3421_v56 = vld [vmem:[#allocation16 + $0x8e0] sm:$0xff]  ;;  %v3418_v57 = vld [vmem:[#allocation16 + $0x8c8] sm:$0xff] }
 0x80a   :  { %v3422_v58 = vld [vmem:[#allocation16 + $0x8e8] sm:$0xff]  ;;  %v7564_v61 = vcombine.high %v3417_v55, %v3421_v56  ;;  %v7563_v11 = vcombine.low %v3417_v55, %v3421_v56  ;;  %v3469_v56 = vld [vmem:[#allocation16 + $0xa60] sm:$0xff] }
 0x80b   :  { %v7566_v62 = vcombine.high %v3418_v57, %v3422_v58  ;;  %v7565_v12 = vcombine.low %v3418_v57, %v3422_v58  ;;  %v3466_v57 = vld [vmem:[#allocation16 + $0xa48] sm:$0xff] }
 0x80c   :  { %6317 = vmatpush1.bf16.msra.mxu1 %v7507_v6  ;;  %6481 = vmatpush1.bf16.msra.mxu0 %v7509_v7  ;;  %v3425_v6 = vld [vmem:[#allocation16 + $0x900] sm:$0xff]  ;;  %v3470_v58 = vld [vmem:[#allocation16 + $0xa68] sm:$0xff] }
 0x80d   :  { %6318 = vmatprep.subr.bf16.mxu1 %v7516_v8  ;;  %6482 = vmatprep.subr.bf16.mxu0 %v7518_v30  ;;  %v3429_v7 = vld [vmem:[#allocation16 + $0x920] sm:$0xff]  ;;  %v3426_v8 = vld [vmem:[#allocation16 + $0x908] sm:$0xff] }
 0x80e   :  { %v3430_v30 = vld [vmem:[#allocation16 + $0x928] sm:$0xff]  ;;  %v7572_v14 = vcombine.high %v3425_v6, %v3429_v7  ;;  %v7571_v21 = vcombine.low %v3425_v6, %v3429_v7 }
 0x80f   :  { %v7574_v15 = vcombine.high %v3426_v8, %v3430_v30  ;;  %v7573_v22 = vcombine.low %v3426_v8, %v3430_v30 }
 0x810   :  { %6319 = vmatpush1.bf16.msra.mxu1 %v7515_v16  ;;  %6483 = vmatpush1.bf16.msra.mxu0 %v7517_v18  ;;  %v3433_v16 = vld [vmem:[#allocation16 + $0x940] sm:$0xff] }
 0x811   :  { %6320 = vmatprep.subr.bf16.mxu1 %v7524_v19  ;;  %6484 = vmatprep.subr.bf16.mxu0 %v7526_v20  ;;  %v3437_v18 = vld [vmem:[#allocation16 + $0x960] sm:$0xff]  ;;  %v3434_v19 = vld [vmem:[#allocation16 + $0x948] sm:$0xff] }
 0x812   :  { %v3438_v20 = vld [vmem:[#allocation16 + $0x968] sm:$0xff]  ;;  %v7580_v43 = vcombine.high %v3433_v16, %v3437_v18  ;;  %v7579_v28 = vcombine.low %v3433_v16, %v3437_v18 }
 0x813   :  { %v7582_v23 = vcombine.high %v3434_v19, %v3438_v20  ;;  %v7581_v29 = vcombine.low %v3434_v19, %v3438_v20 }
 0x814   :  { %6321 = vmatpush1.bf16.msra.mxu1 %v7523_v25  ;;  %6485 = vmatpush1.bf16.msra.mxu0 %v7525_v26  ;;  %v3441_v25 = vld [vmem:[#allocation16 + $0x980] sm:$0xff] }
 0x815   :  { %6322 = vmatprep.subr.bf16.mxu1 %v7532_v37  ;;  %6486 = vmatprep.subr.bf16.mxu0 %v7534_v27  ;;  %v3445_v26 = vld [vmem:[#allocation16 + $0x9a0] sm:$0xff]  ;;  %v3442_v37 = vld [vmem:[#allocation16 + $0x988] sm:$0xff] }
 0x816   :  { %v3446_v27 = vld [vmem:[#allocation16 + $0x9a8] sm:$0xff]  ;;  %v7588_v31 = vcombine.high %v3441_v25, %v3445_v26 }
 0x817   :  { %v7590_v32 = vcombine.high %v3442_v37, %v3446_v27 }
 0x818   :  { %6323 = vmatpush1.bf16.msra.mxu1 %v7531_v33  ;;  %6487 = vmatpush1.bf16.msra.mxu0 %v7533_v34  ;;  %v3453_v33 = vld [vmem:[#allocation16 + $0x9e0] sm:$0xff]  ;;  %v3450_v34 = vld [vmem:[#allocation16 + $0x9c8] sm:$0xff] }
 0x819   :  { %6333 = vmatprep.subr.bf16.mxu1 %v7540_v36  ;;  %6497 = vmatprep.subr.bf16.mxu0 %v7542_v38  ;;  %v7587_v36 = vcombine.low %v3441_v25, %v3445_v26  ;;  %v7589_v38 = vcombine.low %v3442_v37, %v3446_v27  ;;  %v7596_v41 = vcombine.high %v3449_v2, %v3453_v33 }
 0x81a   :  { %v7598_v42 = vcombine.high %v3450_v34, %v3454_v35  ;;  %v7595_v10 = vcombine.low %v3449_v2, %v3453_v33  ;;  %v7597_v50 = vcombine.low %v3450_v34, %v3454_v35  ;;  %v7613_v37 = vcombine.low %v3466_v57, %v3470_v58  ;;  %v3486_v2 = vld [vmem:[#allocation16 + $0xae8] sm:$0xff] }
 0x81b   :  { %6325 = vmatmul.mubr.bf16.vlgmr.msra.gmra.mrb[20].mxu1 %v9122_v46  ;;  %6489 = vmatmul.mubr.bf16.vlgmr.msra.gmra.mrb[24].mxu0 %v9122_v46 }
 0x81c   :  { %6334 = vmatpush1.bf16.msra.mxu1 %v7539_v45  ;;  %6498 = vmatpush1.bf16.msra.mxu0 %v7541_v44  ;;  %v3457_v45 = vld [vmem:[#allocation16 + $0xa00] sm:$0xff]  ;;  %v1455_v44 = vsub.s32 7, %v9022_v63 }
 0x81d   :  { %6335 = vmatprep.subr.bf16.mxu1 %v7548_v47  ;;  %6499 = vmatprep.subr.bf16.mxu0 %v7550_v48  ;;  %v3461_v47 = vld [vmem:[#allocation16 + $0xa20] sm:$0xff]  ;;  %v3458_v48 = vld [vmem:[#allocation16 + $0xa08] sm:$0xff] }
 0x81e   :  { %v1456_v55 = vrot.slane %v9089_v39, %v1455_v44  ;;  %v7603_v6 = vcombine.low %v3457_v45, %v3461_v47  ;;  %v7605_v7 = vcombine.low %v3458_v48, %v3462_v49 }
 0x820   :  { %6336 = vmatpush1.bf16.msra.mxu1 %v7547_v51  ;;  %6500 = vmatpush1.bf16.msra.mxu0 %v7549_v52  ;;  %v1448_v51 = vrot.slane %v9089_v39, %v1447_v9  ;;  %v7604_v52 = vcombine.high %v3457_v45, %v3461_v47  ;;  %v3494_v45 = vld [vmem:[#allocation16 + $0xb28] sm:$0xff] }
 0x821   :  { %6337 = vmatprep.subr.bf16.mxu1 %v7556_v53  ;;  %6501 = vmatprep.subr.bf16.mxu0 %v7558_v54  ;;  %v7606_v53 = vcombine.high %v3458_v48, %v3462_v49  ;;  %v3465_v54 = vld [vmem:[#allocation16 + $0xa40] sm:$0xff] }
 0x822   :  { %v7612_v39 = vcombine.high %v3465_v54, %v3469_v56  ;;  %v7611_v26 = vcombine.low %v3465_v54, %v3469_v56 }
 0x824   :  { %6338 = vmatpush1.bf16.msra.mxu1 %v7555_v59  ;;  %6502 = vmatpush1.bf16.msra.mxu0 %v7557_v60 }
 0x825   :  { %6339 = vmatprep.subr.bf16.mxu1 %v7564_v61  ;;  %6503 = vmatprep.subr.bf16.mxu0 %v7566_v62 }
 0x828   :  { %6340 = vmatpush1.bf16.msra.mxu1 %v7563_v11  ;;  %6504 = vmatpush1.bf16.msra.mxu0 %v7565_v12  ;;  %v7614_v12 = vcombine.high %v3466_v57, %v3470_v58 }
 0x829   :  { %6341 = vmatprep.subr.bf16.mxu1 %v7572_v14  ;;  %6505 = vmatprep.subr.bf16.mxu0 %v7574_v15  ;;  %v3473_v14 = vld [vmem:[#allocation16 + $0xa80] sm:$0xff] }
 0x82a   :  { %v3477_v15 = vld [vmem:[#allocation16 + $0xaa0] sm:$0xff] }
 0x82b   :  { %v7620_v27 = vcombine.high %v3473_v14, %v3477_v15  ;;  %v7619_v33 = vcombine.low %v3473_v14, %v3477_v15 }
 0x82c   :  { %6342 = vmatpush1.bf16.msra.mxu1 %v7571_v21  ;;  %6506 = vmatpush1.bf16.msra.mxu0 %v7573_v22  ;;  %v3474_v21 = vld [vmem:[#allocation16 + $0xa88] sm:$0xff] }
 0x82d   :  { %6343 = vmatprep.subr.bf16.mxu1 %v7580_v43  ;;  %6507 = vmatprep.subr.bf16.mxu0 %v7582_v23  ;;  %v3478_v22 = vld [vmem:[#allocation16 + $0xaa8] sm:$0xff] }
 0x82e   :  { %v7621_v34 = vcombine.low %v3474_v21, %v3478_v22 }
 0x830   :  { %6344 = vmatpush1.bf16.msra.mxu1 %v7579_v28  ;;  %6508 = vmatpush1.bf16.msra.mxu0 %v7581_v29  ;;  %v7622_v28 = vcombine.high %v3474_v21, %v3478_v22  ;;  %v3481_v29 = vld [vmem:[#allocation16 + $0xac0] sm:$0xff]  ;;  %v3514_v22 = vld [vmem:[#allocation16 + $0xbc8] sm:$0xff] }
 0x831   :  { %6345 = vmatprep.subr.bf16.mxu1 %v7588_v31  ;;  %6509 = vmatprep.subr.bf16.mxu0 %v7590_v32  ;;  %v3485_v31 = vld [vmem:[#allocation16 + $0xae0] sm:$0xff]  ;;  %v3482_v32 = vld [vmem:[#allocation16 + $0xac8] sm:$0xff] }
 0x832   :  { %v7628_v35 = vcombine.high %v3481_v29, %v3485_v31  ;;  %v7627_v47 = vcombine.low %v3481_v29, %v3485_v31  ;;  %v7629_v48 = vcombine.low %v3482_v32, %v3486_v2  ;;  %v3517_v21 = vld [vmem:[#allocation16 + $0xbe0] sm:$0xff]  ;;  %v3522_v29 = vld [vmem:[#allocation16 + $0xc08] sm:$0xff] }
 0x833   :  { %v3526_v31 = vld [vmem:[#allocation16 + $0xc28] sm:$0xff] }
 0x834   :  { %6346 = vmatpush1.bf16.msra.mxu1 %v7587_v36  ;;  %6510 = vmatpush1.bf16.msra.mxu0 %v7589_v38  ;;  %v7630_v36 = vcombine.high %v3482_v32, %v3486_v2  ;;  %v3489_v38 = vld [vmem:[#allocation16 + $0xb00] sm:$0xff] }
 0x835   :  { %6347 = vmatprep.subr.bf16.mxu1 %v7596_v41  ;;  %6511 = vmatprep.subr.bf16.mxu0 %v7598_v42  ;;  %v3493_v41 = vld [vmem:[#allocation16 + $0xb20] sm:$0xff]  ;;  %v3490_v42 = vld [vmem:[#allocation16 + $0xb08] sm:$0xff] }
 0x836   :  { %v7636_v49 = vcombine.high %v3489_v38, %v3493_v41  ;;  %v7635_v56 = vcombine.low %v3489_v38, %v3493_v41  ;;  %v7637_v57 = vcombine.low %v3490_v42, %v3494_v45  ;;  %v7670_v38 = vcombine.high %v3522_v29, %v3526_v31 }
 0x838   :  { %v2984_v59 = vpop.f32.mrb[16].mxu1  ;;  %6348 = vmatpush1.bf16.msra.mxu1 %v7595_v10  ;;  %6512 = vmatpush1.bf16.msra.mxu0 %v7597_v50  ;;  %v7638_v10 = vcombine.high %v3490_v42, %v3494_v45  ;;  %v3497_v50 = vld [vmem:[#allocation16 + $0xb40] sm:$0xff] }
 0x839   :  { %v9138_v60 = vadd.f32 %v2984_v59, %v1444_v5  ;;  %v9140_v61 = vpop.f32.mrb[20].mxu0  ;;  %v2986_v62 = vpop.f32.mrb[17].mxu1  ;;  %6349 = vmatprep.subr.bf16.mxu1 %v7604_v52  ;;  %6513 = vmatprep.subr.bf16.mxu0 %v7606_v53  ;;  %v3498_v52 = vld [vmem:[#allocation16 + $0xb48] sm:$0xff]  ;;  %v3529_v45 = vld [vmem:[#allocation16 + $0xc40] sm:$0xff] }
 0x83a   :  { %v9142_v8 = vadd.f32 %v2986_v62, %v1448_v51  ;;  %v3068_v30 = vpop.f32.mrb[21].mxu0  ;;  %v2988_v11 = vpop.f32.mrb[18].mxu1  ;;  %v3501_v51 = vld [vmem:[#allocation16 + $0xb60] sm:$0xff]  ;;  %v3502_v53 = vld [vmem:[#allocation16 + $0xb68] sm:$0xff] }
 0x83b   :  { %v7279_v16 = vmul.f32 -1.442695, %v9138_v60  ;;  %v9145_v18 = vadd.f32 %v3068_v30, %v1456_v55  ;;  %v3070_v19 = vpop.f32.mrb[22].mxu0  ;;  %v2989_v20 = vpop.f32.mrb[19].mxu1  ;;  %v7644_v62 = vcombine.high %v3497_v50, %v3501_v51  ;;  %v3509_v11 = vld [vmem:[#allocation16 + $0xba0] sm:$0xff]  ;;  %v7643_v14 = vcombine.low %v3497_v50, %v3501_v51 }
 0x83c   :  { %v7280_v43 = vmul.f32 -1.442695, %v9142_v8  ;;  %v3071_v23 = vpop.f32.mrb[23].mxu0  ;;  %6350 = vmatpush1.bf16.msra.mxu1 %v7603_v6  ;;  %6514 = vmatpush1.bf16.msra.mxu0 %v7605_v7  ;;  %v7646_v6 = vcombine.high %v3498_v52, %v3502_v53  ;;  %v3505_v7 = vld [vmem:[#allocation16 + $0xb80] sm:$0xff]  ;;  %v7645_v15 = vcombine.low %v3498_v52, %v3502_v53  ;;  %v7669_v51 = vcombine.low %v3522_v29, %v3526_v31 }
 0x83d   :  { %8167 = vpow2.f32 %v7279_v16  ;;  %v7282_v25 = vmul.f32 -1.442695, %v9145_v18  ;;  %6351 = vmatprep.subr.bf16.mxu1 %v7612_v39  ;;  %6515 = vmatprep.subr.bf16.mxu0 %v7614_v12  ;;  %v3506_v39 = vld [vmem:[#allocation16 + $0xb88] sm:$0xff]  ;;  %v7652_v16 = vcombine.high %v3505_v7, %v3509_v11  ;;  %v3513_v20 = vld [vmem:[#allocation16 + $0xbc0] sm:$0xff]  ;;  %v7651_v23 = vcombine.low %v3505_v7, %v3509_v11 }
 0x83e   :  { %8169 = vpow2.f32 %v7280_v43  ;;  %v3510_v12 = vld [vmem:[#allocation16 + $0xba8] sm:$0xff]  ;;  %v7659_v2 = vcombine.low %v3513_v20, %v3517_v21  ;;  %v3537_v52 = vld [vmem:[#allocation16 + $0xc80] sm:$0xff]  ;;  %v1451_v29 = vsub.s32 6, %v9022_v63 }
 0x83f   :  { %8171 = vpow2.f32 %v7282_v25  ;;  %v7654_v19 = vcombine.high %v3506_v39, %v3510_v12  ;;  %v3518_v43 = vld [vmem:[#allocation16 + $0xbe8] sm:$0xff]  ;;  %v7653_v25 = vcombine.low %v3506_v39, %v3510_v12  ;;  %v3541_v53 = vld [vmem:[#allocation16 + $0xca0] sm:$0xff] }
 0x840   :  { %6352 = vmatpush1.bf16.msra.mxu1 %v7611_v26  ;;  %6516 = vmatpush1.bf16.msra.mxu0 %v7613_v37  ;;  %v7660_v26 = vcombine.high %v3513_v20, %v3517_v21  ;;  %v7662_v37 = vcombine.high %v3514_v22, %v3518_v43  ;;  %v3549_v7 = vld [vmem:[#allocation16 + $0xce0] sm:$0xff]  ;;  %v3550_v11 = vld [vmem:[#allocation16 + $0xce8] sm:$0xff]  ;;  %v7683_v39 = vcombine.low %v3537_v52, %v3541_v53 }
 0x841   :  { %6353 = vmatprep.subr.bf16.mxu1 %v7620_v27  ;;  %6517 = vmatprep.subr.bf16.mxu0 %v7622_v28  ;;  %v3521_v27 = vld [vmem:[#allocation16 + $0xc00] sm:$0xff]  ;;  %v3554_v20 = vld [vmem:[#allocation16 + $0xd08] sm:$0xff] }
 0x842   :  { %v3525_v28 = vld [vmem:[#allocation16 + $0xc20] sm:$0xff]  ;;  %v3558_v21 = vld [vmem:[#allocation16 + $0xd28] sm:$0xff] }
 0x844   :  { %6354 = vmatpush1.bf16.msra.mxu1 %v7619_v33  ;;  %6518 = vmatpush1.bf16.msra.mxu0 %v7621_v34  ;;  %v7661_v33 = vcombine.low %v3514_v22, %v3518_v43 }
 0x845   :  { %6355 = vmatprep.subr.bf16.mxu1 %v7628_v35  ;;  %6519 = vmatprep.subr.bf16.mxu0 %v7630_v36  ;;  %v7668_v36 = vcombine.high %v3521_v27, %v3525_v28 }
 0x847   :  { %v8168_v5 = vpop.eup %8167 }
 0x848   :  { %v3101_v54 = vadd.f32 1.0, %v8168_v5  ;;  %v8170_v55 = vpop.eup %8169  ;;  %6356 = vmatpush1.bf16.msra.mxu1 %v7627_v47  ;;  %6520 = vmatpush1.bf16.msra.mxu0 %v7629_v48  ;;  %v3533_v48 = vld [vmem:[#allocation16 + $0xc60] sm:$0xff]  ;;  %v7667_v5 = vcombine.low %v3521_v27, %v3525_v28  ;;  %v3562_v27 = vld [vmem:[#allocation16 + $0xd48] sm:$0xff] }
 0x849   :  { %v8172_v58 = vpop.eup %8171  ;;  %v3102_v59 = vadd.f32 1.0, %v8170_v55  ;;  %6357 = vmatprep.subr.bf16.mxu1 %v7636_v49  ;;  %6521 = vmatprep.subr.bf16.mxu0 %v7638_v10  ;;  %v3530_v49 = vld [vmem:[#allocation16 + $0xc48] sm:$0xff] }
 0x84a   :  { %8173 = vrcp.f32 %v3101_v54  ;;  %v3104_v30 = vadd.f32 1.0, %v8172_v58  ;;  %v3534_v10 = vld [vmem:[#allocation16 + $0xc68] sm:$0xff] }
 0x84b   :  { %8175 = vrcp.f32 %v3102_v59  ;;  %v3538_v54 = vld [vmem:[#allocation16 + $0xc88] sm:$0xff]  ;;  %v7677_v58 = vcombine.low %v3530_v49, %v3534_v10  ;;  %v7684_v59 = vcombine.high %v3537_v52, %v3541_v53 }
 0x84c   :  { %8177 = vrcp.f32 %v3104_v30  ;;  %6358 = vmatpush1.bf16.msra.mxu1 %v7635_v56  ;;  %6522 = vmatpush1.bf16.msra.mxu0 %v7637_v57  ;;  %v3542_v55 = vld [vmem:[#allocation16 + $0xca8] sm:$0xff]  ;;  %v7675_v57 = vcombine.low %v3529_v45, %v3533_v48 }
 0x84d   :  { %6359 = vmatprep.subr.bf16.mxu1 %v7644_v62  ;;  %6523 = vmatprep.subr.bf16.mxu0 %v7646_v6  ;;  %v7686_v62 = vcombine.high %v3538_v54, %v3542_v55  ;;  %v3545_v6 = vld [vmem:[#allocation16 + $0xcc0] sm:$0xff]  ;;  %v3546_v30 = vld [vmem:[#allocation16 + $0xcc8] sm:$0xff]  ;;  %v7685_v12 = vcombine.low %v3538_v54, %v3542_v55 }
 0x84e   :  { %v7691_v22 = vcombine.low %v3545_v6, %v3549_v7  ;;  %v7693_v43 = vcombine.low %v3546_v30, %v3550_v11  ;;  %v3566_v28 = vld [vmem:[#allocation16 + $0xd68] sm:$0xff] }
 0x84f   :  { %v3582_v52 = vld [vmem:[#allocation16 + $0xde8] sm:$0xff] }
 0x850   :  { %6360 = vmatpush1.bf16.msra.mxu1 %v7643_v14  ;;  %6524 = vmatpush1.bf16.msra.mxu0 %v7645_v15  ;;  %v7692_v14 = vcombine.high %v3545_v6, %v3549_v7  ;;  %v7694_v15 = vcombine.high %v3546_v30, %v3550_v11 }
 0x851   :  { %6361 = vmatprep.subr.bf16.mxu1 %v7652_v16  ;;  %6525 = vmatprep.subr.bf16.mxu0 %v7654_v19  ;;  %v3553_v16 = vld [vmem:[#allocation16 + $0xd00] sm:$0xff] }
 0x852   :  { %v3557_v19 = vld [vmem:[#allocation16 + $0xd20] sm:$0xff] }
 0x853   :  { %v7699_v31 = vcombine.low %v3553_v16, %v3557_v19 }
 0x854   :  { %v8174_v32 = vpop.eup %8173  ;;  %6362 = vmatpush1.bf16.msra.mxu1 %v7651_v23  ;;  %6526 = vmatpush1.bf16.msra.mxu0 %v7653_v25  ;;  %v7700_v23 = vcombine.high %v3553_v16, %v3557_v19  ;;  %v7702_v25 = vcombine.high %v3554_v20, %v3558_v21 }
 0x855   :  { %v8176_v34 = vpop.eup %8175  ;;  %v3125_v35 = vmul.f32 %v8174_v32, %v9138_v60  ;;  %6363 = vmatprep.subr.bf16.mxu1 %v7660_v26  ;;  %6527 = vmatprep.subr.bf16.mxu0 %v7662_v37  ;;  %v3561_v26 = vld [vmem:[#allocation16 + $0xd40] sm:$0xff]  ;;  %v7701_v32 = vcombine.low %v3554_v20, %v3558_v21 }
 0x856   :  { %v8178_v41 = vpop.eup %8177  ;;  %v3126_v42 = vmul.f32 %v8176_v34, %v9142_v8  ;;  %v7676_v8 = vcombine.high %v3529_v45, %v3533_v48  ;;  %v3565_v37 = vld [vmem:[#allocation16 + $0xd60] sm:$0xff] }
 0x857   :  { %v3128_v47 = vmul.f32 %v8178_v41, %v9145_v18  ;;  %v9154_v60 = vpack.c.bf16 %v3125_v35, %v3125_v35  ;;  %v7678_v18 = vcombine.high %v3530_v49, %v3534_v10  ;;  %v3569_v34 = vld [vmem:[#allocation16 + $0xd80] sm:$0xff]  ;;  %v8183_v41 = vld [vmem:[#allocation26] sm:$0xff]  ;;  %v7707_v45 = vcombine.low %v3561_v26, %v3565_v37 }
 0x858   :  { %v9152_v50 = vpack.c.bf16 %v3126_v42, %v3126_v42  ;;  %6364 = vmatpush1.bf16.msra.mxu1 %v7659_v2  ;;  %6528 = vmatpush1.bf16.msra.mxu0 %v7661_v33  ;;  %v7708_v2 = vcombine.high %v3561_v26, %v3565_v37  ;;  %v7710_v33 = vcombine.high %v3562_v27, %v3566_v28  ;;  %v3573_v35 = vld [vmem:[#allocation16 + $0xda0] sm:$0xff] }
 0x859   :  { %6374 = vmatprep.subr.bf16.mxu1 %v7668_v36  ;;  %6538 = vmatprep.subr.bf16.mxu0 %v7670_v38  ;;  %v9158_v56 = vpack.c.bf16 %v3128_v47, %v3128_v47  ;;  %v3570_v36 = vld [vmem:[#allocation16 + $0xd88] sm:$0xff]  ;;  %v1452_v42 = vrot.slane %v8183_v41, %v1451_v29  ;;  %v7709_v47 = vcombine.low %v3562_v27, %v3566_v28  ;;  %v3577_v10 = vld [vmem:[#allocation16 + $0xdc0] sm:$0xff] }
 0x85a   :  { %6365 = vmatprep.mubr.bf16.mxu1 %v9152_v50  ;;  %6529 = vmatprep.mubr.bf16.mxu0 %v9152_v50  ;;  %v3574_v38 = vld [vmem:[#allocation16 + $0xda8] sm:$0xff]  ;;  %v7716_v48 = vcombine.high %v3569_v34, %v3573_v35 }
 0x85b   :  { %6366 = vmatmul.mubr.bf16.vlgmr.msra.gmra.mrb[20].mxu1 %v9154_v60  ;;  %6530 = vmatmul.mubr.bf16.vlgmr.msra.gmra.mrb[24].mxu0 %v9154_v60  ;;  %v7718_v49 = vcombine.high %v3570_v36, %v3574_v38  ;;  %v7717_v53 = vcombine.low %v3570_v36, %v3574_v38 }
 0x85c   :  { %6375 = vmatpush1.bf16.msra.mxu1 %v7667_v5  ;;  %6539 = vmatpush1.bf16.msra.mxu0 %v7669_v51  ;;  %v3581_v5 = vld [vmem:[#allocation16 + $0xde0] sm:$0xff]  ;;  %v3578_v51 = vld [vmem:[#allocation16 + $0xdc8] sm:$0xff] }
 0x85d   :  { %6406 = vmatprep.mubr.bf16.mxu1 %v9158_v56  ;;  %6570 = vmatprep.mubr.bf16.mxu0 %v9158_v56  ;;  %v7724_v54 = vcombine.high %v3577_v10, %v3581_v5  ;;  %v7726_v55 = vcombine.high %v3578_v51, %v3582_v52  ;;  %v7723_v7 = vcombine.low %v3577_v10, %v3581_v5 }
 0x85e   :  { %6376 = vmatprep.subr.bf16.mxu1 %v7676_v8  ;;  %6540 = vmatprep.subr.bf16.mxu0 %v7678_v18  ;;  %v9168_v8 = vadd.f32 %v9140_v61, %v1452_v42  ;;  %v7715_v18 = vcombine.low %v3569_v34, %v3573_v35  ;;  %v7725_v30 = vcombine.low %v3578_v51, %v3582_v52  ;;  %v3617_v42 = vld [vmem:[#allocation16 + $0xf00] sm:$0xff] }
 0x860   :  { %6377 = vmatpush1.bf16.msra.mxu1 %v7675_v57  ;;  %6541 = vmatpush1.bf16.msra.mxu0 %v7677_v58  ;;  %v3585_v57 = vld [vmem:[#allocation16 + $0xe00] sm:$0xff]  ;;  %v7281_v6 = vmul.f32 -1.442695, %v9168_v8 }
 0x861   :  { %6378 = vmatprep.subr.bf16.mxu1 %v7684_v59  ;;  %6542 = vmatprep.subr.bf16.mxu0 %v7686_v62  ;;  %v3589_v58 = vld [vmem:[#allocation16 + $0xe20] sm:$0xff]  ;;  %v3586_v59 = vld [vmem:[#allocation16 + $0xe08] sm:$0xff] }
 0x862   :  { %v3590_v62 = vld [vmem:[#allocation16 + $0xe28] sm:$0xff]  ;;  %v7732_v61 = vcombine.high %v3585_v57, %v3589_v58  ;;  %8179 = vpow2.f32 %v7281_v6  ;;  %v7731_v16 = vcombine.low %v3585_v57, %v3589_v58  ;;  %v3633_v6 = vld [vmem:[#allocation16 + $0xf80] sm:$0xff] }
 0x863   :  { %v7734_v11 = vcombine.high %v3586_v59, %v3590_v62  ;;  %v7733_v19 = vcombine.low %v3586_v59, %v3590_v62 }
 0x864   :  { %6379 = vmatpush1.bf16.msra.mxu1 %v7683_v39  ;;  %6543 = vmatpush1.bf16.msra.mxu0 %v7685_v12  ;;  %v3593_v39 = vld [vmem:[#allocation16 + $0xe40] sm:$0xff] }
 0x865   :  { %6380 = vmatprep.subr.bf16.mxu1 %v7692_v14  ;;  %6544 = vmatprep.subr.bf16.mxu0 %v7694_v15  ;;  %v3597_v12 = vld [vmem:[#allocation16 + $0xe60] sm:$0xff]  ;;  %v3594_v14 = vld [vmem:[#allocation16 + $0xe48] sm:$0xff] }
 0x866   :  { %v3598_v15 = vld [vmem:[#allocation16 + $0xe68] sm:$0xff]  ;;  %v7740_v20 = vcombine.high %v3593_v39, %v3597_v12  ;;  %v7739_v26 = vcombine.low %v3593_v39, %v3597_v12 }
 0x867   :  { %v7742_v21 = vcombine.high %v3594_v14, %v3598_v15  ;;  %v7741_v37 = vcombine.low %v3594_v14, %v3598_v15  ;;  %v3641_v15 = vld [vmem:[#allocation16 + $0xfc0] sm:$0xff] }
 0x868   :  { %6381 = vmatpush1.bf16.msra.mxu1 %v7691_v22  ;;  %6545 = vmatpush1.bf16.msra.mxu0 %v7693_v43  ;;  %v3601_v22 = vld [vmem:[#allocation16 + $0xe80] sm:$0xff] }
 0x869   :  { %6382 = vmatprep.subr.bf16.mxu1 %v7700_v23  ;;  %6546 = vmatprep.subr.bf16.mxu0 %v7702_v25  ;;  %v3605_v43 = vld [vmem:[#allocation16 + $0xea0] sm:$0xff]  ;;  %v3602_v23 = vld [vmem:[#allocation16 + $0xe88] sm:$0xff] }
 0x86a   :  { %v3606_v25 = vld [vmem:[#allocation16 + $0xea8] sm:$0xff]  ;;  %v7748_v27 = vcombine.high %v3601_v22, %v3605_v43  ;;  %v7747_v34 = vcombine.low %v3601_v22, %v3605_v43 }
 0x86b   :  { %v7750_v28 = vcombine.high %v3602_v23, %v3606_v25  ;;  %v7749_v35 = vcombine.low %v3602_v23, %v3606_v25  ;;  %v3139_v25 = vld [vmem:[#allocation16 + $0x10] sm:$0xff] }
 0x86c   :  { %6383 = vmatpush1.bf16.msra.mxu1 %v7699_v31  ;;  %6547 = vmatpush1.bf16.msra.mxu0 %v7701_v32  ;;  %v3609_v31 = vld [vmem:[#allocation16 + $0xec0] sm:$0xff]  ;;  %v8180_v36 = vpop.eup %8179 }
 0x86d   :  { %6384 = vmatprep.subr.bf16.mxu1 %v7708_v2  ;;  %6548 = vmatprep.subr.bf16.mxu0 %v7710_v33  ;;  %v3613_v32 = vld [vmem:[#allocation16 + $0xee0] sm:$0xff]  ;;  %v3610_v2 = vld [vmem:[#allocation16 + $0xec8] sm:$0xff] }
 0x86e   :  { %v3614_v33 = vld [vmem:[#allocation16 + $0xee8] sm:$0xff]  ;;  %v7756_v38 = vcombine.high %v3609_v31, %v3613_v32  ;;  %v7755_v10 = vcombine.low %v3609_v31, %v3613_v32 }
 0x86f   :  { %v7758_v41 = vcombine.high %v3610_v2, %v3614_v33  ;;  %v7757_v5 = vcombine.low %v3610_v2, %v3614_v33 }
 0x870   :  { %6385 = vmatpush1.bf16.msra.mxu1 %v7707_v45  ;;  %6549 = vmatpush1.bf16.msra.mxu0 %v7709_v47  ;;  %v3621_v45 = vld [vmem:[#allocation16 + $0xf20] sm:$0xff]  ;;  %v3618_v47 = vld [vmem:[#allocation16 + $0xf08] sm:$0xff] }
 0x871   :  { %6386 = vmatprep.subr.bf16.mxu1 %v7716_v48  ;;  %6550 = vmatprep.subr.bf16.mxu0 %v7718_v49  ;;  %v3622_v48 = vld [vmem:[#allocation16 + $0xf28] sm:$0xff]  ;;  %v3103_v49 = vadd.f32 1.0, %v8180_v36  ;;  %v7764_v51 = vcombine.high %v3617_v42, %v3621_v45  ;;  %v7763_v57 = vcombine.low %v3617_v42, %v3621_v45  ;;  %v3151_v36 = vld [vmem:[#allocation16 + $0x70] sm:$0xff] }
 0x872   :  { %v7766_v52 = vcombine.high %v3618_v47, %v3622_v48  ;;  %v7765_v58 = vcombine.low %v3618_v47, %v3622_v48 }
 0x873   :  { %8181 = vrcp.f32 %v3103_v49 }
 0x874   :  { %6387 = vmatpush1.bf16.msra.mxu1 %v7715_v18  ;;  %6551 = vmatpush1.bf16.msra.mxu0 %v7717_v53  ;;  %v3625_v18 = vld [vmem:[#allocation16 + $0xf40] sm:$0xff] }
 0x875   :  { %6388 = vmatprep.subr.bf16.mxu1 %v7724_v54  ;;  %6552 = vmatprep.subr.bf16.mxu0 %v7726_v55  ;;  %v3629_v53 = vld [vmem:[#allocation16 + $0xf60] sm:$0xff]  ;;  %v3626_v54 = vld [vmem:[#allocation16 + $0xf48] sm:$0xff] }
 0x876   :  { %v3630_v55 = vld [vmem:[#allocation16 + $0xf68] sm:$0xff]  ;;  %v7772_v59 = vcombine.high %v3625_v18, %v3629_v53 }
 0x877   :  { %v7774_v62 = vcombine.high %v3626_v54, %v3630_v55  ;;  %v7773_v39 = vcombine.low %v3626_v54, %v3630_v55  ;;  %v3163_v55 = vld [vmem:[#allocation16 + $0xd0] sm:$0xff] }
 0x878   :  { %6389 = vmatpush1.bf16.msra.mxu1 %v7723_v7  ;;  %6553 = vmatpush1.bf16.msra.mxu0 %v7725_v30  ;;  %v3637_v7 = vld [vmem:[#allocation16 + $0xfa0] sm:$0xff]  ;;  %v3634_v30 = vld [vmem:[#allocation16 + $0xf88] sm:$0xff] }
 0x879   :  { %6390 = vmatprep.subr.bf16.mxu1 %v7732_v61  ;;  %6554 = vmatprep.subr.bf16.mxu0 %v7734_v11  ;;  %v3638_v61 = vld [vmem:[#allocation16 + $0xfa8] sm:$0xff]  ;;  %v7771_v11 = vcombine.low %v3625_v18, %v3629_v53  ;;  %v7780_v12 = vcombine.high %v3633_v6, %v3637_v7 }
 0x87a   :  { %v7782_v14 = vcombine.high %v3634_v30, %v3638_v61  ;;  %v7781_v22 = vcombine.low %v3634_v30, %v3638_v61  ;;  %v3171_v61 = vld [vmem:[#allocation16 + $0x110] sm:$0xff] }
 0x87c   :  { %6391 = vmatpush1.bf16.msra.mxu1 %v7731_v16  ;;  %6555 = vmatpush1.bf16.msra.mxu0 %v7733_v19  ;;  %v3645_v16 = vld [vmem:[#allocation16 + $0xfe0] sm:$0xff]  ;;  %v3642_v19 = vld [vmem:[#allocation16 + $0xfc8] sm:$0xff] }
 0x87d   :  { %6392 = vmatprep.subr.bf16.mxu1 %v7740_v20  ;;  %6556 = vmatprep.subr.bf16.mxu0 %v7742_v21  ;;  %v3646_v20 = vld [vmem:[#allocation16 + $0xfe8] sm:$0xff]  ;;  %v7779_v21 = vcombine.low %v3633_v6, %v3637_v7  ;;  %v7788_v43 = vcombine.high %v3641_v15, %v3645_v16  ;;  %v7787_v31 = vcombine.low %v3641_v15, %v3645_v16 }
 0x87e   :  { %v7790_v23 = vcombine.high %v3642_v19, %v3646_v20  ;;  %v7789_v32 = vcombine.low %v3642_v19, %v3646_v20  ;;  %v3179_v19 = vld [vmem:[#allocation16 + $0x150] sm:$0xff] }
 0x87f   :  { %v3183_v20 = vld [vmem:[#allocation16 + $0x170] sm:$0xff] }
 0x880   :  { %6393 = vmatpush1.bf16.msra.mxu1 %v7739_v26  ;;  %6557 = vmatpush1.bf16.msra.mxu0 %v7741_v37  ;;  %v8182_v26 = vpop.eup %8181  ;;  %v3143_v37 = vld [vmem:[#allocation16 + $0x30] sm:$0xff] }
 0x881   :  { %6394 = vmatprep.subr.bf16.mxu1 %v7748_v27  ;;  %6558 = vmatprep.subr.bf16.mxu0 %v7750_v28  ;;  %v3140_v27 = vld [vmem:[#allocation16 + $0x18] sm:$0xff]  ;;  %v3127_v2 = vmul.f32 %v8182_v26, %v9168_v8  ;;  %v7288_v33 = vcombine.high %v3139_v25, %v3143_v37  ;;  %v7287_v42 = vcombine.low %v3139_v25, %v3143_v37  ;;  %v3159_v8 = vld [vmem:[#allocation16 + $0xb0] sm:$0xff] }
 0x882   :  { %v3144_v28 = vld [vmem:[#allocation16 + $0x38] sm:$0xff]  ;;  %v7328_v25 = vcombine.high %v3179_v19, %v3183_v20  ;;  %v3187_v37 = vld [vmem:[#allocation16 + $0x190] sm:$0xff] }
 0x883   :  { %v9172_v45 = vpack.c.bf16 %v3127_v2, %v3127_v2  ;;  %v7289_v47 = vcombine.low %v3140_v27, %v3144_v28 }
 0x884   :  { %6395 = vmatpush1.bf16.msra.mxu1 %v7747_v34  ;;  %6559 = vmatpush1.bf16.msra.mxu0 %v7749_v35  ;;  %v7290_v34 = vcombine.high %v3140_v27, %v3144_v28  ;;  %v3147_v35 = vld [vmem:[#allocation16 + $0x50] sm:$0xff]  ;;  %v3188_v28 = vld [vmem:[#allocation16 + $0x198] sm:$0xff] }
 0x885   :  { %6396 = vmatprep.subr.bf16.mxu1 %v7756_v38  ;;  %6560 = vmatprep.subr.bf16.mxu0 %v7758_v41  ;;  %v3148_v38 = vld [vmem:[#allocation16 + $0x58] sm:$0xff]  ;;  %v7296_v48 = vcombine.high %v3147_v35, %v3151_v36  ;;  %v3191_v27 = vld [vmem:[#allocation16 + $0x1b0] sm:$0xff] }
 0x886   :  { %v3152_v41 = vld [vmem:[#allocation16 + $0x78] sm:$0xff] }
 0x887   :  { %v7298_v49 = vcombine.high %v3148_v38, %v3152_v41  ;;  %v7297_v18 = vcombine.low %v3148_v38, %v3152_v41  ;;  %v3196_v38 = vld [vmem:[#allocation16 + $0x1d8] sm:$0xff] }
 0x888   :  { %6397 = vmatpush1.bf16.msra.mxu1 %v7755_v10  ;;  %6561 = vmatpush1.bf16.msra.mxu0 %v7757_v5  ;;  %v3155_v10 = vld [vmem:[#allocation16 + $0x90] sm:$0xff]  ;;  %v3156_v5 = vld [vmem:[#allocation16 + $0x98] sm:$0xff] }
 0x889   :  { %6398 = vmatprep.subr.bf16.mxu1 %v7764_v51  ;;  %6562 = vmatprep.subr.bf16.mxu0 %v7766_v52  ;;  %v3160_v51 = vld [vmem:[#allocation16 + $0xb8] sm:$0xff]  ;;  %v7295_v52 = vcombine.low %v3147_v35, %v3151_v36  ;;  %v7304_v53 = vcombine.high %v3155_v10, %v3159_v8  ;;  %v3195_v35 = vld [vmem:[#allocation16 + $0x1d0] sm:$0xff] }
 0x88a   :  { %v7306_v54 = vcombine.high %v3156_v5, %v3160_v51  ;;  %v7305_v6 = vcombine.low %v3156_v5, %v3160_v51  ;;  %v3199_v36 = vld [vmem:[#allocation16 + $0x1f0] sm:$0xff]  ;;  %v3200_v41 = vld [vmem:[#allocation16 + $0x1f8] sm:$0xff] }
 0x88b   :  { %v3204_v5 = vld [vmem:[#allocation16 + $0x218] sm:$0xff] }
 0x88c   :  { %6399 = vmatpush1.bf16.msra.mxu1 %v7763_v57  ;;  %6563 = vmatpush1.bf16.msra.mxu0 %v7765_v58  ;;  %v3167_v57 = vld [vmem:[#allocation16 + $0xf0] sm:$0xff]  ;;  %v3164_v58 = vld [vmem:[#allocation16 + $0xd8] sm:$0xff] }
 0x88d   :  { %6400 = vmatprep.subr.bf16.mxu1 %v7772_v59  ;;  %6564 = vmatprep.subr.bf16.mxu0 %v7774_v62  ;;  %v3168_v59 = vld [vmem:[#allocation16 + $0xf8] sm:$0xff]  ;;  %v7303_v62 = vcombine.low %v3155_v10, %v3159_v8  ;;  %v7312_v7 = vcombine.high %v3163_v55, %v3167_v57  ;;  %v3203_v10 = vld [vmem:[#allocation16 + $0x210] sm:$0xff] }
 0x88e   :  { %v7314_v30 = vcombine.high %v3164_v58, %v3168_v59  ;;  %v3207_v8 = vld [vmem:[#allocation16 + $0x230] sm:$0xff]  ;;  %v3208_v51 = vld [vmem:[#allocation16 + $0x238] sm:$0xff] }
 0x890   :  { %6401 = vmatpush1.bf16.msra.mxu1 %v7771_v11  ;;  %6565 = vmatpush1.bf16.msra.mxu0 %v7773_v39  ;;  %v3175_v11 = vld [vmem:[#allocation16 + $0x130] sm:$0xff]  ;;  %v3176_v39 = vld [vmem:[#allocation16 + $0x138] sm:$0xff] }
 0x891   :  { %6402 = vmatprep.subr.bf16.mxu1 %v7780_v12  ;;  %6566 = vmatprep.subr.bf16.mxu0 %v7782_v14  ;;  %v7311_v12 = vcombine.low %v3163_v55, %v3167_v57  ;;  %v7313_v14 = vcombine.low %v3164_v58, %v3168_v59  ;;  %v7320_v15 = vcombine.high %v3171_v61, %v3175_v11  ;;  %v3211_v55 = vld [vmem:[#allocation16 + $0x250] sm:$0xff]  ;;  %v3212_v58 = vld [vmem:[#allocation16 + $0x258] sm:$0xff] }
 0x892   :  { %v3215_v57 = vld [vmem:[#allocation16 + $0x270] sm:$0xff]  ;;  %v3216_v59 = vld [vmem:[#allocation16 + $0x278] sm:$0xff] }
 0x894   :  { %6403 = vmatpush1.bf16.msra.mxu1 %v7779_v21  ;;  %6567 = vmatpush1.bf16.msra.mxu0 %v7781_v22  ;;  %v3180_v21 = vld [vmem:[#allocation16 + $0x158] sm:$0xff] }
 0x895   :  { %6404 = vmatprep.subr.bf16.mxu1 %v7788_v43  ;;  %6568 = vmatprep.subr.bf16.mxu0 %v7790_v23  ;;  %v3184_v22 = vld [vmem:[#allocation16 + $0x178] sm:$0xff]  ;;  %v7319_v43 = vcombine.low %v3171_v61, %v3175_v11  ;;  %v3219_v61 = vld [vmem:[#allocation16 + $0x290] sm:$0xff] }
 0x896   :  { %v7330_v26 = vcombine.high %v3180_v21, %v3184_v22  ;;  %v7329_v2 = vcombine.low %v3180_v21, %v3184_v22  ;;  %v3223_v11 = vld [vmem:[#allocation16 + $0x2b0] sm:$0xff]  ;;  %v3228_v21 = vld [vmem:[#allocation16 + $0x2d8] sm:$0xff] }
 0x897   :  { %v3232_v22 = vld [vmem:[#allocation16 + $0x2f8] sm:$0xff] }
 0x898   :  { %6405 = vmatpush1.bf16.msra.mxu1 %v7787_v31  ;;  %6569 = vmatpush1.bf16.msra.mxu0 %v7789_v32  ;;  %v3192_v31 = vld [vmem:[#allocation16 + $0x1b8] sm:$0xff]  ;;  %v7327_v32 = vcombine.low %v3179_v19, %v3183_v20  ;;  %v3227_v19 = vld [vmem:[#allocation16 + $0x2d0] sm:$0xff] }
 0x899   :  { %6579 = vmatprep.subr.bf16.mxu1 %v7288_v33  ;;  %6743 = vmatprep.subr.bf16.mxu0 %v7290_v34  ;;  %v7336_v33 = vcombine.high %v3187_v37, %v3191_v27  ;;  %v7338_v34 = vcombine.high %v3188_v28, %v3192_v31  ;;  %v3231_v20 = vld [vmem:[#allocation16 + $0x2f0] sm:$0xff] }
 0x89b   :  { %6407 = vmatmul.mubr.bf16.vlgmr.msra.gmra.mrb[20].mxu1 %v9172_v45  ;;  %6571 = vmatmul.mubr.bf16.vlgmr.msra.gmra.mrb[24].mxu0 %v9172_v45 }
 0x89c   :  { %6580 = vmatpush1.bf16.msra.mxu1 %v7287_v42  ;;  %6611 = vmatprep.mubr.bf16.mxu1 %v9099_v0  ;;  %v7335_v42 = vcombine.low %v3187_v37, %v3191_v27  ;;  %v3235_v37 = vld [vmem:[#allocation16 + $0x310] sm:$0xff] }
 0x89d   :  { %6744 = vmatpush1.bf16.msra.mxu0 %v7289_v47  ;;  %6775 = vmatprep.mubr.bf16.mxu0 %v9099_v0  ;;  %v3172_v0 = vld [vmem:[#allocation16 + $0x118] sm:$0xff]  ;;  %v7337_v47 = vcombine.low %v3188_v28, %v3192_v31  ;;  %v3239_v27 = vld [vmem:[#allocation16 + $0x330] sm:$0xff] }
 0x89e   :  { %6581 = vmatprep.subr.bf16.mxu1 %v7296_v48  ;;  %6745 = vmatprep.subr.bf16.mxu0 %v7298_v49  ;;  %v7322_v16 = vcombine.high %v3172_v0, %v3176_v39  ;;  %v7321_v23 = vcombine.low %v3172_v0, %v3176_v39  ;;  %v7344_v48 = vcombine.high %v3195_v35, %v3199_v36  ;;  %v3220_v0 = vld [vmem:[#allocation16 + $0x298] sm:$0xff] }
 0x89f   :  { %v7346_v49 = vcombine.high %v3196_v38, %v3200_v41  ;;  %v3224_v39 = vld [vmem:[#allocation16 + $0x2b8] sm:$0xff] }
 0x8a0   :  { %6582 = vmatpush1.bf16.msra.mxu1 %v7295_v52  ;;  %v7343_v52 = vcombine.low %v3195_v35, %v3199_v36  ;;  %v3236_v28 = vld [vmem:[#allocation16 + $0x318] sm:$0xff]  ;;  %v3243_v35 = vld [vmem:[#allocation16 + $0x350] sm:$0xff] }
 0x8a1   :  { %6746 = vmatpush1.bf16.msra.mxu0 %v7297_v18  ;;  %6583 = vmatprep.subr.bf16.mxu1 %v7304_v53  ;;  %v7345_v18 = vcombine.low %v3196_v38, %v3200_v41  ;;  %v7352_v53 = vcombine.high %v3203_v10, %v3207_v8  ;;  %v3240_v31 = vld [vmem:[#allocation16 + $0x338] sm:$0xff]  ;;  %v3247_v36 = vld [vmem:[#allocation16 + $0x370] sm:$0xff] }
 0x8a2   :  { %6747 = vmatprep.subr.bf16.mxu0 %v7306_v54  ;;  %v7354_v54 = vcombine.high %v3204_v5, %v3208_v51  ;;  %v3244_v38 = vld [vmem:[#allocation16 + $0x358] sm:$0xff] }
 0x8a3   :  { %v3248_v41 = vld [vmem:[#allocation16 + $0x378] sm:$0xff] }
 0x8a4   :  { %6584 = vmatpush1.bf16.msra.mxu1 %v7303_v62  ;;  %v7351_v62 = vcombine.low %v3203_v10, %v3207_v8  ;;  %v3251_v10 = vld [vmem:[#allocation16 + $0x390] sm:$0xff] }
 0x8a5   :  { %6748 = vmatpush1.bf16.msra.mxu0 %v7305_v6  ;;  %6585 = vmatprep.subr.bf16.mxu1 %v7312_v7  ;;  %v7353_v6 = vcombine.low %v3204_v5, %v3208_v51  ;;  %v7360_v7 = vcombine.high %v3211_v55, %v3215_v57  ;;  %v3255_v8 = vld [vmem:[#allocation16 + $0x3b0] sm:$0xff]  ;;  %v3252_v5 = vld [vmem:[#allocation16 + $0x398] sm:$0xff] }
 0x8a6   :  { %6749 = vmatprep.subr.bf16.mxu0 %v7314_v30  ;;  %v7362_v30 = vcombine.high %v3212_v58, %v3216_v59  ;;  %v3256_v51 = vld [vmem:[#allocation16 + $0x3b8] sm:$0xff] }
 0x8a8   :  { %6586 = vmatpush1.bf16.msra.mxu1 %v7311_v12  ;;  %v7359_v12 = vcombine.low %v3211_v55, %v3215_v57  ;;  %v3259_v55 = vld [vmem:[#allocation16 + $0x3d0] sm:$0xff] }
 0x8a9   :  { %6750 = vmatpush1.bf16.msra.mxu0 %v7313_v14  ;;  %6587 = vmatprep.subr.bf16.mxu1 %v7320_v15  ;;  %v7361_v14 = vcombine.low %v3212_v58, %v3216_v59  ;;  %v7368_v15 = vcombine.high %v3219_v61, %v3223_v11  ;;  %v3263_v57 = vld [vmem:[#allocation16 + $0x3f0] sm:$0xff]  ;;  %v3260_v58 = vld [vmem:[#allocation16 + $0x3d8] sm:$0xff] }
 0x8aa   :  { %6751 = vmatprep.subr.bf16.mxu0 %v7322_v16  ;;  %v7370_v16 = vcombine.high %v3220_v0, %v3224_v39  ;;  %v3264_v59 = vld [vmem:[#allocation16 + $0x3f8] sm:$0xff] }
 0x8ac   :  { %6588 = vmatpush1.bf16.msra.mxu1 %v7319_v43  ;;  %v7367_v43 = vcombine.low %v3219_v61, %v3223_v11  ;;  %v3267_v61 = vld [vmem:[#allocation16 + $0x410] sm:$0xff] }
 0x8ad   :  { %6752 = vmatpush1.bf16.msra.mxu0 %v7321_v23  ;;  %6589 = vmatprep.subr.bf16.mxu1 %v7328_v25  ;;  %v7369_v23 = vcombine.low %v3220_v0, %v3224_v39  ;;  %v7376_v25 = vcombine.high %v3227_v19, %v3231_v20  ;;  %v3271_v11 = vld [vmem:[#allocation16 + $0x430] sm:$0xff]  ;;  %v3268_v0 = vld [vmem:[#allocation16 + $0x418] sm:$0xff] }
 0x8ae   :  { %6753 = vmatprep.subr.bf16.mxu0 %v7330_v26  ;;  %v7378_v26 = vcombine.high %v3228_v21, %v3232_v22  ;;  %v3272_v39 = vld [vmem:[#allocation16 + $0x438] sm:$0xff] }
 0x8b0   :  { %6590 = vmatpush1.bf16.msra.mxu1 %v7327_v32  ;;  %v7375_v32 = vcombine.low %v3227_v19, %v3231_v20  ;;  %v3275_v19 = vld [vmem:[#allocation16 + $0x450] sm:$0xff] }
 0x8b1   :  { %6754 = vmatpush1.bf16.msra.mxu0 %v7329_v2  ;;  %6591 = vmatprep.subr.bf16.mxu1 %v7336_v33  ;;  %v7377_v2 = vcombine.low %v3228_v21, %v3232_v22  ;;  %v7384_v33 = vcombine.high %v3235_v37, %v3239_v27  ;;  %v3279_v20 = vld [vmem:[#allocation16 + $0x470] sm:$0xff]  ;;  %v7415_v21 = vcombine.low %v3267_v61, %v3271_v11  ;;  %v3276_v22 = vld [vmem:[#allocation16 + $0x458] sm:$0xff] }
 0x8b2   :  { %6755 = vmatprep.subr.bf16.mxu0 %v7338_v34  ;;  %v7386_v34 = vcombine.high %v3236_v28, %v3240_v31 }
 0x8b4   :  { %6592 = vmatpush1.bf16.msra.mxu1 %v7335_v42  ;;  %v7383_v42 = vcombine.low %v3235_v37, %v3239_v27  ;;  %v3287_v37 = vld [vmem:[#allocation16 + $0x4b0] sm:$0xff] }
 0x8b5   :  { %6756 = vmatpush1.bf16.msra.mxu0 %v7337_v47  ;;  %6593 = vmatprep.subr.bf16.mxu1 %v7344_v48  ;;  %v7385_v47 = vcombine.low %v3236_v28, %v3240_v31  ;;  %v7392_v48 = vcombine.high %v3243_v35, %v3247_v36  ;;  %v3284_v28 = vld [vmem:[#allocation16 + $0x498] sm:$0xff] }
 0x8b6   :  { %6757 = vmatprep.subr.bf16.mxu0 %v7346_v49  ;;  %v7394_v49 = vcombine.high %v3244_v38, %v3248_v41  ;;  %v3288_v31 = vld [vmem:[#allocation16 + $0x4b8] sm:$0xff] }
 0x8b8   :  { %6594 = vmatpush1.bf16.msra.mxu1 %v7343_v52  ;;  %v7391_v52 = vcombine.low %v3243_v35, %v3247_v36  ;;  %v3291_v35 = vld [vmem:[#allocation16 + $0x4d0] sm:$0xff] }
 0x8b9   :  { %6758 = vmatpush1.bf16.msra.mxu0 %v7345_v18  ;;  %6595 = vmatprep.subr.bf16.mxu1 %v7352_v53  ;;  %v7393_v18 = vcombine.low %v3244_v38, %v3248_v41  ;;  %v7400_v53 = vcombine.high %v3251_v10, %v3255_v8  ;;  %v3295_v36 = vld [vmem:[#allocation16 + $0x4f0] sm:$0xff]  ;;  %v3292_v38 = vld [vmem:[#allocation16 + $0x4d8] sm:$0xff] }
 0x8ba   :  { %6759 = vmatprep.subr.bf16.mxu0 %v7354_v54  ;;  %v7402_v54 = vcombine.high %v3252_v5, %v3256_v51  ;;  %v3296_v41 = vld [vmem:[#allocation16 + $0x4f8] sm:$0xff] }
 0x8bc   :  { %6596 = vmatpush1.bf16.msra.mxu1 %v7351_v62  ;;  %v7399_v62 = vcombine.low %v3251_v10, %v3255_v8  ;;  %v3303_v10 = vld [vmem:[#allocation16 + $0x530] sm:$0xff]  ;;  %v3300_v8 = vld [vmem:[#allocation16 + $0x518] sm:$0xff] }
 0x8bd   :  { %6760 = vmatpush1.bf16.msra.mxu0 %v7353_v6  ;;  %6597 = vmatprep.subr.bf16.mxu1 %v7360_v7  ;;  %v7401_v6 = vcombine.low %v3252_v5, %v3256_v51  ;;  %v7408_v7 = vcombine.high %v3259_v55, %v3263_v57  ;;  %v3304_v5 = vld [vmem:[#allocation16 + $0x538] sm:$0xff]  ;;  %v7441_v51 = vcombine.low %v3292_v38, %v3296_v41 }
 0x8be   :  { %6761 = vmatprep.subr.bf16.mxu0 %v7362_v30  ;;  %v7410_v30 = vcombine.high %v3260_v58, %v3264_v59 }
 0x8c0   :  { %6598 = vmatpush1.bf16.msra.mxu1 %v7359_v12  ;;  %v7407_v12 = vcombine.low %v3259_v55, %v3263_v57  ;;  %v3308_v55 = vld [vmem:[#allocation16 + $0x558] sm:$0xff] }
 0x8c1   :  { %6762 = vmatpush1.bf16.msra.mxu0 %v7361_v14  ;;  %6599 = vmatprep.subr.bf16.mxu1 %v7368_v15  ;;  %v7409_v14 = vcombine.low %v3260_v58, %v3264_v59  ;;  %v7416_v15 = vcombine.high %v3267_v61, %v3271_v11  ;;  %v3312_v57 = vld [vmem:[#allocation16 + $0x578] sm:$0xff]  ;;  %v7449_v59 = vcombine.low %v3300_v8, %v3304_v5 }
 0x8c2   :  { %6763 = vmatprep.subr.bf16.mxu0 %v7370_v16  ;;  %v7418_v16 = vcombine.high %v3268_v0, %v3272_v39  ;;  %v3316_v61 = vld [vmem:[#allocation16 + $0x598] sm:$0xff] }
 0x8c3   :  { %v3320_v11 = vld [vmem:[#allocation16 + $0x5b8] sm:$0xff] }
 0x8c4   :  { %6600 = vmatpush1.bf16.msra.mxu1 %v7367_v43  ;;  %v3280_v43 = vld [vmem:[#allocation16 + $0x478] sm:$0xff] }
 0x8c5   :  { %6764 = vmatpush1.bf16.msra.mxu0 %v7369_v23  ;;  %6601 = vmatprep.subr.bf16.mxu1 %v7376_v25  ;;  %v7417_v23 = vcombine.low %v3268_v0, %v3272_v39  ;;  %v7424_v25 = vcombine.high %v3275_v19, %v3279_v20  ;;  %v7426_v27 = vcombine.high %v3276_v22, %v3280_v43 }
 0x8c6   :  { %6765 = vmatprep.subr.bf16.mxu0 %v7378_v26  ;;  %v3283_v26 = vld [vmem:[#allocation16 + $0x490] sm:$0xff]  ;;  %v7457_v39 = vcombine.low %v3308_v55, %v3312_v57 }
 0x8c8   :  { %6602 = vmatpush1.bf16.msra.mxu1 %v7375_v32  ;;  %v7423_v32 = vcombine.low %v3275_v19, %v3279_v20  ;;  %v3324_v19 = vld [vmem:[#allocation16 + $0x5d8] sm:$0xff] }
 0x8c9   :  { %6766 = vmatpush1.bf16.msra.mxu0 %v7377_v2  ;;  %6603 = vmatprep.subr.bf16.mxu1 %v7384_v33  ;;  %v7425_v2 = vcombine.low %v3276_v22, %v3280_v43  ;;  %v7432_v33 = vcombine.high %v3283_v26, %v3287_v37  ;;  %v3328_v20 = vld [vmem:[#allocation16 + $0x5f8] sm:$0xff]  ;;  %v7465_v22 = vcombine.low %v3316_v61, %v3320_v11 }
 0x8ca   :  { %6767 = vmatprep.subr.bf16.mxu0 %v7386_v34  ;;  %v7434_v34 = vcombine.high %v3284_v28, %v3288_v31 }
 0x8cc   :  { %6604 = vmatpush1.bf16.msra.mxu1 %v7383_v42  ;;  %v7431_v42 = vcombine.low %v3283_v26, %v3287_v37  ;;  %v3335_v26 = vld [vmem:[#allocation16 + $0x630] sm:$0xff]  ;;  %v3332_v37 = vld [vmem:[#allocation16 + $0x618] sm:$0xff] }
 0x8cd   :  { %6768 = vmatpush1.bf16.msra.mxu0 %v7385_v47  ;;  %6605 = vmatprep.subr.bf16.mxu1 %v7392_v48  ;;  %v7440_v47 = vcombine.high %v3291_v35, %v3295_v36  ;;  %v7442_v48 = vcombine.high %v3292_v38, %v3296_v41 }
 0x8ce   :  { %6769 = vmatprep.subr.bf16.mxu0 %v7394_v49  ;;  %v3299_v49 = vld [vmem:[#allocation16 + $0x510] sm:$0xff] }
 0x8cf   :  { %v7447_v58 = vcombine.low %v3299_v49, %v3303_v10 }
 0x8d0   :  { %6606 = vmatpush1.bf16.msra.mxu1 %v7391_v52  ;;  %v7448_v52 = vcombine.high %v3299_v49, %v3303_v10  ;;  %v3348_v49 = vld [vmem:[#allocation16 + $0x698] sm:$0xff] }
 0x8d1   :  { %6770 = vmatpush1.bf16.msra.mxu0 %v7393_v18  ;;  %6607 = vmatprep.subr.bf16.mxu1 %v7400_v53  ;;  %v7450_v18 = vcombine.high %v3300_v8, %v3304_v5  ;;  %v3307_v53 = vld [vmem:[#allocation16 + $0x550] sm:$0xff]  ;;  %v3352_v10 = vld [vmem:[#allocation16 + $0x6b8] sm:$0xff] }
 0x8d2   :  { %6771 = vmatprep.subr.bf16.mxu0 %v7402_v54  ;;  %v3311_v54 = vld [vmem:[#allocation16 + $0x570] sm:$0xff] }
 0x8d3   :  { %v7455_v0 = vcombine.low %v3307_v53, %v3311_v54 }
 0x8d4   :  { %6608 = vmatpush1.bf16.msra.mxu1 %v7399_v62  ;;  %v7456_v62 = vcombine.high %v3307_v53, %v3311_v54  ;;  %v3356_v53 = vld [vmem:[#allocation16 + $0x6d8] sm:$0xff] }
 0x8d5   :  { %6772 = vmatpush1.bf16.msra.mxu0 %v7401_v6  ;;  %6609 = vmatprep.subr.bf16.mxu1 %v7408_v7  ;;  %v7458_v6 = vcombine.high %v3308_v55, %v3312_v57  ;;  %v3315_v7 = vld [vmem:[#allocation16 + $0x590] sm:$0xff]  ;;  %v3360_v54 = vld [vmem:[#allocation16 + $0x6f8] sm:$0xff]  ;;  %v7497_v57 = vcombine.low %v3348_v49, %v3352_v10 }
 0x8d6   :  { %6773 = vmatprep.subr.bf16.mxu0 %v7410_v30  ;;  %v3319_v30 = vld [vmem:[#allocation16 + $0x5b0] sm:$0xff] }
 0x8d8   :  { %6610 = vmatpush1.bf16.msra.mxu1 %v7407_v12  ;;  %v7464_v12 = vcombine.high %v3315_v7, %v3319_v30 }
 0x8d9   :  { %6774 = vmatpush1.bf16.msra.mxu0 %v7409_v14  ;;  %6620 = vmatprep.subr.bf16.mxu1 %v7416_v15  ;;  %v7466_v14 = vcombine.high %v3316_v61, %v3320_v11  ;;  %v3323_v15 = vld [vmem:[#allocation16 + $0x5d0] sm:$0xff]  ;;  %v7505_v11 = vcombine.low %v3356_v53, %v3360_v54 }
 0x8da   :  { %6784 = vmatprep.subr.bf16.mxu0 %v7418_v16  ;;  %v3327_v16 = vld [vmem:[#allocation16 + $0x5f0] sm:$0xff] }
 0x8db   :  { %6612 = vmatmul.mubr.bf16.vlgmr.msra.gmra.mrb[24].mxu1 %v9105_v17  ;;  %v7472_v43 = vcombine.high %v3323_v15, %v3327_v16 }
 0x8dc   :  { %6776 = vmatmul.mubr.bf16.vlgmr.msra.gmra.mrb[28].mxu0 %v9105_v17  ;;  %6621 = vmatpush1.bf16.msra.mxu1 %v7415_v21  ;;  %v7433_v17 = vcombine.low %v3284_v28, %v3288_v31  ;;  %v7463_v21 = vcombine.low %v3315_v7, %v3319_v30  ;;  %v7471_v28 = vcombine.low %v3323_v15, %v3327_v16  ;;  %v3364_v7 = vld [vmem:[#allocation16 + $0x718] sm:$0xff] }
 0x8dd   :  { %6652 = vmatprep.mubr.bf16.mxu1 %v9109_v24  ;;  %6785 = vmatpush1.bf16.msra.mxu0 %v7417_v23  ;;  %v7474_v23 = vcombine.high %v3324_v19, %v3328_v20  ;;  %v7473_v31 = vcombine.low %v3324_v19, %v3328_v20  ;;  %v3368_v30 = vld [vmem:[#allocation16 + $0x738] sm:$0xff] }
 0x8de   :  { %6816 = vmatprep.mubr.bf16.mxu0 %v9109_v24  ;;  %6622 = vmatprep.subr.bf16.mxu1 %v7424_v25  ;;  %v7439_v24 = vcombine.low %v3291_v35, %v3295_v36  ;;  %v3331_v25 = vld [vmem:[#allocation16 + $0x610] sm:$0xff]  ;;  %v3340_v35 = vld [vmem:[#allocation16 + $0x658] sm:$0xff]  ;;  %v7513_v20 = vcombine.low %v3364_v7, %v3368_v30 }
 0x8df   :  { %6786 = vmatprep.subr.bf16.mxu0 %v7426_v27  ;;  %v3336_v27 = vld [vmem:[#allocation16 + $0x638] sm:$0xff]  ;;  %v7479_v38 = vcombine.low %v3331_v25, %v3335_v26 }
 0x8e0   :  { %6623 = vmatpush1.bf16.msra.mxu1 %v7423_v32  ;;  %v7480_v32 = vcombine.high %v3331_v25, %v3335_v26  ;;  %v3344_v36 = vld [vmem:[#allocation16 + $0x678] sm:$0xff]  ;;  %v7481_v41 = vcombine.low %v3332_v37, %v3336_v27 }
 0x8e1   :  { %6787 = vmatpush1.bf16.msra.mxu0 %v7425_v2  ;;  %6624 = vmatprep.subr.bf16.mxu1 %v7432_v33  ;;  %v7482_v2 = vcombine.high %v3332_v37, %v3336_v27  ;;  %v3339_v33 = vld [vmem:[#allocation16 + $0x650] sm:$0xff]  ;;  %v7489_v5 = vcombine.low %v3340_v35, %v3344_v36  ;;  %v3372_v15 = vld [vmem:[#allocation16 + $0x758] sm:$0xff] }
 0x8e2   :  { %6788 = vmatprep.subr.bf16.mxu0 %v7434_v34  ;;  %v3343_v34 = vld [vmem:[#allocation16 + $0x670] sm:$0xff]  ;;  %v3376_v16 = vld [vmem:[#allocation16 + $0x778] sm:$0xff] }
 0x8e3   :  { %v7487_v8 = vcombine.low %v3339_v33, %v3343_v34  ;;  %v3380_v25 = vld [vmem:[#allocation16 + $0x798] sm:$0xff]  ;;  %v7521_v27 = vcombine.low %v3372_v15, %v3376_v16 }
 0x8e4   :  { %6625 = vmatpush1.bf16.msra.mxu1 %v7431_v42  ;;  %v7488_v42 = vcombine.high %v3339_v33, %v3343_v34  ;;  %v3384_v26 = vld [vmem:[#allocation16 + $0x7b8] sm:$0xff] }
 0x8e5   :  { %6789 = vmatpush1.bf16.msra.mxu0 %v7433_v17  ;;  %6626 = vmatprep.subr.bf16.mxu1 %v7440_v47  ;;  %v7490_v17 = vcombine.high %v3340_v35, %v3344_v36  ;;  %v3347_v47 = vld [vmem:[#allocation16 + $0x690] sm:$0xff]  ;;  %v3388_v33 = vld [vmem:[#allocation16 + $0x7d8] sm:$0xff]  ;;  %v7529_v36 = vcombine.low %v3380_v25, %v3384_v26 }
 0x8e6   :  { %6790 = vmatprep.subr.bf16.mxu0 %v7442_v48  ;;  %v3351_v48 = vld [vmem:[#allocation16 + $0x6b0] sm:$0xff]  ;;  %v3392_v34 = vld [vmem:[#allocation16 + $0x7f8] sm:$0xff] }
 0x8e7   :  { %v7495_v55 = vcombine.low %v3347_v47, %v3351_v48 }
 0x8e8   :  { %6627 = vmatpush1.bf16.msra.mxu1 %v7439_v24  ;;  %v7496_v24 = vcombine.high %v3347_v47, %v3351_v48  ;;  %v3396_v47 = vld [vmem:[#allocation16 + $0x818] sm:$0xff] }
 0x8e9   :  { %6791 = vmatpush1.bf16.msra.mxu0 %v7441_v51  ;;  %6628 = vmatprep.subr.bf16.mxu1 %v7448_v52  ;;  %v7498_v51 = vcombine.high %v3348_v49, %v3352_v10  ;;  %v3355_v52 = vld [vmem:[#allocation16 + $0x6d0] sm:$0xff]  ;;  %v3400_v48 = vld [vmem:[#allocation16 + $0x838] sm:$0xff]  ;;  %v7537_v10 = vcombine.low %v3388_v33, %v3392_v34 }
 0x8ea   :  { %6792 = vmatprep.subr.bf16.mxu0 %v7450_v18  ;;  %v3359_v18 = vld [vmem:[#allocation16 + $0x6f0] sm:$0xff] }
 0x8eb   :  { %v7503_v61 = vcombine.low %v3355_v52, %v3359_v18 }
 0x8ec   :  { %6629 = vmatpush1.bf16.msra.mxu1 %v7447_v58  ;;  %v7504_v58 = vcombine.high %v3355_v52, %v3359_v18  ;;  %v3404_v18 = vld [vmem:[#allocation16 + $0x858] sm:$0xff] }
 0x8ed   :  { %6793 = vmatpush1.bf16.msra.mxu0 %v7449_v59  ;;  %6630 = vmatprep.subr.bf16.mxu1 %v7456_v62  ;;  %v7506_v59 = vcombine.high %v3356_v53, %v3360_v54  ;;  %v3363_v62 = vld [vmem:[#allocation16 + $0x710] sm:$0xff]  ;;  %v3408_v53 = vld [vmem:[#allocation16 + $0x878] sm:$0xff]  ;;  %v7545_v54 = vcombine.low %v3396_v47, %v3400_v48 }
 0x8ee   :  { %6794 = vmatprep.subr.bf16.mxu0 %v7458_v6  ;;  %v3367_v6 = vld [vmem:[#allocation16 + $0x730] sm:$0xff] }
 0x8ef   :  { %v7511_v19 = vcombine.low %v3363_v62, %v3367_v6 }
 0x8f0   :  { %6631 = vmatpush1.bf16.msra.mxu1 %v7455_v0  ;;  %v7512_v0 = vcombine.high %v3363_v62, %v3367_v6  ;;  %v3412_v62 = vld [vmem:[#allocation16 + $0x898] sm:$0xff] }
 0x8f1   :  { %6795 = vmatpush1.bf16.msra.mxu0 %v7457_v39  ;;  %6632 = vmatprep.subr.bf16.mxu1 %v7464_v12  ;;  %v7514_v39 = vcombine.high %v3364_v7, %v3368_v30  ;;  %v3371_v12 = vld [vmem:[#allocation16 + $0x750] sm:$0xff]  ;;  %v3416_v6 = vld [vmem:[#allocation16 + $0x8b8] sm:$0xff]  ;;  %v7553_v30 = vcombine.low %v3404_v18, %v3408_v53 }
 0x8f2   :  { %6796 = vmatprep.subr.bf16.mxu0 %v7466_v14  ;;  %v3375_v14 = vld [vmem:[#allocation16 + $0x770] sm:$0xff] }
 0x8f3   :  { %v7519_v37 = vcombine.low %v3371_v12, %v3375_v14 }
 0x8f4   :  { %6633 = vmatpush1.bf16.msra.mxu1 %v7463_v21  ;;  %v7520_v21 = vcombine.high %v3371_v12, %v3375_v14  ;;  %v3420_v12 = vld [vmem:[#allocation16 + $0x8d8] sm:$0xff] }
 0x8f5   :  { %6797 = vmatpush1.bf16.msra.mxu0 %v7465_v22  ;;  %6634 = vmatprep.subr.bf16.mxu1 %v7472_v43  ;;  %v7522_v22 = vcombine.high %v3372_v15, %v3376_v16  ;;  %v3379_v43 = vld [vmem:[#allocation16 + $0x790] sm:$0xff]  ;;  %v3424_v14 = vld [vmem:[#allocation16 + $0x8f8] sm:$0xff] }
 0x8f6   :  { %6798 = vmatprep.subr.bf16.mxu0 %v7474_v23  ;;  %v3383_v23 = vld [vmem:[#allocation16 + $0x7b0] sm:$0xff] }
 0x8f7   :  { %v7527_v35 = vcombine.low %v3379_v43, %v3383_v23 }
 0x8f8   :  { %6635 = vmatpush1.bf16.msra.mxu1 %v7471_v28  ;;  %v7528_v28 = vcombine.high %v3379_v43, %v3383_v23  ;;  %v3432_v43 = vld [vmem:[#allocation16 + $0x938] sm:$0xff]  ;;  %v7569_v23 = vcombine.low %v3420_v12, %v3424_v14 }
 0x8f9   :  { %6799 = vmatpush1.bf16.msra.mxu0 %v7473_v31  ;;  %6636 = vmatprep.subr.bf16.mxu1 %v7480_v32  ;;  %v7530_v31 = vcombine.high %v3380_v25, %v3384_v26  ;;  %v3387_v32 = vld [vmem:[#allocation16 + $0x7d0] sm:$0xff] }
 0x8fa   :  { %6800 = vmatprep.subr.bf16.mxu0 %v7482_v2  ;;  %v3391_v2 = vld [vmem:[#allocation16 + $0x7f0] sm:$0xff] }
 0x8fb   :  { %v7535_v49 = vcombine.low %v3387_v32, %v3391_v2 }
 0x8fc   :  { %6637 = vmatpush1.bf16.msra.mxu1 %v7479_v38  ;;  %v7536_v38 = vcombine.high %v3387_v32, %v3391_v2 }
 0x8fd   :  { %6801 = vmatpush1.bf16.msra.mxu0 %v7481_v41  ;;  %6638 = vmatprep.subr.bf16.mxu1 %v7488_v42  ;;  %v7538_v41 = vcombine.high %v3388_v33, %v3392_v34  ;;  %v3395_v42 = vld [vmem:[#allocation16 + $0x810] sm:$0xff] }
 0x8fe   :  { %6802 = vmatprep.subr.bf16.mxu0 %v7490_v17  ;;  %v3399_v17 = vld [vmem:[#allocation16 + $0x830] sm:$0xff] }
 0x8ff   :  { %v7543_v52 = vcombine.low %v3395_v42, %v3399_v17 }
 0x900   :  { %6639 = vmatpush1.bf16.msra.mxu1 %v7487_v8  ;;  %v7544_v8 = vcombine.high %v3395_v42, %v3399_v17 }
 0x901   :  { %6803 = vmatpush1.bf16.msra.mxu0 %v7489_v5  ;;  %6640 = vmatprep.subr.bf16.mxu1 %v7496_v24  ;;  %v7546_v5 = vcombine.high %v3396_v47, %v3400_v48  ;;  %v3403_v24 = vld [vmem:[#allocation16 + $0x850] sm:$0xff] }
 0x902   :  { %6804 = vmatprep.subr.bf16.mxu0 %v7498_v51  ;;  %v3407_v51 = vld [vmem:[#allocation16 + $0x870] sm:$0xff] }
 0x903   :  { %v7551_v7 = vcombine.low %v3403_v24, %v3407_v51 }
 0x904   :  { %6641 = vmatpush1.bf16.msra.mxu1 %v7495_v55  ;;  %v7552_v55 = vcombine.high %v3403_v24, %v3407_v51 }
 0x905   :  { %6805 = vmatpush1.bf16.msra.mxu0 %v7497_v57  ;;  %6642 = vmatprep.subr.bf16.mxu1 %v7504_v58  ;;  %v3411_v57 = vld [vmem:[#allocation16 + $0x890] sm:$0xff] }
 0x906   :  { %6806 = vmatprep.subr.bf16.mxu0 %v7506_v59  ;;  %v3415_v58 = vld [vmem:[#allocation16 + $0x8b0] sm:$0xff]  ;;  %v7554_v59 = vcombine.high %v3404_v18, %v3408_v53 }
 0x907   :  { %v7559_v15 = vcombine.low %v3411_v57, %v3415_v58  ;;  %v3459_v53 = vld [vmem:[#allocation16 + $0xa10] sm:$0xff] }
 0x908   :  { %6643 = vmatpush1.bf16.msra.mxu1 %v7503_v61  ;;  %v7560_v61 = vcombine.high %v3411_v57, %v3415_v58  ;;  %v3464_v57 = vld [vmem:[#allocation16 + $0xa38] sm:$0xff] }
 0x909   :  { %6807 = vmatpush1.bf16.msra.mxu0 %v7505_v11  ;;  %6644 = vmatprep.subr.bf16.mxu1 %v7512_v0  ;;  %v7562_v11 = vcombine.high %v3412_v62, %v3416_v6  ;;  %v3419_v0 = vld [vmem:[#allocation16 + $0x8d0] sm:$0xff] }
 0x90a   :  { %6808 = vmatprep.subr.bf16.mxu0 %v7514_v39  ;;  %v3423_v39 = vld [vmem:[#allocation16 + $0x8f0] sm:$0xff] }
 0x90b   :  { %v7568_v16 = vcombine.high %v3419_v0, %v3423_v39 }
 0x90c   :  { %6645 = vmatpush1.bf16.msra.mxu1 %v7511_v19  ;;  %v7570_v19 = vcombine.high %v3420_v12, %v3424_v14 }
 0x90d   :  { %6809 = vmatpush1.bf16.msra.mxu0 %v7513_v20  ;;  %6646 = vmatprep.subr.bf16.mxu1 %v7520_v21  ;;  %v3427_v20 = vld [vmem:[#allocation16 + $0x910] sm:$0xff] }
 0x90e   :  { %6810 = vmatprep.subr.bf16.mxu0 %v7522_v22  ;;  %v3431_v21 = vld [vmem:[#allocation16 + $0x930] sm:$0xff]  ;;  %v3428_v22 = vld [vmem:[#allocation16 + $0x918] sm:$0xff] }
 0x90f   :  { %v7576_v25 = vcombine.high %v3427_v20, %v3431_v21  ;;  %v7578_v26 = vcombine.high %v3428_v22, %v3432_v43  ;;  %v7575_v32 = vcombine.low %v3427_v20, %v3431_v21  ;;  %v7577_v2 = vcombine.low %v3428_v22, %v3432_v43 }
 0x910   :  { %6647 = vmatpush1.bf16.msra.mxu1 %v7519_v37  ;;  %v3435_v37 = vld [vmem:[#allocation16 + $0x950] sm:$0xff] }
 0x911   :  { %6811 = vmatpush1.bf16.msra.mxu0 %v7521_v27  ;;  %6648 = vmatprep.subr.bf16.mxu1 %v7528_v28  ;;  %v3439_v27 = vld [vmem:[#allocation16 + $0x970] sm:$0xff]  ;;  %v3436_v28 = vld [vmem:[#allocation16 + $0x958] sm:$0xff] }
 0x912   :  { %6812 = vmatprep.subr.bf16.mxu0 %v7530_v31  ;;  %v3440_v31 = vld [vmem:[#allocation16 + $0x978] sm:$0xff]  ;;  %v7584_v33 = vcombine.high %v3435_v37, %v3439_v27  ;;  %v7583_v42 = vcombine.low %v3435_v37, %v3439_v27 }
 0x913   :  { %v7586_v34 = vcombine.high %v3436_v28, %v3440_v31  ;;  %v7585_v17 = vcombine.low %v3436_v28, %v3440_v31 }
 0x914   :  { %6649 = vmatpush1.bf16.msra.mxu1 %v7527_v35  ;;  %v3443_v35 = vld [vmem:[#allocation16 + $0x990] sm:$0xff] }
 0x915   :  { %6813 = vmatpush1.bf16.msra.mxu0 %v7529_v36  ;;  %6650 = vmatprep.subr.bf16.mxu1 %v7536_v38  ;;  %v3447_v36 = vld [vmem:[#allocation16 + $0x9b0] sm:$0xff]  ;;  %v3444_v38 = vld [vmem:[#allocation16 + $0x998] sm:$0xff] }
 0x916   :  { %6814 = vmatprep.subr.bf16.mxu0 %v7538_v41  ;;  %v3448_v41 = vld [vmem:[#allocation16 + $0x9b8] sm:$0xff]  ;;  %v7592_v47 = vcombine.high %v3443_v35, %v3447_v36  ;;  %v7591_v24 = vcombine.low %v3443_v35, %v3447_v36 }
 0x917   :  { %v7594_v48 = vcombine.high %v3444_v38, %v3448_v41  ;;  %v7593_v51 = vcombine.low %v3444_v38, %v3448_v41 }
 0x918   :  { %6651 = vmatpush1.bf16.msra.mxu1 %v7535_v49  ;;  %v3451_v49 = vld [vmem:[#allocation16 + $0x9d0] sm:$0xff] }
 0x919   :  { %6815 = vmatpush1.bf16.msra.mxu0 %v7537_v10  ;;  %6661 = vmatprep.subr.bf16.mxu1 %v7544_v8  ;;  %v3455_v10 = vld [vmem:[#allocation16 + $0x9f0] sm:$0xff]  ;;  %v3452_v8 = vld [vmem:[#allocation16 + $0x9d8] sm:$0xff] }
 0x91a   :  { %6825 = vmatprep.subr.bf16.mxu0 %v7546_v5  ;;  %v3456_v5 = vld [vmem:[#allocation16 + $0x9f8] sm:$0xff]  ;;  %v7599_v58 = vcombine.low %v3451_v49, %v3455_v10 }
 0x91b   :  { %6653 = vmatmul.mubr.bf16.vlgmr.msra.gmra.mrb[24].mxu1 %v9122_v46  ;;  %v7602_v18 = vcombine.high %v3452_v8, %v3456_v5 }
 0x91c   :  { %6817 = vmatmul.mubr.bf16.vlgmr.msra.gmra.mrb[28].mxu0 %v9122_v46  ;;  %6662 = vmatpush1.bf16.msra.mxu1 %v7543_v52  ;;  %v7561_v46 = vcombine.low %v3412_v62, %v3416_v6  ;;  %v7600_v52 = vcombine.high %v3451_v49, %v3455_v10 }
 0x91d   :  { %6693 = vmatprep.mubr.bf16.mxu1 %v9152_v50  ;;  %6826 = vmatpush1.bf16.msra.mxu0 %v7545_v54  ;;  %v3463_v54 = vld [vmem:[#allocation16 + $0xa30] sm:$0xff] }
 0x91e   :  { %6857 = vmatprep.mubr.bf16.mxu0 %v9152_v50  ;;  %6663 = vmatprep.subr.bf16.mxu1 %v7552_v55  ;;  %v7567_v50 = vcombine.low %v3419_v0, %v3423_v39  ;;  %v3460_v55 = vld [vmem:[#allocation16 + $0xa18] sm:$0xff]  ;;  %v7608_v62 = vcombine.high %v3459_v53, %v3463_v54  ;;  %v7607_v0 = vcombine.low %v3459_v53, %v3463_v54 }
 0x91f   :  { %6827 = vmatprep.subr.bf16.mxu0 %v7554_v59  ;;  %v7601_v59 = vcombine.low %v3452_v8, %v3456_v5  ;;  %v7610_v6 = vcombine.high %v3460_v55, %v3464_v57  ;;  %v7609_v39 = vcombine.low %v3460_v55, %v3464_v57 }
 0x920   :  { %6664 = vmatpush1.bf16.msra.mxu1 %v7551_v7  ;;  %v3467_v7 = vld [vmem:[#allocation16 + $0xa50] sm:$0xff] }
 0x921   :  { %6828 = vmatpush1.bf16.msra.mxu0 %v7553_v30  ;;  %6665 = vmatprep.subr.bf16.mxu1 %v7560_v61  ;;  %v3471_v30 = vld [vmem:[#allocation16 + $0xa70] sm:$0xff]  ;;  %v3468_v61 = vld [vmem:[#allocation16 + $0xa58] sm:$0xff] }
 0x922   :  { %6829 = vmatprep.subr.bf16.mxu0 %v7562_v11  ;;  %v3472_v11 = vld [vmem:[#allocation16 + $0xa78] sm:$0xff]  ;;  %v7616_v12 = vcombine.high %v3467_v7, %v3471_v30  ;;  %v7615_v20 = vcombine.low %v3467_v7, %v3471_v30 }
 0x923   :  { %v7618_v14 = vcombine.high %v3468_v61, %v3472_v11  ;;  %v7617_v21 = vcombine.low %v3468_v61, %v3472_v11 }
 0x924   :  { %6666 = vmatpush1.bf16.msra.mxu1 %v7559_v15  ;;  %v3475_v15 = vld [vmem:[#allocation16 + $0xa90] sm:$0xff] }
 0x925   :  { %6830 = vmatpush1.bf16.msra.mxu0 %v7561_v46  ;;  %6667 = vmatprep.subr.bf16.mxu1 %v7568_v16  ;;  %v3479_v46 = vld [vmem:[#allocation16 + $0xab0] sm:$0xff]  ;;  %v3476_v16 = vld [vmem:[#allocation16 + $0xa98] sm:$0xff] }
 0x926   :  { %6831 = vmatprep.subr.bf16.mxu0 %v7570_v19  ;;  %v3480_v19 = vld [vmem:[#allocation16 + $0xab8] sm:$0xff]  ;;  %v7624_v22 = vcombine.high %v3475_v15, %v3479_v46  ;;  %v7623_v37 = vcombine.low %v3475_v15, %v3479_v46 }
 0x927   :  { %v7626_v43 = vcombine.high %v3476_v16, %v3480_v19  ;;  %v7625_v27 = vcombine.low %v3476_v16, %v3480_v19 }
 0x928   :  { %6668 = vmatpush1.bf16.msra.mxu1 %v7567_v50  ;;  %v3483_v50 = vld [vmem:[#allocation16 + $0xad0] sm:$0xff] }
 0x929   :  { %6832 = vmatpush1.bf16.msra.mxu0 %v7569_v23  ;;  %6669 = vmatprep.subr.bf16.mxu1 %v7576_v25  ;;  %v3487_v23 = vld [vmem:[#allocation16 + $0xaf0] sm:$0xff]  ;;  %v3484_v25 = vld [vmem:[#allocation16 + $0xad8] sm:$0xff] }
 0x92a   :  { %6833 = vmatprep.subr.bf16.mxu0 %v7578_v26  ;;  %v3488_v26 = vld [vmem:[#allocation16 + $0xaf8] sm:$0xff]  ;;  %v7632_v28 = vcombine.high %v3483_v50, %v3487_v23  ;;  %v7631_v35 = vcombine.low %v3483_v50, %v3487_v23 }
 0x92b   :  { %v7634_v31 = vcombine.high %v3484_v25, %v3488_v26  ;;  %v7633_v36 = vcombine.low %v3484_v25, %v3488_v26  ;;  %v3536_v50 = vld [vmem:[#allocation16 + $0xc78] sm:$0xff]  ;;  %v3539_v26 = vld [vmem:[#allocation16 + $0xc90] sm:$0xff] }
 0x92c   :  { %6670 = vmatpush1.bf16.msra.mxu1 %v7575_v32  ;;  %v3491_v32 = vld [vmem:[#allocation16 + $0xb10] sm:$0xff] }
 0x92d   :  { %6834 = vmatpush1.bf16.msra.mxu0 %v7577_v2  ;;  %6671 = vmatprep.subr.bf16.mxu1 %v7584_v33  ;;  %v3495_v2 = vld [vmem:[#allocation16 + $0xb30] sm:$0xff]  ;;  %v3492_v33 = vld [vmem:[#allocation16 + $0xb18] sm:$0xff] }
 0x92e   :  { %6835 = vmatprep.subr.bf16.mxu0 %v7586_v34  ;;  %v3496_v34 = vld [vmem:[#allocation16 + $0xb38] sm:$0xff]  ;;  %v7640_v38 = vcombine.high %v3491_v32, %v3495_v2  ;;  %v7639_v49 = vcombine.low %v3491_v32, %v3495_v2 }
 0x92f   :  { %v7642_v41 = vcombine.high %v3492_v33, %v3496_v34  ;;  %v7641_v10 = vcombine.low %v3492_v33, %v3496_v34 }
 0x930   :  { %6672 = vmatpush1.bf16.msra.mxu1 %v7583_v42  ;;  %v3499_v42 = vld [vmem:[#allocation16 + $0xb50] sm:$0xff] }
 0x931   :  { %6836 = vmatpush1.bf16.msra.mxu0 %v7585_v17  ;;  %6673 = vmatprep.subr.bf16.mxu1 %v7592_v47  ;;  %v3503_v17 = vld [vmem:[#allocation16 + $0xb70] sm:$0xff]  ;;  %v3500_v47 = vld [vmem:[#allocation16 + $0xb58] sm:$0xff] }
 0x932   :  { %6837 = vmatprep.subr.bf16.mxu0 %v7594_v48  ;;  %v3504_v48 = vld [vmem:[#allocation16 + $0xb78] sm:$0xff]  ;;  %v7648_v8 = vcombine.high %v3499_v42, %v3503_v17  ;;  %v7647_v53 = vcombine.low %v3499_v42, %v3503_v17 }
 0x933   :  { %v7650_v5 = vcombine.high %v3500_v47, %v3504_v48  ;;  %v7649_v54 = vcombine.low %v3500_v47, %v3504_v48  ;;  %v3555_v48 = vld [vmem:[#allocation16 + $0xd10] sm:$0xff] }
 0x934   :  { %6674 = vmatpush1.bf16.msra.mxu1 %v7591_v24  ;;  %v3507_v24 = vld [vmem:[#allocation16 + $0xb90] sm:$0xff] }
 0x935   :  { %6838 = vmatpush1.bf16.msra.mxu0 %v7593_v51  ;;  %6675 = vmatprep.subr.bf16.mxu1 %v7600_v52  ;;  %v3511_v51 = vld [vmem:[#allocation16 + $0xbb0] sm:$0xff]  ;;  %v3508_v52 = vld [vmem:[#allocation16 + $0xb98] sm:$0xff] }
 0x936   :  { %6839 = vmatprep.subr.bf16.mxu0 %v7602_v18  ;;  %v3512_v18 = vld [vmem:[#allocation16 + $0xbb8] sm:$0xff]  ;;  %v7656_v55 = vcombine.high %v3507_v24, %v3511_v51  ;;  %v7655_v7 = vcombine.low %v3507_v24, %v3511_v51 }
 0x937   :  { %v7658_v57 = vcombine.high %v3508_v52, %v3512_v18  ;;  %v7657_v30 = vcombine.low %v3508_v52, %v3512_v18  ;;  %v3563_v52 = vld [vmem:[#allocation16 + $0xd50] sm:$0xff] }
 0x938   :  { %6676 = vmatpush1.bf16.msra.mxu1 %v7599_v58  ;;  %v3515_v58 = vld [vmem:[#allocation16 + $0xbd0] sm:$0xff] }
 0x939   :  { %6840 = vmatpush1.bf16.msra.mxu0 %v7601_v59  ;;  %6677 = vmatprep.subr.bf16.mxu1 %v7608_v62  ;;  %v3519_v59 = vld [vmem:[#allocation16 + $0xbf0] sm:$0xff]  ;;  %v3516_v62 = vld [vmem:[#allocation16 + $0xbd8] sm:$0xff] }
 0x93a   :  { %6841 = vmatprep.subr.bf16.mxu0 %v7610_v6  ;;  %v3520_v6 = vld [vmem:[#allocation16 + $0xbf8] sm:$0xff]  ;;  %v7664_v61 = vcombine.high %v3515_v58, %v3519_v59  ;;  %v7663_v15 = vcombine.low %v3515_v58, %v3519_v59  ;;  %v3567_v18 = vld [vmem:[#allocation16 + $0xd70] sm:$0xff] }
 0x93b   :  { %v7666_v11 = vcombine.high %v3516_v62, %v3520_v6  ;;  %v7665_v46 = vcombine.low %v3516_v62, %v3520_v6  ;;  %v7712_v59 = vcombine.high %v3563_v52, %v3567_v18  ;;  %v3571_v6 = vld [vmem:[#allocation16 + $0xd90] sm:$0xff] }
 0x93c   :  { %6678 = vmatpush1.bf16.msra.mxu1 %v7607_v0  ;;  %v3523_v0 = vld [vmem:[#allocation16 + $0xc10] sm:$0xff] }
 0x93d   :  { %6842 = vmatpush1.bf16.msra.mxu0 %v7609_v39  ;;  %6679 = vmatprep.subr.bf16.mxu1 %v7616_v12  ;;  %v3527_v39 = vld [vmem:[#allocation16 + $0xc30] sm:$0xff]  ;;  %v3524_v12 = vld [vmem:[#allocation16 + $0xc18] sm:$0xff] }
 0x93e   :  { %6843 = vmatprep.subr.bf16.mxu0 %v7618_v14  ;;  %v3528_v14 = vld [vmem:[#allocation16 + $0xc38] sm:$0xff]  ;;  %v7672_v16 = vcombine.high %v3523_v0, %v3527_v39 }
 0x93f   :  { %v7674_v19 = vcombine.high %v3524_v12, %v3528_v14  ;;  %v7673_v23 = vcombine.low %v3524_v12, %v3528_v14  ;;  %v7711_v14 = vcombine.low %v3563_v52, %v3567_v18  ;;  %v3607_v52 = vld [vmem:[#allocation16 + $0xeb0] sm:$0xff]  ;;  %v3604_v18 = vld [vmem:[#allocation16 + $0xe98] sm:$0xff] }
 0x940   :  { %6680 = vmatpush1.bf16.msra.mxu1 %v7615_v20  ;;  %v3531_v20 = vld [vmem:[#allocation16 + $0xc50] sm:$0xff] }
 0x941   :  { %6844 = vmatpush1.bf16.msra.mxu0 %v7617_v21  ;;  %6681 = vmatprep.subr.bf16.mxu1 %v7624_v22  ;;  %v3535_v21 = vld [vmem:[#allocation16 + $0xc70] sm:$0xff]  ;;  %v7671_v22 = vcombine.low %v3523_v0, %v3527_v39  ;;  %v3576_v0 = vld [vmem:[#allocation16 + $0xdb8] sm:$0xff] }
 0x942   :  { %6845 = vmatprep.subr.bf16.mxu0 %v7626_v43  ;;  %v3532_v43 = vld [vmem:[#allocation16 + $0xc58] sm:$0xff]  ;;  %v7680_v25 = vcombine.high %v3531_v20, %v3535_v21  ;;  %v7679_v32 = vcombine.low %v3531_v20, %v3535_v21  ;;  %v3579_v20 = vld [vmem:[#allocation16 + $0xdd0] sm:$0xff] }
 0x943   :  { %v7681_v2 = vcombine.low %v3532_v43, %v3536_v50 }
 0x944   :  { %6682 = vmatpush1.bf16.msra.mxu1 %v7623_v37  ;;  %v3543_v37 = vld [vmem:[#allocation16 + $0xcb0] sm:$0xff] }
 0x945   :  { %6846 = vmatpush1.bf16.msra.mxu0 %v7625_v27  ;;  %6683 = vmatprep.subr.bf16.mxu1 %v7632_v28  ;;  %v7682_v27 = vcombine.high %v3532_v43, %v3536_v50  ;;  %v3540_v28 = vld [vmem:[#allocation16 + $0xc98] sm:$0xff]  ;;  %v7688_v33 = vcombine.high %v3539_v26, %v3543_v37  ;;  %v7687_v42 = vcombine.low %v3539_v26, %v3543_v37 }
 0x946   :  { %6847 = vmatprep.subr.bf16.mxu0 %v7634_v31  ;;  %v3544_v31 = vld [vmem:[#allocation16 + $0xcb8] sm:$0xff] }
 0x947   :  { %v7690_v34 = vcombine.high %v3540_v28, %v3544_v31 }
 0x948   :  { %6684 = vmatpush1.bf16.msra.mxu1 %v7631_v35  ;;  %v3547_v35 = vld [vmem:[#allocation16 + $0xcd0] sm:$0xff] }
 0x949   :  { %6848 = vmatpush1.bf16.msra.mxu0 %v7633_v36  ;;  %6685 = vmatprep.subr.bf16.mxu1 %v7640_v38  ;;  %v3551_v36 = vld [vmem:[#allocation16 + $0xcf0] sm:$0xff]  ;;  %v3548_v38 = vld [vmem:[#allocation16 + $0xcd8] sm:$0xff] }
 0x94a   :  { %6849 = vmatprep.subr.bf16.mxu0 %v7642_v41  ;;  %v3552_v41 = vld [vmem:[#allocation16 + $0xcf8] sm:$0xff]  ;;  %v7696_v17 = vcombine.high %v3547_v35, %v3551_v36 }
 0x94b   :  { %v7698_v47 = vcombine.high %v3548_v38, %v3552_v41 }
 0x94c   :  { %6686 = vmatpush1.bf16.msra.mxu1 %v7639_v49  ;;  %v3559_v49 = vld [vmem:[#allocation16 + $0xd30] sm:$0xff] }
 0x94d   :  { %6850 = vmatpush1.bf16.msra.mxu0 %v7641_v10  ;;  %6687 = vmatprep.subr.bf16.mxu1 %v7648_v8  ;;  %v3556_v10 = vld [vmem:[#allocation16 + $0xd18] sm:$0xff]  ;;  %v7704_v24 = vcombine.high %v3555_v48, %v3559_v49 }
 0x94e   :  { %6851 = vmatprep.subr.bf16.mxu0 %v7650_v5  ;;  %v3560_v8 = vld [vmem:[#allocation16 + $0xd38] sm:$0xff]  ;;  %v7697_v5 = vcombine.low %v3548_v38, %v3552_v41 }
 0x94f   :  { %v7706_v51 = vcombine.high %v3556_v10, %v3560_v8  ;;  %v7705_v58 = vcombine.low %v3556_v10, %v3560_v8  ;;  %v3592_v38 = vld [vmem:[#allocation16 + $0xe38] sm:$0xff] }
 0x950   :  { %6688 = vmatpush1.bf16.msra.mxu1 %v7647_v53  ;;  %v3564_v53 = vld [vmem:[#allocation16 + $0xd58] sm:$0xff] }
 0x951   :  { %6852 = vmatpush1.bf16.msra.mxu0 %v7649_v54  ;;  %6689 = vmatprep.subr.bf16.mxu1 %v7656_v55  ;;  %v3568_v54 = vld [vmem:[#allocation16 + $0xd78] sm:$0xff]  ;;  %v7703_v55 = vcombine.low %v3555_v48, %v3559_v49  ;;  %v3599_v48 = vld [vmem:[#allocation16 + $0xe70] sm:$0xff] }
 0x952   :  { %6853 = vmatprep.subr.bf16.mxu0 %v7658_v57  ;;  %v9190_v57 = vld [vmem:[#allocation28] sm:$0xff]  ;;  %v7714_v62 = vcombine.high %v3564_v53, %v3568_v54 }
 0x953   :  { %v3658_v39 = vrot.slane %v9190_v57, %v9030_v3  ;;  %v3666_v12 = vrot.slane %v9190_v57, %v9033_v4  ;;  %v3584_v3 = vld [vmem:[#allocation16 + $0xdf8] sm:$0xff] }
 0x954   :  { %6690 = vmatpush1.bf16.msra.mxu1 %v7655_v7  ;;  %v3575_v7 = vld [vmem:[#allocation16 + $0xdb0] sm:$0xff]  ;;  %v3596_v49 = vld [vmem:[#allocation16 + $0xe58] sm:$0xff] }
 0x955   :  { %6854 = vmatpush1.bf16.msra.mxu0 %v7657_v30  ;;  %6691 = vmatprep.subr.bf16.mxu1 %v7664_v61  ;;  %v3654_v30 = vrot.slane %v9190_v57, %v9025_v1  ;;  %v3662_v61 = vrot.slane %v9190_v57, %v9056_v13  ;;  %v3583_v13 = vld [vmem:[#allocation16 + $0xdf0] sm:$0xff]  ;;  %v3600_v10 = vld [vmem:[#allocation16 + $0xe78] sm:$0xff] }
 0x956   :  { %6855 = vmatprep.subr.bf16.mxu0 %v7666_v11  ;;  %v3572_v11 = vld [vmem:[#allocation16 + $0xd98] sm:$0xff]  ;;  %v7727_v41 = vcombine.low %v3579_v20, %v3583_v13 }
 0x957   :  { %v7722_v1 = vcombine.high %v3572_v11, %v3576_v0 }
 0x958   :  { %6692 = vmatpush1.bf16.msra.mxu1 %v7663_v15  ;;  %v7713_v15 = vcombine.low %v3564_v53, %v3568_v54  ;;  %v3608_v53 = vld [vmem:[#allocation16 + $0xeb8] sm:$0xff] }
 0x959   :  { %6856 = vmatpush1.bf16.msra.mxu0 %v7665_v46  ;;  %6702 = vmatprep.subr.bf16.mxu1 %v7672_v16  ;;  %v7720_v46 = vcombine.high %v3571_v6, %v3575_v7 }
 0x95a   :  { %6866 = vmatprep.subr.bf16.mxu0 %v7674_v19 }
 0x95b   :  { %6694 = vmatmul.mubr.bf16.vlgmr.msra.gmra.mrb[24].mxu1 %v9154_v60 }
 0x95c   :  { %6858 = vmatmul.mubr.bf16.vlgmr.msra.gmra.mrb[28].mxu0 %v9154_v60  ;;  %6703 = vmatpush1.bf16.msra.mxu1 %v7671_v22  ;;  %v7689_v60 = vcombine.low %v3540_v28, %v3544_v31 }
 0x95d   :  { %6734 = vmatprep.mubr.bf16.mxu1 %v9158_v56  ;;  %6867 = vmatpush1.bf16.msra.mxu0 %v7673_v23  ;;  %v3580_v23 = vld [vmem:[#allocation16 + $0xdd8] sm:$0xff] }
 0x95e   :  { %6898 = vmatprep.mubr.bf16.mxu0 %v9158_v56  ;;  %6704 = vmatprep.subr.bf16.mxu1 %v7680_v25  ;;  %v7695_v56 = vcombine.low %v3547_v35, %v3551_v36  ;;  %v3591_v35 = vld [vmem:[#allocation16 + $0xe30] sm:$0xff]  ;;  %v3588_v36 = vld [vmem:[#allocation16 + $0xe18] sm:$0xff] }
 0x95f   :  { %6868 = vmatprep.subr.bf16.mxu0 %v7682_v27  ;;  %v7719_v27 = vcombine.low %v3571_v6, %v3575_v7  ;;  %v3615_v6 = vld [vmem:[#allocation16 + $0xef0] sm:$0xff]  ;;  %v3612_v7 = vld [vmem:[#allocation16 + $0xed8] sm:$0xff] }
 0x960   :  { %6705 = vmatpush1.bf16.msra.mxu1 %v7679_v32  ;;  %v7721_v32 = vcombine.low %v3572_v11, %v3576_v0  ;;  %v7753_v11 = vcombine.low %v3604_v18, %v3608_v53 }
 0x961   :  { %6869 = vmatpush1.bf16.msra.mxu0 %v7681_v2  ;;  %6706 = vmatprep.subr.bf16.mxu1 %v7688_v33  ;;  %v7728_v2 = vcombine.high %v3579_v20, %v3583_v13  ;;  %v7730_v33 = vcombine.high %v3580_v23, %v3584_v3  ;;  %v3627_v13 = vld [vmem:[#allocation16 + $0xf50] sm:$0xff] }
 0x962   :  { %6870 = vmatprep.subr.bf16.mxu0 %v7690_v34  ;;  %v3587_v34 = vld [vmem:[#allocation16 + $0xe10] sm:$0xff] }
 0x963   :  { %v7735_v8 = vcombine.low %v3587_v34, %v3591_v35 }
 0x964   :  { %6707 = vmatpush1.bf16.msra.mxu1 %v7687_v42  ;;  %v7729_v42 = vcombine.low %v3580_v23, %v3584_v3 }
 0x965   :  { %6871 = vmatpush1.bf16.msra.mxu0 %v7689_v60  ;;  %6708 = vmatprep.subr.bf16.mxu1 %v7696_v17  ;;  %v7736_v60 = vcombine.high %v3587_v34, %v3591_v35  ;;  %v7738_v17 = vcombine.high %v3588_v36, %v3592_v38  ;;  %v3647_v34 = vld [vmem:[#allocation16 + $0xff0] sm:$0xff]  ;;  %v3644_v35 = vld [vmem:[#allocation16 + $0xfd8] sm:$0xff] }
 0x966   :  { %6872 = vmatprep.subr.bf16.mxu0 %v7698_v47  ;;  %v3595_v47 = vld [vmem:[#allocation16 + $0xe50] sm:$0xff] }
 0x967   :  { %v7743_v54 = vcombine.low %v3595_v47, %v3599_v48 }
 0x968   :  { %6709 = vmatpush1.bf16.msra.mxu1 %v7695_v56  ;;  %v7737_v56 = vcombine.low %v3588_v36, %v3592_v38  ;;  %v3648_v36 = vld [vmem:[#allocation16 + $0xff8] sm:$0xff] }
 0x969   :  { %6873 = vmatpush1.bf16.msra.mxu0 %v7697_v5  ;;  %6710 = vmatprep.subr.bf16.mxu1 %v7704_v24  ;;  %v7744_v5 = vcombine.high %v3595_v47, %v3599_v48  ;;  %v7746_v24 = vcombine.high %v3596_v49, %v3600_v10  ;;  %v7793_v47 = vcombine.low %v3644_v35, %v3648_v36 }
 0x96a   :  { %6874 = vmatprep.subr.bf16.mxu0 %v7706_v51  ;;  %v3603_v51 = vld [vmem:[#allocation16 + $0xe90] sm:$0xff]  ;;  %v3670_v48 = vrot.slane %v9190_v57, %v1443_v40 }
 0x96c   :  { %6711 = vmatpush1.bf16.msra.mxu1 %v7703_v55  ;;  %v7745_v55 = vcombine.low %v3596_v49, %v3600_v10  ;;  %v3678_v49 = vrot.slane %v9190_v57, %v1451_v29  ;;  %v3674_v10 = vrot.slane %v9190_v57, %v1447_v9 }
 0x96d   :  { %6875 = vmatpush1.bf16.msra.mxu0 %v7705_v58  ;;  %6712 = vmatprep.subr.bf16.mxu1 %v7712_v59  ;;  %v7752_v58 = vcombine.high %v3603_v51, %v3607_v52  ;;  %v7754_v59 = vcombine.high %v3604_v18, %v3608_v53 }
 0x96e   :  { %v6408_v16 = vpop.f32.mrb[20].mxu1  ;;  %v6572_v19 = vpop.f32.mrb[24].mxu0  ;;  %6876 = vmatprep.subr.bf16.mxu0 %v7714_v62  ;;  %v3611_v62 = vld [vmem:[#allocation16 + $0xed0] sm:$0xff] }
 0x96f   :  { %v7948_v21 = vadd.f32 %v6408_v16, %v3654_v30  ;;  %v7950_v22 = vadd.f32 %v6572_v19, %v3662_v61  ;;  %v6410_v43 = vpop.f32.mrb[21].mxu1  ;;  %v6574_v50 = vpop.f32.mrb[25].mxu0  ;;  %v3616_v30 = vld [vmem:[#allocation16 + $0xef8] sm:$0xff]  ;;  %v7751_v61 = vcombine.low %v3603_v51, %v3607_v52  ;;  %v7760_v0 = vcombine.high %v3611_v62, %v3615_v6 }
 0x970   :  { %v7949_v25 = vadd.f32 %v6410_v43, %v3658_v39  ;;  %v7951_v26 = vadd.f32 %v6574_v50, %v3666_v12  ;;  %v6412_v4 = vpop.f32.mrb[22].mxu1  ;;  %v6576_v37 = vpop.f32.mrb[26].mxu0  ;;  %6713 = vmatpush1.bf16.msra.mxu1 %v7711_v14  ;;  %v7762_v39 = vcombine.high %v3612_v7, %v3616_v30  ;;  %v3619_v12 = vld [vmem:[#allocation16 + $0xf10] sm:$0xff]  ;;  %v7759_v16 = vcombine.low %v3611_v62, %v3615_v6  ;;  %v3632_v43 = vld [vmem:[#allocation16 + $0xf78] sm:$0xff] }
 0x971   :  { %6907 = vst [vmem:[#allocation29] sm:$0xff] %v7948_v21  ;;  %6909 = vst [vmem:[#allocation29 + $0x10] sm:$0xff] %v7950_v22  ;;  %6877 = vmatpush1.bf16.msra.mxu0 %v7713_v15  ;;  %v6413_v28 = vpop.f32.mrb[23].mxu1  ;;  %v6577_v31 = vpop.f32.mrb[27].mxu0  ;;  %6714 = vmatprep.subr.bf16.mxu1 %v7720_v46  ;;  %v3623_v14 = vld [vmem:[#allocation16 + $0xf30] sm:$0xff]  ;;  %v3620_v15 = vld [vmem:[#allocation16 + $0xf18] sm:$0xff]  ;;  %v7761_v19 = vcombine.low %v3612_v7, %v3616_v30 }
 0x972   :  { %6908 = vst [vmem:[#allocation29 + $0x8] sm:$0xff] %v7949_v25  ;;  %6910 = vst [vmem:[#allocation29 + $0x18] sm:$0xff] %v7951_v26  ;;  %6878 = vmatprep.subr.bf16.mxu0 %v7722_v1  ;;  %v3624_v46 = vld [vmem:[#allocation16 + $0xf38] sm:$0xff]  ;;  %v7768_v1 = vcombine.high %v3619_v12, %v3623_v14  ;;  %v3631_v21 = vld [vmem:[#allocation16 + $0xf70] sm:$0xff]  ;;  %v7767_v50 = vcombine.low %v3619_v12, %v3623_v14 }
 0x973   :  { %v7770_v20 = vcombine.high %v3620_v15, %v3624_v46  ;;  %v3628_v22 = vld [vmem:[#allocation16 + $0xf58] sm:$0xff]  ;;  %v7769_v23 = vcombine.low %v3620_v15, %v3624_v46  ;;  %v7776_v3 = vcombine.high %v3627_v13, %v3631_v21  ;;  %v3635_v26 = vld [vmem:[#allocation16 + $0xf90] sm:$0xff]  ;;  %v7775_v28 = vcombine.low %v3627_v13, %v3631_v21 }
 0x974   :  { %6715 = vmatpush1.bf16.msra.mxu1 %v7719_v27  ;;  %v7778_v25 = vcombine.high %v3628_v22, %v3632_v43  ;;  %v3639_v4 = vld [vmem:[#allocation16 + $0xfb0] sm:$0xff]  ;;  %v3636_v37 = vld [vmem:[#allocation16 + $0xf98] sm:$0xff]  ;;  %v7777_v31 = vcombine.low %v3628_v22, %v3632_v43 }
 0x975   :  { %6879 = vmatpush1.bf16.msra.mxu0 %v7721_v32  ;;  %6716 = vmatprep.subr.bf16.mxu1 %v7728_v2  ;;  %v3640_v27 = vld [vmem:[#allocation16 + $0xfb8] sm:$0xff]  ;;  %v7784_v32 = vcombine.high %v3635_v26, %v3639_v4  ;;  %v7783_v38 = vcombine.low %v3635_v26, %v3639_v4 }
 0x976   :  { %6880 = vmatprep.subr.bf16.mxu0 %v7730_v33  ;;  %v7786_v2 = vcombine.high %v3636_v37, %v3640_v27  ;;  %v3643_v33 = vld [vmem:[#allocation16 + $0xfd0] sm:$0xff] }
 0x978   :  { %6717 = vmatpush1.bf16.msra.mxu1 %v7727_v41  ;;  %v7785_v41 = vcombine.low %v3636_v37, %v3640_v27 }
 0x979   :  { %6881 = vmatpush1.bf16.msra.mxu0 %v7729_v42  ;;  %6718 = vmatprep.subr.bf16.mxu1 %v7736_v60  ;;  %v7792_v42 = vcombine.high %v3643_v33, %v3647_v34  ;;  %v7794_v60 = vcombine.high %v3644_v35, %v3648_v36 }
 0x97a   :  { %6882 = vmatprep.subr.bf16.mxu0 %v7738_v17  ;;  %v7791_v17 = vcombine.low %v3643_v33, %v3647_v34 }
 0x97c   :  { %6719 = vmatpush1.bf16.msra.mxu1 %v7735_v8  ;;  %v3682_v8 = vrot.slane %v9190_v57, %v1455_v44 }
 0x97d   :  { %6883 = vmatpush1.bf16.msra.mxu0 %v7737_v56  ;;  %6720 = vmatprep.subr.bf16.mxu1 %v7744_v5 }
 0x97e   :  { %6884 = vmatprep.subr.bf16.mxu0 %v7746_v24 }
 0x980   :  { %6721 = vmatpush1.bf16.msra.mxu1 %v7743_v54 }
 0x981   :  { %6885 = vmatpush1.bf16.msra.mxu0 %v7745_v55  ;;  %6722 = vmatprep.subr.bf16.mxu1 %v7752_v58 }
 0x982   :  { %6886 = vmatprep.subr.bf16.mxu0 %v7754_v59 }
 0x984   :  { %6723 = vmatpush1.bf16.msra.mxu1 %v7751_v61 }
 0x985   :  { %6887 = vmatpush1.bf16.msra.mxu0 %v7753_v11  ;;  %6724 = vmatprep.subr.bf16.mxu1 %v7760_v0 }
 0x986   :  { %6888 = vmatprep.subr.bf16.mxu0 %v7762_v39 }
 0x988   :  { %6725 = vmatpush1.bf16.msra.mxu1 %v7759_v16 }
 0x989   :  { %6889 = vmatpush1.bf16.msra.mxu0 %v7761_v19  ;;  %6726 = vmatprep.subr.bf16.mxu1 %v7768_v1 }
 0x98a   :  { %6890 = vmatprep.subr.bf16.mxu0 %v7770_v20 }
 0x98c   :  { %6727 = vmatpush1.bf16.msra.mxu1 %v7767_v50 }
 0x98d   :  { %6891 = vmatpush1.bf16.msra.mxu0 %v7769_v23  ;;  %6728 = vmatprep.subr.bf16.mxu1 %v7776_v3 }
 0x98e   :  { %6892 = vmatprep.subr.bf16.mxu0 %v7778_v25 }
 0x990   :  { %6729 = vmatpush1.bf16.msra.mxu1 %v7775_v28 }
 0x991   :  { %6893 = vmatpush1.bf16.msra.mxu0 %v7777_v31  ;;  %6730 = vmatprep.subr.bf16.mxu1 %v7784_v32 }
 0x992   :  { %6894 = vmatprep.subr.bf16.mxu0 %v7786_v2 }
 0x994   :  { %6731 = vmatpush1.bf16.msra.mxu1 %v7783_v38 }
 0x995   :  { %6895 = vmatpush1.bf16.msra.mxu0 %v7785_v41  ;;  %6732 = vmatprep.subr.bf16.mxu1 %v7792_v42 }
 0x996   :  { %6896 = vmatprep.subr.bf16.mxu0 %v7794_v60 }
 0x998   :  { %6733 = vmatpush1.bf16.msra.mxu1 %v7791_v17 }
 0x999   :  { %6897 = vmatpush1.bf16.msra.mxu0 %v7793_v47 }
 0x99b   :  { %6735 = vmatmul.mubr.bf16.vlgmr.msra.gmra.mrb[24].mxu1 %v9172_v45 }
 0x99c   :  { %6899 = vmatmul.mubr.bf16.vlgmr.msra.gmra.mrb[28].mxu0 %v9172_v45 }
 0xa6e   :  { %v6736_v56 = vpop.f32.mrb[24].mxu1 }
 0xa6f   :  { %v7952_v45 = vadd.f32 %v6736_v56, %v3670_v48  ;;  %v6900_v5 = vpop.f32.mrb[28].mxu0  ;;  %v6738_v24 = vpop.f32.mrb[25].mxu1 }
 0xa70   :  { %v7954_v51 = vadd.f32 %v6900_v5, %v3678_v49  ;;  %v7953_v40 = vadd.f32 %v6738_v24, %v3674_v10  ;;  %v6902_v52 = vpop.f32.mrb[29].mxu0  ;;  %v6740_v18 = vpop.f32.mrb[26].mxu1 }
 0xa71   :  { %6911 = vst [vmem:[#allocation29 + $0x20] sm:$0xff] %v7952_v45  ;;  %v7955_v29 = vadd.f32 %v6902_v52, %v3682_v8  ;;  %v6904_v53 = vpop.f32.mrb[30].mxu0  ;;  %v6741_v54 = vpop.f32.mrb[27].mxu1 }
 0xa72   :  { %6913 = vst [vmem:[#allocation29 + $0x30] sm:$0xff] %v7954_v51  ;;  %6912 = vst [vmem:[#allocation29 + $0x28] sm:$0xff] %v7953_v40  ;;  %v6905_v63 = vpop.f32.mrb[31].mxu0 }
 0xa73   :  { %6914 = vst [vmem:[#allocation29 + $0x38] sm:$0xff] %v7955_v29 }
 0xa74   :  { %8569 = shalt.err (!%p8566_p0)
}
 0xa75   :  { %s9255_s15 = sld [smem:[#allocation43_spill]] }
 0xa7b   :  { %s8570_s22 = scalar_lea.hbm %s9255_s15, 1024 }
 0xa7c   :  { %p8571_p1 = scmp.ne.s32.totalorder %s9255_s15, %s8570_s22  ;;  %p8574_p2 = scmp.lt.u32.totalorder %s8570_s22, %s9255_s15 }
 0xa7e   :  { %p8576_p3 = pnand %p8574_p2, %p8571_p1 }
 0xa80   :  { %8579 = shalt.err (!%p8576_p3)
}
 0xa81   :  { %6924 = dma.vmem_to_hbm [thread:$0]  %s6922_s0, 1024, %s9255_s15, [#allocation4]  }
 0xa82   :  { %8598 = dma.done.wait [#allocation4], 1024  }
 0xa83   :  { %8599 = vsyncadd [#allocation4], 4294966272 }
 0xa84   :  { %6928 = vsyncpa [#allocation3], 1 }
 0xa85   :  { %6929 = vsyncpa [#allocation6], 1 }
 0xa86   :  { %6930 = vsyncpa [#allocation9], 1 }
 0xa87   :  { %6931 = vsyncpa [#allocation12], 1 }
 0xa88   :  { %6932 = vsyncpa [#allocation15], 1 }
 0xa89   :  { %6933 = vsyncpa [#allocation18], 1 }
 0xa8a   :  { %6934 = vsyncpa [#allocation21], 1 }
 0xa8b   :  { %6935 = vsyncpa [#allocation24], 1 }
 0xa8c   :  { %6936 = vsyncpa [#allocation27], 1 }
 0xa8d   :  { %6937 = vsyncpa [#allocation4], 1 }

</bundles_post_ra>
